<compile_context>
chip_gen: v5e
topology: v5e:2x2
jax: 0.10.0
libtpu: 0.0.40
codegen_flags: <defaults>
</compile_context>

<pallas_src>
import jax
import jax.numpy as jnp
from jax.experimental import pallas as pl
from jax.experimental.pallas import tpu as pltpu

HIDDEN_DIM = 32
NUM_LAYERS = 1
DROPOUT = 0.1  # eval mode -> identity

SUBLANE = 8    # f32 sublane tile


def seq2seq_lstm_kernel(x_ref,
                        w_ih_enc_ref, b_enc_ref,
                        w_hh_f_ref, w_hh_b_ref,
                        w_ih_d_ref, w_hh_d_ref, b_d_ref,
                        w1_ref, b1_ref, w2_ref, b2_ref,
                        out_ref):
    """x_ref: (T, Bp, D) time-major, batch padded to a sublane multiple.
       out_ref: (T*Bp, 1) per-(t, b) scalar prediction."""
    x = x_ref[...]                                   # (T, B, D) f32
    T, B, D = x.shape
    H = w_hh_f_ref.shape[0]
    H4 = 4 * H

    w_hh_f = w_hh_f_ref[...]
    w_hh_b = w_hh_b_ref[...]
    w_hh_d = w_hh_d_ref[...]

    # ---- hoisted encoder input projection: one (T*B, D) @ (D, 8H) matmul.
    #      fwd gates live in lanes [0, 4H), bwd gates in [4H, 8H); biases folded in
    #      once (no per-step broadcast_in_dim inside the unrolled loops). ----
    gx_enc = (jnp.dot(x.reshape(T * B, D), w_ih_enc_ref[...],
                      preferred_element_type=jnp.float32)
              + b_enc_ref[...]).reshape(T, B, 2 * H4)

    def cell(gx_t, h, c, w_hh):
        # gx_t already holds x_t @ w_ih + b; only h @ w_hh stays on the serial path.
        gates = gx_t + jnp.dot(h, w_hh, preferred_element_type=jnp.float32)
        i = jax.nn.sigmoid(gates[:, 0 * H:1 * H])
        f = jax.nn.sigmoid(gates[:, 1 * H:2 * H])
        g = jnp.tanh(gates[:, 2 * H:3 * H])
        o = jax.nn.sigmoid(gates[:, 3 * H:4 * H])
        c_new = f * c + i * g
        h_new = o * jnp.tanh(c_new)
        return h_new, c_new

    zeros = jnp.zeros((B, H), jnp.float32)

    # ---- encoder: the independent fwd and bwd chains interleaved in one unrolled
    #      loop so the scheduler can overlap MXU/EUP work across directions. ----
    h_f, c_f = zeros, zeros
    h_b, c_b = zeros, zeros
    fwd = [None] * T
    bwd = [None] * T
    for t in range(T):
        tb = T - 1 - t
        h_f, c_f = cell(gx_enc[t, :, 0:H4], h_f, c_f, w_hh_f)
        h_b, c_b = cell(gx_enc[tb, :, H4:2 * H4], h_b, c_b, w_hh_b)
        fwd[t] = h_f
        bwd[tb] = h_b

    # ---- hoisted decoder input projection: one (T*B, 2H) @ (2H, 4H) matmul. ----
    enc = jnp.stack([jnp.concatenate([fwd[t], bwd[t]], axis=-1)
                     for t in range(T)], axis=0)                   # (T, B, 2H)
    gx_dec = (jnp.dot(enc.reshape(T * B, 2 * H), w_ih_d_ref[...],
                      preferred_element_type=jnp.float32)
              + b_d_ref[...]).reshape(T, B, H4)

    # ---- decoder recurrence: only h @ w_hh_d per serial step. ----
    h_d, c_d = zeros, zeros
    hs = [None] * T
    for t in range(T):
        h_d, c_d = cell(gx_dec[t], h_d, c_d, w_hh_d)
        hs[t] = h_d

    # ---- FC head hoisted out of the loop: one batched pass over all T steps.
    #      Dropout in the fc head is identity at eval time. ----
    hmat = jnp.stack(hs, axis=0).reshape(T * B, H)                 # (T*B, H)
    z = jnp.maximum(jnp.dot(hmat, w1_ref[...],
                            preferred_element_type=jnp.float32) + b1_ref[...], 0.0)
    out_ref[...] = (jnp.dot(z, w2_ref[...],
                            preferred_element_type=jnp.float32) + b2_ref[...])


def seq2seq_lstm(x, params):
    """x: (B, T, D) batch-first (like nn.LSTM(batch_first=True)). Returns (B, T)."""
    B, T, D = x.shape
    Bp = ((B + SUBLANE - 1) // SUBLANE) * SUBLANE

    # Time-major + pad batch to a sublane multiple so every per-step (Bp, .) op
    # fills full f32 vreg rows; padded rows never mix with real rows (all ops are
    # row-independent) and are sliced off below.
    xt = jnp.transpose(x, (1, 0, 2))
    if Bp != B:
        xt = jnp.pad(xt, ((0, 0), (0, Bp - B), (0, 0)))

    args = (xt,
            params['w_ih_enc'], params['b_enc'],
            params['w_hh_f'], params['w_hh_b'],
            params['w_ih_d'], params['w_hh_d'], params['b_d'],
            params['w1'], params['b1'], params['w2'], params['b2'])
    in_specs = [pl.BlockSpec(a.shape, lambda i, _nd=a.ndim: (0,) * _nd)
                for a in args]

    out = pl.pallas_call(
        seq2seq_lstm_kernel,
        out_shape=jax.ShapeDtypeStruct((T * Bp, 1), jnp.float32),
        grid=(1,),
        in_specs=in_specs,
        out_specs=pl.BlockSpec((T * Bp, 1), lambda i: (0, 0)),
        compiler_params=pltpu.CompilerParams(
            dimension_semantics=("arbitrary",)),
    )(*args)

    # (T*Bp, 1) -> (T, Bp) -> drop padded batch rows -> (B, T)
    return out.reshape(T, Bp)[:, :B].T


def init_params(key, input_dim, hidden):
    H, D, H2 = hidden, input_dim, hidden // 2
    bound = float(H) ** -0.5
    keys = jax.random.split(key, 16)

    def u(k_, shape):
        return jax.random.uniform(k_, shape, jnp.float32, -bound, bound)

    # PyTorch-shaped weights (out, in); gate order [i, f, g, o].
    w_ih_f = u(keys[0], (4 * H, D));     w_hh_f = u(keys[1], (4 * H, H))
    b_ih_f = u(keys[2], (4 * H,));       b_hh_f = u(keys[3], (4 * H,))
    w_ih_b = u(keys[4], (4 * H, D));     w_hh_b = u(keys[5], (4 * H, H))
    b_ih_b = u(keys[6], (4 * H,));       b_hh_b = u(keys[7], (4 * H,))
    w_ih_d = u(keys[8], (4 * H, 2 * H)); w_hh_d = u(keys[9], (4 * H, H))
    b_ih_d = u(keys[10], (4 * H,));      b_hh_d = u(keys[11], (4 * H,))
    w1 = u(keys[12], (H2, H));           b1 = u(keys[13], (H2,))
    w2 = u(keys[14], (1, H2));           b2 = u(keys[15], (1,))

    b_f = (b_ih_f + b_hh_f)[None, :]
    b_b = (b_ih_b + b_hh_b)[None, :]
    return dict(
        # packed / transposed (in, out) forms used by the kernel
        w_ih_enc=jnp.concatenate([w_ih_f.T, w_ih_b.T], axis=1),   # (D, 8H) 256-wide RHS
        b_enc=jnp.concatenate([b_f, b_b], axis=1),                # (1, 8H)
        w_hh_f=w_hh_f.T, w_hh_b=w_hh_b.T,
        w_ih_d=w_ih_d.T, w_hh_d=w_hh_d.T, b_d=(b_ih_d + b_hh_d)[None, :],
        w1=w1.T, b1=b1[None, :], w2=w2.T, b2=b2[None, :],
        # unpacked forms kept for the pure-JAX reference
        w_ih_f=w_ih_f.T, b_f=b_f, w_ih_b=w_ih_b.T, b_b=b_b,
    )


def reference(x, p):
    """Pure-JAX reference with identical (PyTorch-eval) semantics."""
    B, T, _ = x.shape
    H = p['w_hh_f'].shape[0]

    def cell(xt, h, c, wih, whh, b):
        g = xt @ wih + h @ whh + b
        i, f, gg, o = jnp.split(g, 4, axis=-1)
        i, f, o = jax.nn.sigmoid(i), jax.nn.sigmoid(f), jax.nn.sigmoid(o)
        gg = jnp.tanh(gg)
        c = f * c + i * gg
        return o * jnp.tanh(c), c

    z = jnp.zeros((B, H), jnp.float32)
    h, c = z, z
    fwd = []
    for t in range(T):
        h, c = cell(x[:, t, :], h, c, p['w_ih_f'], p['w_hh_f'], p['b_f'])
        fwd.append(h)
    h, c = z, z
    bwd = [None] * T
    for t in range(T - 1, -1, -1):
        h, c = cell(x[:, t, :], h, c, p['w_ih_b'], p['w_hh_b'], p['b_b'])
        bwd[t] = h
    h, c = z, z
    outs = []
    for t in range(T):
        e = jnp.concatenate([fwd[t], bwd[t]], axis=-1)
        h, c = cell(e, h, c, p['w_ih_d'], p['w_hh_d'], p['b_d'])
        zz = jnp.maximum(h @ p['w1'] + p['b1'], 0.0)
        outs.append(zz @ p['w2'] + p['b2'])
    return jnp.concatenate(outs, axis=-1)


if __name__ == "__main__":
    B, T, D, H = 2, 10, 8, HIDDEN_DIM   # 10-step sequence per module docstring
    key = jax.random.PRNGKey(0)
    kx, kp = jax.random.split(key)
    x = jax.random.normal(kx, (B, T, D), jnp.float32)
    params = init_params(kp, D, H)

    y = seq2seq_lstm(x, params)
    jax.block_until_ready(y)

    y_ref = reference(x, params)
    assert y.shape == (B, T)
    assert jnp.allclose(y, y_ref, atol=1e-5, rtol=1e-5)
    print("KERNEL_OK")
</pallas_src>

<mosaic_0001>
module attributes {stable_mosaic.version = 11 : i64} {
  func.func @seq2seq_lstm_kernel(%arg0: i32, %arg1: memref<10x8x8xf32, #tpu.memory_space<vmem>>, %arg2: memref<8x256xf32, #tpu.memory_space<vmem>>, %arg3: memref<1x256xf32, #tpu.memory_space<vmem>>, %arg4: memref<32x128xf32, #tpu.memory_space<vmem>>, %arg5: memref<32x128xf32, #tpu.memory_space<vmem>>, %arg6: memref<64x128xf32, #tpu.memory_space<vmem>>, %arg7: memref<32x128xf32, #tpu.memory_space<vmem>>, %arg8: memref<1x128xf32, #tpu.memory_space<vmem>>, %arg9: memref<32x16xf32, #tpu.memory_space<vmem>>, %arg10: memref<1x16xf32, #tpu.memory_space<vmem>>, %arg11: memref<16x1xf32, #tpu.memory_space<vmem>>, %arg12: memref<1x1xf32, #tpu.memory_space<vmem>>, %arg13: memref<80x1xf32, #tpu.memory_space<vmem>>) attributes {dimension_semantics = [#tpu.dimension_semantics<arbitrary>], iteration_bounds = array<i64: 1>, scalar_prefetch = 0 : i64, scratch_operands = 0 : i64, tpu.core_type = #tpu.core_type<tc>, window_params = [{pipeline_mode = #tpu.pipeline_mode<synchronous>, transform_indices = @transform_0, window_bounds = array<i64: 10, 8, 8>}, {pipeline_mode = #tpu.pipeline_mode<synchronous>, transform_indices = @transform_1, window_bounds = array<i64: 8, 256>}, {pipeline_mode = #tpu.pipeline_mode<synchronous>, transform_indices = @transform_2, window_bounds = array<i64: 1, 256>}, {pipeline_mode = #tpu.pipeline_mode<synchronous>, transform_indices = @transform_3, window_bounds = array<i64: 32, 128>}, {pipeline_mode = #tpu.pipeline_mode<synchronous>, transform_indices = @transform_4, window_bounds = array<i64: 32, 128>}, {pipeline_mode = #tpu.pipeline_mode<synchronous>, transform_indices = @transform_5, window_bounds = array<i64: 64, 128>}, {pipeline_mode = #tpu.pipeline_mode<synchronous>, transform_indices = @transform_6, window_bounds = array<i64: 32, 128>}, {pipeline_mode = #tpu.pipeline_mode<synchronous>, transform_indices = @transform_7, window_bounds = array<i64: 1, 128>}, {pipeline_mode = #tpu.pipeline_mode<synchronous>, transform_indices = @transform_8, window_bounds = array<i64: 32, 16>}, {pipeline_mode = #tpu.pipeline_mode<synchronous>, transform_indices = @transform_9, window_bounds = array<i64: 1, 16>}, {pipeline_mode = #tpu.pipeline_mode<synchronous>, transform_indices = @transform_10, window_bounds = array<i64: 16, 1>}, {pipeline_mode = #tpu.pipeline_mode<synchronous>, transform_indices = @transform_11, window_bounds = array<i64: 1, 1>}, {pipeline_mode = #tpu.pipeline_mode<synchronous>, transform_indices = @transform_12, window_bounds = array<i64: 80, 1>}]} {
    %c0 = arith.constant 0 : index
    %c0_0 = arith.constant 0 : index
    %c0_1 = arith.constant 0 : index
    %0 = vector.load %arg1[%c0, %c0_0, %c0_1] : memref<10x8x8xf32, #tpu.memory_space<vmem>>, vector<10x8x8xf32>
    %c0_2 = arith.constant 0 : index
    %c0_3 = arith.constant 0 : index
    %1 = vector.load %arg4[%c0_2, %c0_3] : memref<32x128xf32, #tpu.memory_space<vmem>>, vector<32x128xf32>
    %c0_4 = arith.constant 0 : index
    %c0_5 = arith.constant 0 : index
    %2 = vector.load %arg5[%c0_4, %c0_5] : memref<32x128xf32, #tpu.memory_space<vmem>>, vector<32x128xf32>
    %c0_6 = arith.constant 0 : index
    %c0_7 = arith.constant 0 : index
    %3 = vector.load %arg7[%c0_6, %c0_7] : memref<32x128xf32, #tpu.memory_space<vmem>>, vector<32x128xf32>
    %4 = vector.shape_cast %0 : vector<10x8x8xf32> to vector<80x8xf32>
    %c0_8 = arith.constant 0 : index
    %c0_9 = arith.constant 0 : index
    %5 = vector.load %arg2[%c0_8, %c0_9] : memref<8x256xf32, #tpu.memory_space<vmem>>, vector<8x256xf32>
    %cst = arith.constant dense<0.000000e+00> : vector<80x256xf32>
    %6 = tpu.matmul %4, %5, %cst {dimension_numbers = #tpu.dot_dimension_numbers<[1], [0], [0], [1], [0, 0, 1, 1], [], []>} : vector<80x8xf32>, vector<8x256xf32>, vector<80x256xf32> -> vector<80x256xf32>
    %c0_10 = arith.constant 0 : index
    %c0_11 = arith.constant 0 : index
    %7 = vector.load %arg3[%c0_10, %c0_11] : memref<1x256xf32, #tpu.memory_space<vmem>>, vector<1x256xf32>
    %8 = vector.broadcast %7 : vector<1x256xf32> to vector<80x256xf32>
    %9 = arith.addf %6, %8 : vector<80x256xf32>
    %10 = vector.shape_cast %9 : vector<80x256xf32> to vector<10x8x256xf32>
    %cst_12 = arith.constant 0.000000e+00 : f32
    %11 = vector.broadcast %cst_12 : f32 to vector<8x32xf32>
    %12 = vector.extract_strided_slice %10 {offsets = [0, 0, 0], sizes = [1, 8, 128], strides = [1, 1, 1]} : vector<10x8x256xf32> to vector<1x8x128xf32>
    %13 = vector.shape_cast %12 : vector<1x8x128xf32> to vector<8x128xf32>
    %cst_13 = arith.constant dense<0.000000e+00> : vector<8x128xf32>
    %14 = tpu.matmul %11, %1, %cst_13 {dimension_numbers = #tpu.dot_dimension_numbers<[1], [0], [0], [1], [0, 0, 1, 1], [], []>} : vector<8x32xf32>, vector<32x128xf32>, vector<8x128xf32> -> vector<8x128xf32>
    %15 = arith.addf %13, %14 : vector<8x128xf32>
    %16 = vector.extract_strided_slice %15 {offsets = [0, 0], sizes = [8, 32], strides = [1, 1]} : vector<8x128xf32> to vector<8x32xf32>
    %17 = arith.negf %16 : vector<8x32xf32>
    %18 = math.exp %17 : vector<8x32xf32>
    %cst_14 = arith.constant 1.000000e+00 : f32
    %19 = vector.broadcast %cst_14 : f32 to vector<8x32xf32>
    %20 = arith.addf %19, %18 : vector<8x32xf32>
    %21 = arith.divf %19, %20 : vector<8x32xf32>
    %22 = vector.extract_strided_slice %15 {offsets = [0, 32], sizes = [8, 32], strides = [1, 1]} : vector<8x128xf32> to vector<8x32xf32>
    %23 = arith.negf %22 : vector<8x32xf32>
    %24 = math.exp %23 : vector<8x32xf32>
    %cst_15 = arith.constant 1.000000e+00 : f32
    %25 = vector.broadcast %cst_15 : f32 to vector<8x32xf32>
    %26 = arith.addf %25, %24 : vector<8x32xf32>
    %27 = arith.divf %25, %26 : vector<8x32xf32>
    %28 = vector.extract_strided_slice %15 {offsets = [0, 64], sizes = [8, 32], strides = [1, 1]} : vector<8x128xf32> to vector<8x32xf32>
    %29 = math.tanh %28 : vector<8x32xf32>
    %30 = vector.extract_strided_slice %15 {offsets = [0, 96], sizes = [8, 32], strides = [1, 1]} : vector<8x128xf32> to vector<8x32xf32>
    %31 = arith.negf %30 : vector<8x32xf32>
    %32 = math.exp %31 : vector<8x32xf32>
    %cst_16 = arith.constant 1.000000e+00 : f32
    %33 = vector.broadcast %cst_16 : f32 to vector<8x32xf32>
    %34 = arith.addf %33, %32 : vector<8x32xf32>
    %35 = arith.divf %33, %34 : vector<8x32xf32>
    %36 = arith.mulf %27, %11 : vector<8x32xf32>
    %37 = arith.mulf %21, %29 : vector<8x32xf32>
    %38 = arith.addf %36, %37 : vector<8x32xf32>
    %39 = math.tanh %38 : vector<8x32xf32>
    %40 = arith.mulf %35, %39 : vector<8x32xf32>
    %41 = vector.extract_strided_slice %10 {offsets = [9, 0, 128], sizes = [1, 8, 128], strides = [1, 1, 1]} : vector<10x8x256xf32> to vector<1x8x128xf32>
    %42 = vector.shape_cast %41 : vector<1x8x128xf32> to vector<8x128xf32>
    %cst_17 = arith.constant dense<0.000000e+00> : vector<8x128xf32>
    %43 = tpu.matmul %11, %2, %cst_17 {dimension_numbers = #tpu.dot_dimension_numbers<[1], [0], [0], [1], [0, 0, 1, 1], [], []>} : vector<8x32xf32>, vector<32x128xf32>, vector<8x128xf32> -> vector<8x128xf32>
    %44 = arith.addf %42, %43 : vector<8x128xf32>
    %45 = vector.extract_strided_slice %44 {offsets = [0, 0], sizes = [8, 32], strides = [1, 1]} : vector<8x128xf32> to vector<8x32xf32>
    %46 = arith.negf %45 : vector<8x32xf32>
    %47 = math.exp %46 : vector<8x32xf32>
    %cst_18 = arith.constant 1.000000e+00 : f32
    %48 = vector.broadcast %cst_18 : f32 to vector<8x32xf32>
    %49 = arith.addf %48, %47 : vector<8x32xf32>
    %50 = arith.divf %48, %49 : vector<8x32xf32>
    %51 = vector.extract_strided_slice %44 {offsets = [0, 32], sizes = [8, 32], strides = [1, 1]} : vector<8x128xf32> to vector<8x32xf32>
    %52 = arith.negf %51 : vector<8x32xf32>
    %53 = math.exp %52 : vector<8x32xf32>
    %cst_19 = arith.constant 1.000000e+00 : f32
    %54 = vector.broadcast %cst_19 : f32 to vector<8x32xf32>
    %55 = arith.addf %54, %53 : vector<8x32xf32>
    %56 = arith.divf %54, %55 : vector<8x32xf32>
    %57 = vector.extract_strided_slice %44 {offsets = [0, 64], sizes = [8, 32], strides = [1, 1]} : vector<8x128xf32> to vector<8x32xf32>
    %58 = math.tanh %57 : vector<8x32xf32>
    %59 = vector.extract_strided_slice %44 {offsets = [0, 96], sizes = [8, 32], strides = [1, 1]} : vector<8x128xf32> to vector<8x32xf32>
    %60 = arith.negf %59 : vector<8x32xf32>
    %61 = math.exp %60 : vector<8x32xf32>
    %cst_20 = arith.constant 1.000000e+00 : f32
    %62 = vector.broadcast %cst_20 : f32 to vector<8x32xf32>
    %63 = arith.addf %62, %61 : vector<8x32xf32>
    %64 = arith.divf %62, %63 : vector<8x32xf32>
    %65 = arith.mulf %56, %11 : vector<8x32xf32>
    %66 = arith.mulf %50, %58 : vector<8x32xf32>
    %67 = arith.addf %65, %66 : vector<8x32xf32>
    %68 = math.tanh %67 : vector<8x32xf32>
    %69 = arith.mulf %64, %68 : vector<8x32xf32>
    %70 = vector.extract_strided_slice %10 {offsets = [1, 0, 0], sizes = [1, 8, 128], strides = [1, 1, 1]} : vector<10x8x256xf32> to vector<1x8x128xf32>
    %71 = vector.shape_cast %70 : vector<1x8x128xf32> to vector<8x128xf32>
    %cst_21 = arith.constant dense<0.000000e+00> : vector<8x128xf32>
    %72 = tpu.matmul %40, %1, %cst_21 {dimension_numbers = #tpu.dot_dimension_numbers<[1], [0], [0], [1], [0, 0, 1, 1], [], []>} : vector<8x32xf32>, vector<32x128xf32>, vector<8x128xf32> -> vector<8x128xf32>
    %73 = arith.addf %71, %72 : vector<8x128xf32>
    %74 = vector.extract_strided_slice %73 {offsets = [0, 0], sizes = [8, 32], strides = [1, 1]} : vector<8x128xf32> to vector<8x32xf32>
    %75 = arith.negf %74 : vector<8x32xf32>
    %76 = math.exp %75 : vector<8x32xf32>
    %cst_22 = arith.constant 1.000000e+00 : f32
    %77 = vector.broadcast %cst_22 : f32 to vector<8x32xf32>
    %78 = arith.addf %77, %76 : vector<8x32xf32>
    %79 = arith.divf %77, %78 : vector<8x32xf32>
    %80 = vector.extract_strided_slice %73 {offsets = [0, 32], sizes = [8, 32], strides = [1, 1]} : vector<8x128xf32> to vector<8x32xf32>
    %81 = arith.negf %80 : vector<8x32xf32>
    %82 = math.exp %81 : vector<8x32xf32>
    %cst_23 = arith.constant 1.000000e+00 : f32
    %83 = vector.broadcast %cst_23 : f32 to vector<8x32xf32>
    %84 = arith.addf %83, %82 : vector<8x32xf32>
    %85 = arith.divf %83, %84 : vector<8x32xf32>
    %86 = vector.extract_strided_slice %73 {offsets = [0, 64], sizes = [8, 32], strides = [1, 1]} : vector<8x128xf32> to vector<8x32xf32>
    %87 = math.tanh %86 : vector<8x32xf32>
    %88 = vector.extract_strided_slice %73 {offsets = [0, 96], sizes = [8, 32], strides = [1, 1]} : vector<8x128xf32> to vector<8x32xf32>
    %89 = arith.negf %88 : vector<8x32xf32>
    %90 = math.exp %89 : vector<8x32xf32>
    %cst_24 = arith.constant 1.000000e+00 : f32
    %91 = vector.broadcast %cst_24 : f32 to vector<8x32xf32>
    %92 = arith.addf %91, %90 : vector<8x32xf32>
    %93 = arith.divf %91, %92 : vector<8x32xf32>
    %94 = arith.mulf %85, %38 : vector<8x32xf32>
    %95 = arith.mulf %79, %87 : vector<8x32xf32>
    %96 = arith.addf %94, %95 : vector<8x32xf32>
    %97 = math.tanh %96 : vector<8x32xf32>
    %98 = arith.mulf %93, %97 : vector<8x32xf32>
    %99 = vector.extract_strided_slice %10 {offsets = [8, 0, 128], sizes = [1, 8, 128], strides = [1, 1, 1]} : vector<10x8x256xf32> to vector<1x8x128xf32>
    %100 = vector.shape_cast %99 : vector<1x8x128xf32> to vector<8x128xf32>
    %cst_25 = arith.constant dense<0.000000e+00> : vector<8x128xf32>
    %101 = tpu.matmul %69, %2, %cst_25 {dimension_numbers = #tpu.dot_dimension_numbers<[1], [0], [0], [1], [0, 0, 1, 1], [], []>} : vector<8x32xf32>, vector<32x128xf32>, vector<8x128xf32> -> vector<8x128xf32>
    %102 = arith.addf %100, %101 : vector<8x128xf32>
    %103 = vector.extract_strided_slice %102 {offsets = [0, 0], sizes = [8, 32], strides = [1, 1]} : vector<8x128xf32> to vector<8x32xf32>
    %104 = arith.negf %103 : vector<8x32xf32>
    %105 = math.exp %104 : vector<8x32xf32>
    %cst_26 = arith.constant 1.000000e+00 : f32
    %106 = vector.broadcast %cst_26 : f32 to vector<8x32xf32>
    %107 = arith.addf %106, %105 : vector<8x32xf32>
    %108 = arith.divf %106, %107 : vector<8x32xf32>
    %109 = vector.extract_strided_slice %102 {offsets = [0, 32], sizes = [8, 32], strides = [1, 1]} : vector<8x128xf32> to vector<8x32xf32>
    %110 = arith.negf %109 : vector<8x32xf32>
    %111 = math.exp %110 : vector<8x32xf32>
    %cst_27 = arith.constant 1.000000e+00 : f32
    %112 = vector.broadcast %cst_27 : f32 to vector<8x32xf32>
    %113 = arith.addf %112, %111 : vector<8x32xf32>
    %114 = arith.divf %112, %113 : vector<8x32xf32>
    %115 = vector.extract_strided_slice %102 {offsets = [0, 64], sizes = [8, 32], strides = [1, 1]} : vector<8x128xf32> to vector<8x32xf32>
    %116 = math.tanh %115 : vector<8x32xf32>
    %117 = vector.extract_strided_slice %102 {offsets = [0, 96], sizes = [8, 32], strides = [1, 1]} : vector<8x128xf32> to vector<8x32xf32>
    %118 = arith.negf %117 : vector<8x32xf32>
    %119 = math.exp %118 : vector<8x32xf32>
    %cst_28 = arith.constant 1.000000e+00 : f32
    %120 = vector.broadcast %cst_28 : f32 to vector<8x32xf32>
    %121 = arith.addf %120, %119 : vector<8x32xf32>
    %122 = arith.divf %120, %121 : vector<8x32xf32>
    %123 = arith.mulf %114, %67 : vector<8x32xf32>
    %124 = arith.mulf %108, %116 : vector<8x32xf32>
    %125 = arith.addf %123, %124 : vector<8x32xf32>
    %126 = math.tanh %125 : vector<8x32xf32>
    %127 = arith.mulf %122, %126 : vector<8x32xf32>
    %128 = vector.extract_strided_slice %10 {offsets = [2, 0, 0], sizes = [1, 8, 128], strides = [1, 1, 1]} : vector<10x8x256xf32> to vector<1x8x128xf32>
    %129 = vector.shape_cast %128 : vector<1x8x128xf32> to vector<8x128xf32>
    %cst_29 = arith.constant dense<0.000000e+00> : vector<8x128xf32>
    %130 = tpu.matmul %98, %1, %cst_29 {dimension_numbers = #tpu.dot_dimension_numbers<[1], [0], [0], [1], [0, 0, 1, 1], [], []>} : vector<8x32xf32>, vector<32x128xf32>, vector<8x128xf32> -> vector<8x128xf32>
    %131 = arith.addf %129, %130 : vector<8x128xf32>
    %132 = vector.extract_strided_slice %131 {offsets = [0, 0], sizes = [8, 32], strides = [1, 1]} : vector<8x128xf32> to vector<8x32xf32>
    %133 = arith.negf %132 : vector<8x32xf32>
    %134 = math.exp %133 : vector<8x32xf32>
    %cst_30 = arith.constant 1.000000e+00 : f32
    %135 = vector.broadcast %cst_30 : f32 to vector<8x32xf32>
    %136 = arith.addf %135, %134 : vector<8x32xf32>
    %137 = arith.divf %135, %136 : vector<8x32xf32>
    %138 = vector.extract_strided_slice %131 {offsets = [0, 32], sizes = [8, 32], strides = [1, 1]} : vector<8x128xf32> to vector<8x32xf32>
    %139 = arith.negf %138 : vector<8x32xf32>
    %140 = math.exp %139 : vector<8x32xf32>
    %cst_31 = arith.constant 1.000000e+00 : f32
    %141 = vector.broadcast %cst_31 : f32 to vector<8x32xf32>
    %142 = arith.addf %141, %140 : vector<8x32xf32>
    %143 = arith.divf %141, %142 : vector<8x32xf32>
    %144 = vector.extract_strided_slice %131 {offsets = [0, 64], sizes = [8, 32], strides = [1, 1]} : vector<8x128xf32> to vector<8x32xf32>
    %145 = math.tanh %144 : vector<8x32xf32>
    %146 = vector.extract_strided_slice %131 {offsets = [0, 96], sizes = [8, 32], strides = [1, 1]} : vector<8x128xf32> to vector<8x32xf32>
    %147 = arith.negf %146 : vector<8x32xf32>
    %148 = math.exp %147 : vector<8x32xf32>
    %cst_32 = arith.constant 1.000000e+00 : f32
    %149 = vector.broadcast %cst_32 : f32 to vector<8x32xf32>
    %150 = arith.addf %149, %148 : vector<8x32xf32>
    %151 = arith.divf %149, %150 : vector<8x32xf32>
    %152 = arith.mulf %143, %96 : vector<8x32xf32>
    %153 = arith.mulf %137, %145 : vector<8x32xf32>
    %154 = arith.addf %152, %153 : vector<8x32xf32>
    %155 = math.tanh %154 : vector<8x32xf32>
    %156 = arith.mulf %151, %155 : vector<8x32xf32>
    %157 = vector.extract_strided_slice %10 {offsets = [7, 0, 128], sizes = [1, 8, 128], strides = [1, 1, 1]} : vector<10x8x256xf32> to vector<1x8x128xf32>
    %158 = vector.shape_cast %157 : vector<1x8x128xf32> to vector<8x128xf32>
    %cst_33 = arith.constant dense<0.000000e+00> : vector<8x128xf32>
    %159 = tpu.matmul %127, %2, %cst_33 {dimension_numbers = #tpu.dot_dimension_numbers<[1], [0], [0], [1], [0, 0, 1, 1], [], []>} : vector<8x32xf32>, vector<32x128xf32>, vector<8x128xf32> -> vector<8x128xf32>
    %160 = arith.addf %158, %159 : vector<8x128xf32>
    %161 = vector.extract_strided_slice %160 {offsets = [0, 0], sizes = [8, 32], strides = [1, 1]} : vector<8x128xf32> to vector<8x32xf32>
    %162 = arith.negf %161 : vector<8x32xf32>
    %163 = math.exp %162 : vector<8x32xf32>
    %cst_34 = arith.constant 1.000000e+00 : f32
    %164 = vector.broadcast %cst_34 : f32 to vector<8x32xf32>
    %165 = arith.addf %164, %163 : vector<8x32xf32>
    %166 = arith.divf %164, %165 : vector<8x32xf32>
    %167 = vector.extract_strided_slice %160 {offsets = [0, 32], sizes = [8, 32], strides = [1, 1]} : vector<8x128xf32> to vector<8x32xf32>
    %168 = arith.negf %167 : vector<8x32xf32>
    %169 = math.exp %168 : vector<8x32xf32>
    %cst_35 = arith.constant 1.000000e+00 : f32
    %170 = vector.broadcast %cst_35 : f32 to vector<8x32xf32>
    %171 = arith.addf %170, %169 : vector<8x32xf32>
    %172 = arith.divf %170, %171 : vector<8x32xf32>
    %173 = vector.extract_strided_slice %160 {offsets = [0, 64], sizes = [8, 32], strides = [1, 1]} : vector<8x128xf32> to vector<8x32xf32>
    %174 = math.tanh %173 : vector<8x32xf32>
    %175 = vector.extract_strided_slice %160 {offsets = [0, 96], sizes = [8, 32], strides = [1, 1]} : vector<8x128xf32> to vector<8x32xf32>
    %176 = arith.negf %175 : vector<8x32xf32>
    %177 = math.exp %176 : vector<8x32xf32>
    %cst_36 = arith.constant 1.000000e+00 : f32
    %178 = vector.broadcast %cst_36 : f32 to vector<8x32xf32>
    %179 = arith.addf %178, %177 : vector<8x32xf32>
    %180 = arith.divf %178, %179 : vector<8x32xf32>
    %181 = arith.mulf %172, %125 : vector<8x32xf32>
    %182 = arith.mulf %166, %174 : vector<8x32xf32>
    %183 = arith.addf %181, %182 : vector<8x32xf32>
    %184 = math.tanh %183 : vector<8x32xf32>
    %185 = arith.mulf %180, %184 : vector<8x32xf32>
    %186 = vector.extract_strided_slice %10 {offsets = [3, 0, 0], sizes = [1, 8, 128], strides = [1, 1, 1]} : vector<10x8x256xf32> to vector<1x8x128xf32>
    %187 = vector.shape_cast %186 : vector<1x8x128xf32> to vector<8x128xf32>
    %cst_37 = arith.constant dense<0.000000e+00> : vector<8x128xf32>
    %188 = tpu.matmul %156, %1, %cst_37 {dimension_numbers = #tpu.dot_dimension_numbers<[1], [0], [0], [1], [0, 0, 1, 1], [], []>} : vector<8x32xf32>, vector<32x128xf32>, vector<8x128xf32> -> vector<8x128xf32>
    %189 = arith.addf %187, %188 : vector<8x128xf32>
    %190 = vector.extract_strided_slice %189 {offsets = [0, 0], sizes = [8, 32], strides = [1, 1]} : vector<8x128xf32> to vector<8x32xf32>
    %191 = arith.negf %190 : vector<8x32xf32>
    %192 = math.exp %191 : vector<8x32xf32>
    %cst_38 = arith.constant 1.000000e+00 : f32
    %193 = vector.broadcast %cst_38 : f32 to vector<8x32xf32>
    %194 = arith.addf %193, %192 : vector<8x32xf32>
    %195 = arith.divf %193, %194 : vector<8x32xf32>
    %196 = vector.extract_strided_slice %189 {offsets = [0, 32], sizes = [8, 32], strides = [1, 1]} : vector<8x128xf32> to vector<8x32xf32>
    %197 = arith.negf %196 : vector<8x32xf32>
    %198 = math.exp %197 : vector<8x32xf32>
    %cst_39 = arith.constant 1.000000e+00 : f32
    %199 = vector.broadcast %cst_39 : f32 to vector<8x32xf32>
    %200 = arith.addf %199, %198 : vector<8x32xf32>
    %201 = arith.divf %199, %200 : vector<8x32xf32>
    %202 = vector.extract_strided_slice %189 {offsets = [0, 64], sizes = [8, 32], strides = [1, 1]} : vector<8x128xf32> to vector<8x32xf32>
    %203 = math.tanh %202 : vector<8x32xf32>
    %204 = vector.extract_strided_slice %189 {offsets = [0, 96], sizes = [8, 32], strides = [1, 1]} : vector<8x128xf32> to vector<8x32xf32>
    %205 = arith.negf %204 : vector<8x32xf32>
    %206 = math.exp %205 : vector<8x32xf32>
    %cst_40 = arith.constant 1.000000e+00 : f32
    %207 = vector.broadcast %cst_40 : f32 to vector<8x32xf32>
    %208 = arith.addf %207, %206 : vector<8x32xf32>
    %209 = arith.divf %207, %208 : vector<8x32xf32>
    %210 = arith.mulf %201, %154 : vector<8x32xf32>
    %211 = arith.mulf %195, %203 : vector<8x32xf32>
    %212 = arith.addf %210, %211 : vector<8x32xf32>
    %213 = math.tanh %212 : vector<8x32xf32>
    %214 = arith.mulf %209, %213 : vector<8x32xf32>
    %215 = vector.extract_strided_slice %10 {offsets = [6, 0, 128], sizes = [1, 8, 128], strides = [1, 1, 1]} : vector<10x8x256xf32> to vector<1x8x128xf32>
    %216 = vector.shape_cast %215 : vector<1x8x128xf32> to vector<8x128xf32>
    %cst_41 = arith.constant dense<0.000000e+00> : vector<8x128xf32>
    %217 = tpu.matmul %185, %2, %cst_41 {dimension_numbers = #tpu.dot_dimension_numbers<[1], [0], [0], [1], [0, 0, 1, 1], [], []>} : vector<8x32xf32>, vector<32x128xf32>, vector<8x128xf32> -> vector<8x128xf32>
    %218 = arith.addf %216, %217 : vector<8x128xf32>
    %219 = vector.extract_strided_slice %218 {offsets = [0, 0], sizes = [8, 32], strides = [1, 1]} : vector<8x128xf32> to vector<8x32xf32>
    %220 = arith.negf %219 : vector<8x32xf32>
    %221 = math.exp %220 : vector<8x32xf32>
    %cst_42 = arith.constant 1.000000e+00 : f32
    %222 = vector.broadcast %cst_42 : f32 to vector<8x32xf32>
    %223 = arith.addf %222, %221 : vector<8x32xf32>
    %224 = arith.divf %222, %223 : vector<8x32xf32>
    %225 = vector.extract_strided_slice %218 {offsets = [0, 32], sizes = [8, 32], strides = [1, 1]} : vector<8x128xf32> to vector<8x32xf32>
    %226 = arith.negf %225 : vector<8x32xf32>
    %227 = math.exp %226 : vector<8x32xf32>
    %cst_43 = arith.constant 1.000000e+00 : f32
    %228 = vector.broadcast %cst_43 : f32 to vector<8x32xf32>
    %229 = arith.addf %228, %227 : vector<8x32xf32>
    %230 = arith.divf %228, %229 : vector<8x32xf32>
    %231 = vector.extract_strided_slice %218 {offsets = [0, 64], sizes = [8, 32], strides = [1, 1]} : vector<8x128xf32> to vector<8x32xf32>
    %232 = math.tanh %231 : vector<8x32xf32>
    %233 = vector.extract_strided_slice %218 {offsets = [0, 96], sizes = [8, 32], strides = [1, 1]} : vector<8x128xf32> to vector<8x32xf32>
    %234 = arith.negf %233 : vector<8x32xf32>
    %235 = math.exp %234 : vector<8x32xf32>
    %cst_44 = arith.constant 1.000000e+00 : f32
    %236 = vector.broadcast %cst_44 : f32 to vector<8x32xf32>
    %237 = arith.addf %236, %235 : vector<8x32xf32>
    %238 = arith.divf %236, %237 : vector<8x32xf32>
    %239 = arith.mulf %230, %183 : vector<8x32xf32>
    %240 = arith.mulf %224, %232 : vector<8x32xf32>
    %241 = arith.addf %239, %240 : vector<8x32xf32>
    %242 = math.tanh %241 : vector<8x32xf32>
    %243 = arith.mulf %238, %242 : vector<8x32xf32>
    %244 = vector.extract_strided_slice %10 {offsets = [4, 0, 0], sizes = [1, 8, 128], strides = [1, 1, 1]} : vector<10x8x256xf32> to vector<1x8x128xf32>
    %245 = vector.shape_cast %244 : vector<1x8x128xf32> to vector<8x128xf32>
    %cst_45 = arith.constant dense<0.000000e+00> : vector<8x128xf32>
    %246 = tpu.matmul %214, %1, %cst_45 {dimension_numbers = #tpu.dot_dimension_numbers<[1], [0], [0], [1], [0, 0, 1, 1], [], []>} : vector<8x32xf32>, vector<32x128xf32>, vector<8x128xf32> -> vector<8x128xf32>
    %247 = arith.addf %245, %246 : vector<8x128xf32>
    %248 = vector.extract_strided_slice %247 {offsets = [0, 0], sizes = [8, 32], strides = [1, 1]} : vector<8x128xf32> to vector<8x32xf32>
    %249 = arith.negf %248 : vector<8x32xf32>
    %250 = math.exp %249 : vector<8x32xf32>
    %cst_46 = arith.constant 1.000000e+00 : f32
    %251 = vector.broadcast %cst_46 : f32 to vector<8x32xf32>
    %252 = arith.addf %251, %250 : vector<8x32xf32>
    %253 = arith.divf %251, %252 : vector<8x32xf32>
    %254 = vector.extract_strided_slice %247 {offsets = [0, 32], sizes = [8, 32], strides = [1, 1]} : vector<8x128xf32> to vector<8x32xf32>
    %255 = arith.negf %254 : vector<8x32xf32>
    %256 = math.exp %255 : vector<8x32xf32>
    %cst_47 = arith.constant 1.000000e+00 : f32
    %257 = vector.broadcast %cst_47 : f32 to vector<8x32xf32>
    %258 = arith.addf %257, %256 : vector<8x32xf32>
    %259 = arith.divf %257, %258 : vector<8x32xf32>
    %260 = vector.extract_strided_slice %247 {offsets = [0, 64], sizes = [8, 32], strides = [1, 1]} : vector<8x128xf32> to vector<8x32xf32>
    %261 = math.tanh %260 : vector<8x32xf32>
    %262 = vector.extract_strided_slice %247 {offsets = [0, 96], sizes = [8, 32], strides = [1, 1]} : vector<8x128xf32> to vector<8x32xf32>
    %263 = arith.negf %262 : vector<8x32xf32>
    %264 = math.exp %263 : vector<8x32xf32>
    %cst_48 = arith.constant 1.000000e+00 : f32
    %265 = vector.broadcast %cst_48 : f32 to vector<8x32xf32>
    %266 = arith.addf %265, %264 : vector<8x32xf32>
    %267 = arith.divf %265, %266 : vector<8x32xf32>
    %268 = arith.mulf %259, %212 : vector<8x32xf32>
    %269 = arith.mulf %253, %261 : vector<8x32xf32>
    %270 = arith.addf %268, %269 : vector<8x32xf32>
    %271 = math.tanh %270 : vector<8x32xf32>
    %272 = arith.mulf %267, %271 : vector<8x32xf32>
    %273 = vector.extract_strided_slice %10 {offsets = [5, 0, 128], sizes = [1, 8, 128], strides = [1, 1, 1]} : vector<10x8x256xf32> to vector<1x8x128xf32>
    %274 = vector.shape_cast %273 : vector<1x8x128xf32> to vector<8x128xf32>
    %cst_49 = arith.constant dense<0.000000e+00> : vector<8x128xf32>
    %275 = tpu.matmul %243, %2, %cst_49 {dimension_numbers = #tpu.dot_dimension_numbers<[1], [0], [0], [1], [0, 0, 1, 1], [], []>} : vector<8x32xf32>, vector<32x128xf32>, vector<8x128xf32> -> vector<8x128xf32>
    %276 = arith.addf %274, %275 : vector<8x128xf32>
    %277 = vector.extract_strided_slice %276 {offsets = [0, 0], sizes = [8, 32], strides = [1, 1]} : vector<8x128xf32> to vector<8x32xf32>
    %278 = arith.negf %277 : vector<8x32xf32>
    %279 = math.exp %278 : vector<8x32xf32>
    %cst_50 = arith.constant 1.000000e+00 : f32
    %280 = vector.broadcast %cst_50 : f32 to vector<8x32xf32>
    %281 = arith.addf %280, %279 : vector<8x32xf32>
    %282 = arith.divf %280, %281 : vector<8x32xf32>
    %283 = vector.extract_strided_slice %276 {offsets = [0, 32], sizes = [8, 32], strides = [1, 1]} : vector<8x128xf32> to vector<8x32xf32>
    %284 = arith.negf %283 : vector<8x32xf32>
    %285 = math.exp %284 : vector<8x32xf32>
    %cst_51 = arith.constant 1.000000e+00 : f32
    %286 = vector.broadcast %cst_51 : f32 to vector<8x32xf32>
    %287 = arith.addf %286, %285 : vector<8x32xf32>
    %288 = arith.divf %286, %287 : vector<8x32xf32>
    %289 = vector.extract_strided_slice %276 {offsets = [0, 64], sizes = [8, 32], strides = [1, 1]} : vector<8x128xf32> to vector<8x32xf32>
    %290 = math.tanh %289 : vector<8x32xf32>
    %291 = vector.extract_strided_slice %276 {offsets = [0, 96], sizes = [8, 32], strides = [1, 1]} : vector<8x128xf32> to vector<8x32xf32>
    %292 = arith.negf %291 : vector<8x32xf32>
    %293 = math.exp %292 : vector<8x32xf32>
    %cst_52 = arith.constant 1.000000e+00 : f32
    %294 = vector.broadcast %cst_52 : f32 to vector<8x32xf32>
    %295 = arith.addf %294, %293 : vector<8x32xf32>
    %296 = arith.divf %294, %295 : vector<8x32xf32>
    %297 = arith.mulf %288, %241 : vector<8x32xf32>
    %298 = arith.mulf %282, %290 : vector<8x32xf32>
    %299 = arith.addf %297, %298 : vector<8x32xf32>
    %300 = math.tanh %299 : vector<8x32xf32>
    %301 = arith.mulf %296, %300 : vector<8x32xf32>
    %302 = vector.extract_strided_slice %10 {offsets = [5, 0, 0], sizes = [1, 8, 128], strides = [1, 1, 1]} : vector<10x8x256xf32> to vector<1x8x128xf32>
    %303 = vector.shape_cast %302 : vector<1x8x128xf32> to vector<8x128xf32>
    %cst_53 = arith.constant dense<0.000000e+00> : vector<8x128xf32>
    %304 = tpu.matmul %272, %1, %cst_53 {dimension_numbers = #tpu.dot_dimension_numbers<[1], [0], [0], [1], [0, 0, 1, 1], [], []>} : vector<8x32xf32>, vector<32x128xf32>, vector<8x128xf32> -> vector<8x128xf32>
    %305 = arith.addf %303, %304 : vector<8x128xf32>
    %306 = vector.extract_strided_slice %305 {offsets = [0, 0], sizes = [8, 32], strides = [1, 1]} : vector<8x128xf32> to vector<8x32xf32>
    %307 = arith.negf %306 : vector<8x32xf32>
    %308 = math.exp %307 : vector<8x32xf32>
    %cst_54 = arith.constant 1.000000e+00 : f32
    %309 = vector.broadcast %cst_54 : f32 to vector<8x32xf32>
    %310 = arith.addf %309, %308 : vector<8x32xf32>
    %311 = arith.divf %309, %310 : vector<8x32xf32>
    %312 = vector.extract_strided_slice %305 {offsets = [0, 32], sizes = [8, 32], strides = [1, 1]} : vector<8x128xf32> to vector<8x32xf32>
    %313 = arith.negf %312 : vector<8x32xf32>
    %314 = math.exp %313 : vector<8x32xf32>
    %cst_55 = arith.constant 1.000000e+00 : f32
    %315 = vector.broadcast %cst_55 : f32 to vector<8x32xf32>
    %316 = arith.addf %315, %314 : vector<8x32xf32>
    %317 = arith.divf %315, %316 : vector<8x32xf32>
    %318 = vector.extract_strided_slice %305 {offsets = [0, 64], sizes = [8, 32], strides = [1, 1]} : vector<8x128xf32> to vector<8x32xf32>
    %319 = math.tanh %318 : vector<8x32xf32>
    %320 = vector.extract_strided_slice %305 {offsets = [0, 96], sizes = [8, 32], strides = [1, 1]} : vector<8x128xf32> to vector<8x32xf32>
    %321 = arith.negf %320 : vector<8x32xf32>
    %322 = math.exp %321 : vector<8x32xf32>
    %cst_56 = arith.constant 1.000000e+00 : f32
    %323 = vector.broadcast %cst_56 : f32 to vector<8x32xf32>
    %324 = arith.addf %323, %322 : vector<8x32xf32>
    %325 = arith.divf %323, %324 : vector<8x32xf32>
    %326 = arith.mulf %317, %270 : vector<8x32xf32>
    %327 = arith.mulf %311, %319 : vector<8x32xf32>
    %328 = arith.addf %326, %327 : vector<8x32xf32>
    %329 = math.tanh %328 : vector<8x32xf32>
    %330 = arith.mulf %325, %329 : vector<8x32xf32>
    %331 = vector.extract_strided_slice %10 {offsets = [4, 0, 128], sizes = [1, 8, 128], strides = [1, 1, 1]} : vector<10x8x256xf32> to vector<1x8x128xf32>
    %332 = vector.shape_cast %331 : vector<1x8x128xf32> to vector<8x128xf32>
    %cst_57 = arith.constant dense<0.000000e+00> : vector<8x128xf32>
    %333 = tpu.matmul %301, %2, %cst_57 {dimension_numbers = #tpu.dot_dimension_numbers<[1], [0], [0], [1], [0, 0, 1, 1], [], []>} : vector<8x32xf32>, vector<32x128xf32>, vector<8x128xf32> -> vector<8x128xf32>
    %334 = arith.addf %332, %333 : vector<8x128xf32>
    %335 = vector.extract_strided_slice %334 {offsets = [0, 0], sizes = [8, 32], strides = [1, 1]} : vector<8x128xf32> to vector<8x32xf32>
    %336 = arith.negf %335 : vector<8x32xf32>
    %337 = math.exp %336 : vector<8x32xf32>
    %cst_58 = arith.constant 1.000000e+00 : f32
    %338 = vector.broadcast %cst_58 : f32 to vector<8x32xf32>
    %339 = arith.addf %338, %337 : vector<8x32xf32>
    %340 = arith.divf %338, %339 : vector<8x32xf32>
    %341 = vector.extract_strided_slice %334 {offsets = [0, 32], sizes = [8, 32], strides = [1, 1]} : vector<8x128xf32> to vector<8x32xf32>
    %342 = arith.negf %341 : vector<8x32xf32>
    %343 = math.exp %342 : vector<8x32xf32>
    %cst_59 = arith.constant 1.000000e+00 : f32
    %344 = vector.broadcast %cst_59 : f32 to vector<8x32xf32>
    %345 = arith.addf %344, %343 : vector<8x32xf32>
    %346 = arith.divf %344, %345 : vector<8x32xf32>
    %347 = vector.extract_strided_slice %334 {offsets = [0, 64], sizes = [8, 32], strides = [1, 1]} : vector<8x128xf32> to vector<8x32xf32>
    %348 = math.tanh %347 : vector<8x32xf32>
    %349 = vector.extract_strided_slice %334 {offsets = [0, 96], sizes = [8, 32], strides = [1, 1]} : vector<8x128xf32> to vector<8x32xf32>
    %350 = arith.negf %349 : vector<8x32xf32>
    %351 = math.exp %350 : vector<8x32xf32>
    %cst_60 = arith.constant 1.000000e+00 : f32
    %352 = vector.broadcast %cst_60 : f32 to vector<8x32xf32>
    %353 = arith.addf %352, %351 : vector<8x32xf32>
    %354 = arith.divf %352, %353 : vector<8x32xf32>
    %355 = arith.mulf %346, %299 : vector<8x32xf32>
    %356 = arith.mulf %340, %348 : vector<8x32xf32>
    %357 = arith.addf %355, %356 : vector<8x32xf32>
    %358 = math.tanh %357 : vector<8x32xf32>
    %359 = arith.mulf %354, %358 : vector<8x32xf32>
    %360 = vector.extract_strided_slice %10 {offsets = [6, 0, 0], sizes = [1, 8, 128], strides = [1, 1, 1]} : vector<10x8x256xf32> to vector<1x8x128xf32>
    %361 = vector.shape_cast %360 : vector<1x8x128xf32> to vector<8x128xf32>
    %cst_61 = arith.constant dense<0.000000e+00> : vector<8x128xf32>
    %362 = tpu.matmul %330, %1, %cst_61 {dimension_numbers = #tpu.dot_dimension_numbers<[1], [0], [0], [1], [0, 0, 1, 1], [], []>} : vector<8x32xf32>, vector<32x128xf32>, vector<8x128xf32> -> vector<8x128xf32>
    %363 = arith.addf %361, %362 : vector<8x128xf32>
    %364 = vector.extract_strided_slice %363 {offsets = [0, 0], sizes = [8, 32], strides = [1, 1]} : vector<8x128xf32> to vector<8x32xf32>
    %365 = arith.negf %364 : vector<8x32xf32>
    %366 = math.exp %365 : vector<8x32xf32>
    %cst_62 = arith.constant 1.000000e+00 : f32
    %367 = vector.broadcast %cst_62 : f32 to vector<8x32xf32>
    %368 = arith.addf %367, %366 : vector<8x32xf32>
    %369 = arith.divf %367, %368 : vector<8x32xf32>
    %370 = vector.extract_strided_slice %363 {offsets = [0, 32], sizes = [8, 32], strides = [1, 1]} : vector<8x128xf32> to vector<8x32xf32>
    %371 = arith.negf %370 : vector<8x32xf32>
    %372 = math.exp %371 : vector<8x32xf32>
    %cst_63 = arith.constant 1.000000e+00 : f32
    %373 = vector.broadcast %cst_63 : f32 to vector<8x32xf32>
    %374 = arith.addf %373, %372 : vector<8x32xf32>
    %375 = arith.divf %373, %374 : vector<8x32xf32>
    %376 = vector.extract_strided_slice %363 {offsets = [0, 64], sizes = [8, 32], strides = [1, 1]} : vector<8x128xf32> to vector<8x32xf32>
    %377 = math.tanh %376 : vector<8x32xf32>
    %378 = vector.extract_strided_slice %363 {offsets = [0, 96], sizes = [8, 32], strides = [1, 1]} : vector<8x128xf32> to vector<8x32xf32>
    %379 = arith.negf %378 : vector<8x32xf32>
    %380 = math.exp %379 : vector<8x32xf32>
    %cst_64 = arith.constant 1.000000e+00 : f32
    %381 = vector.broadcast %cst_64 : f32 to vector<8x32xf32>
    %382 = arith.addf %381, %380 : vector<8x32xf32>
    %383 = arith.divf %381, %382 : vector<8x32xf32>
    %384 = arith.mulf %375, %328 : vector<8x32xf32>
    %385 = arith.mulf %369, %377 : vector<8x32xf32>
    %386 = arith.addf %384, %385 : vector<8x32xf32>
    %387 = math.tanh %386 : vector<8x32xf32>
    %388 = arith.mulf %383, %387 : vector<8x32xf32>
    %389 = vector.extract_strided_slice %10 {offsets = [3, 0, 128], sizes = [1, 8, 128], strides = [1, 1, 1]} : vector<10x8x256xf32> to vector<1x8x128xf32>
    %390 = vector.shape_cast %389 : vector<1x8x128xf32> to vector<8x128xf32>
    %cst_65 = arith.constant dense<0.000000e+00> : vector<8x128xf32>
    %391 = tpu.matmul %359, %2, %cst_65 {dimension_numbers = #tpu.dot_dimension_numbers<[1], [0], [0], [1], [0, 0, 1, 1], [], []>} : vector<8x32xf32>, vector<32x128xf32>, vector<8x128xf32> -> vector<8x128xf32>
    %392 = arith.addf %390, %391 : vector<8x128xf32>
    %393 = vector.extract_strided_slice %392 {offsets = [0, 0], sizes = [8, 32], strides = [1, 1]} : vector<8x128xf32> to vector<8x32xf32>
    %394 = arith.negf %393 : vector<8x32xf32>
    %395 = math.exp %394 : vector<8x32xf32>
    %cst_66 = arith.constant 1.000000e+00 : f32
    %396 = vector.broadcast %cst_66 : f32 to vector<8x32xf32>
    %397 = arith.addf %396, %395 : vector<8x32xf32>
    %398 = arith.divf %396, %397 : vector<8x32xf32>
    %399 = vector.extract_strided_slice %392 {offsets = [0, 32], sizes = [8, 32], strides = [1, 1]} : vector<8x128xf32> to vector<8x32xf32>
    %400 = arith.negf %399 : vector<8x32xf32>
    %401 = math.exp %400 : vector<8x32xf32>
    %cst_67 = arith.constant 1.000000e+00 : f32
    %402 = vector.broadcast %cst_67 : f32 to vector<8x32xf32>
    %403 = arith.addf %402, %401 : vector<8x32xf32>
    %404 = arith.divf %402, %403 : vector<8x32xf32>
    %405 = vector.extract_strided_slice %392 {offsets = [0, 64], sizes = [8, 32], strides = [1, 1]} : vector<8x128xf32> to vector<8x32xf32>
    %406 = math.tanh %405 : vector<8x32xf32>
    %407 = vector.extract_strided_slice %392 {offsets = [0, 96], sizes = [8, 32], strides = [1, 1]} : vector<8x128xf32> to vector<8x32xf32>
    %408 = arith.negf %407 : vector<8x32xf32>
    %409 = math.exp %408 : vector<8x32xf32>
    %cst_68 = arith.constant 1.000000e+00 : f32
    %410 = vector.broadcast %cst_68 : f32 to vector<8x32xf32>
    %411 = arith.addf %410, %409 : vector<8x32xf32>
    %412 = arith.divf %410, %411 : vector<8x32xf32>
    %413 = arith.mulf %404, %357 : vector<8x32xf32>
    %414 = arith.mulf %398, %406 : vector<8x32xf32>
    %415 = arith.addf %413, %414 : vector<8x32xf32>
    %416 = math.tanh %415 : vector<8x32xf32>
    %417 = arith.mulf %412, %416 : vector<8x32xf32>
    %418 = vector.extract_strided_slice %10 {offsets = [7, 0, 0], sizes = [1, 8, 128], strides = [1, 1, 1]} : vector<10x8x256xf32> to vector<1x8x128xf32>
    %419 = vector.shape_cast %418 : vector<1x8x128xf32> to vector<8x128xf32>
    %cst_69 = arith.constant dense<0.000000e+00> : vector<8x128xf32>
    %420 = tpu.matmul %388, %1, %cst_69 {dimension_numbers = #tpu.dot_dimension_numbers<[1], [0], [0], [1], [0, 0, 1, 1], [], []>} : vector<8x32xf32>, vector<32x128xf32>, vector<8x128xf32> -> vector<8x128xf32>
    %421 = arith.addf %419, %420 : vector<8x128xf32>
    %422 = vector.extract_strided_slice %421 {offsets = [0, 0], sizes = [8, 32], strides = [1, 1]} : vector<8x128xf32> to vector<8x32xf32>
    %423 = arith.negf %422 : vector<8x32xf32>
    %424 = math.exp %423 : vector<8x32xf32>
    %cst_70 = arith.constant 1.000000e+00 : f32
    %425 = vector.broadcast %cst_70 : f32 to vector<8x32xf32>
    %426 = arith.addf %425, %424 : vector<8x32xf32>
    %427 = arith.divf %425, %426 : vector<8x32xf32>
    %428 = vector.extract_strided_slice %421 {offsets = [0, 32], sizes = [8, 32], strides = [1, 1]} : vector<8x128xf32> to vector<8x32xf32>
    %429 = arith.negf %428 : vector<8x32xf32>
    %430 = math.exp %429 : vector<8x32xf32>
    %cst_71 = arith.constant 1.000000e+00 : f32
    %431 = vector.broadcast %cst_71 : f32 to vector<8x32xf32>
    %432 = arith.addf %431, %430 : vector<8x32xf32>
    %433 = arith.divf %431, %432 : vector<8x32xf32>
    %434 = vector.extract_strided_slice %421 {offsets = [0, 64], sizes = [8, 32], strides = [1, 1]} : vector<8x128xf32> to vector<8x32xf32>
    %435 = math.tanh %434 : vector<8x32xf32>
    %436 = vector.extract_strided_slice %421 {offsets = [0, 96], sizes = [8, 32], strides = [1, 1]} : vector<8x128xf32> to vector<8x32xf32>
    %437 = arith.negf %436 : vector<8x32xf32>
    %438 = math.exp %437 : vector<8x32xf32>
    %cst_72 = arith.constant 1.000000e+00 : f32
    %439 = vector.broadcast %cst_72 : f32 to vector<8x32xf32>
    %440 = arith.addf %439, %438 : vector<8x32xf32>
    %441 = arith.divf %439, %440 : vector<8x32xf32>
    %442 = arith.mulf %433, %386 : vector<8x32xf32>
    %443 = arith.mulf %427, %435 : vector<8x32xf32>
    %444 = arith.addf %442, %443 : vector<8x32xf32>
    %445 = math.tanh %444 : vector<8x32xf32>
    %446 = arith.mulf %441, %445 : vector<8x32xf32>
    %447 = vector.extract_strided_slice %10 {offsets = [2, 0, 128], sizes = [1, 8, 128], strides = [1, 1, 1]} : vector<10x8x256xf32> to vector<1x8x128xf32>
    %448 = vector.shape_cast %447 : vector<1x8x128xf32> to vector<8x128xf32>
    %cst_73 = arith.constant dense<0.000000e+00> : vector<8x128xf32>
    %449 = tpu.matmul %417, %2, %cst_73 {dimension_numbers = #tpu.dot_dimension_numbers<[1], [0], [0], [1], [0, 0, 1, 1], [], []>} : vector<8x32xf32>, vector<32x128xf32>, vector<8x128xf32> -> vector<8x128xf32>
    %450 = arith.addf %448, %449 : vector<8x128xf32>
    %451 = vector.extract_strided_slice %450 {offsets = [0, 0], sizes = [8, 32], strides = [1, 1]} : vector<8x128xf32> to vector<8x32xf32>
    %452 = arith.negf %451 : vector<8x32xf32>
    %453 = math.exp %452 : vector<8x32xf32>
    %cst_74 = arith.constant 1.000000e+00 : f32
    %454 = vector.broadcast %cst_74 : f32 to vector<8x32xf32>
    %455 = arith.addf %454, %453 : vector<8x32xf32>
    %456 = arith.divf %454, %455 : vector<8x32xf32>
    %457 = vector.extract_strided_slice %450 {offsets = [0, 32], sizes = [8, 32], strides = [1, 1]} : vector<8x128xf32> to vector<8x32xf32>
    %458 = arith.negf %457 : vector<8x32xf32>
    %459 = math.exp %458 : vector<8x32xf32>
    %cst_75 = arith.constant 1.000000e+00 : f32
    %460 = vector.broadcast %cst_75 : f32 to vector<8x32xf32>
    %461 = arith.addf %460, %459 : vector<8x32xf32>
    %462 = arith.divf %460, %461 : vector<8x32xf32>
    %463 = vector.extract_strided_slice %450 {offsets = [0, 64], sizes = [8, 32], strides = [1, 1]} : vector<8x128xf32> to vector<8x32xf32>
    %464 = math.tanh %463 : vector<8x32xf32>
    %465 = vector.extract_strided_slice %450 {offsets = [0, 96], sizes = [8, 32], strides = [1, 1]} : vector<8x128xf32> to vector<8x32xf32>
    %466 = arith.negf %465 : vector<8x32xf32>
    %467 = math.exp %466 : vector<8x32xf32>
    %cst_76 = arith.constant 1.000000e+00 : f32
    %468 = vector.broadcast %cst_76 : f32 to vector<8x32xf32>
    %469 = arith.addf %468, %467 : vector<8x32xf32>
    %470 = arith.divf %468, %469 : vector<8x32xf32>
    %471 = arith.mulf %462, %415 : vector<8x32xf32>
    %472 = arith.mulf %456, %464 : vector<8x32xf32>
    %473 = arith.addf %471, %472 : vector<8x32xf32>
    %474 = math.tanh %473 : vector<8x32xf32>
    %475 = arith.mulf %470, %474 : vector<8x32xf32>
    %476 = vector.extract_strided_slice %10 {offsets = [8, 0, 0], sizes = [1, 8, 128], strides = [1, 1, 1]} : vector<10x8x256xf32> to vector<1x8x128xf32>
    %477 = vector.shape_cast %476 : vector<1x8x128xf32> to vector<8x128xf32>
    %cst_77 = arith.constant dense<0.000000e+00> : vector<8x128xf32>
    %478 = tpu.matmul %446, %1, %cst_77 {dimension_numbers = #tpu.dot_dimension_numbers<[1], [0], [0], [1], [0, 0, 1, 1], [], []>} : vector<8x32xf32>, vector<32x128xf32>, vector<8x128xf32> -> vector<8x128xf32>
    %479 = arith.addf %477, %478 : vector<8x128xf32>
    %480 = vector.extract_strided_slice %479 {offsets = [0, 0], sizes = [8, 32], strides = [1, 1]} : vector<8x128xf32> to vector<8x32xf32>
    %481 = arith.negf %480 : vector<8x32xf32>
    %482 = math.exp %481 : vector<8x32xf32>
    %cst_78 = arith.constant 1.000000e+00 : f32
    %483 = vector.broadcast %cst_78 : f32 to vector<8x32xf32>
    %484 = arith.addf %483, %482 : vector<8x32xf32>
    %485 = arith.divf %483, %484 : vector<8x32xf32>
    %486 = vector.extract_strided_slice %479 {offsets = [0, 32], sizes = [8, 32], strides = [1, 1]} : vector<8x128xf32> to vector<8x32xf32>
    %487 = arith.negf %486 : vector<8x32xf32>
    %488 = math.exp %487 : vector<8x32xf32>
    %cst_79 = arith.constant 1.000000e+00 : f32
    %489 = vector.broadcast %cst_79 : f32 to vector<8x32xf32>
    %490 = arith.addf %489, %488 : vector<8x32xf32>
    %491 = arith.divf %489, %490 : vector<8x32xf32>
    %492 = vector.extract_strided_slice %479 {offsets = [0, 64], sizes = [8, 32], strides = [1, 1]} : vector<8x128xf32> to vector<8x32xf32>
    %493 = math.tanh %492 : vector<8x32xf32>
    %494 = vector.extract_strided_slice %479 {offsets = [0, 96], sizes = [8, 32], strides = [1, 1]} : vector<8x128xf32> to vector<8x32xf32>
    %495 = arith.negf %494 : vector<8x32xf32>
    %496 = math.exp %495 : vector<8x32xf32>
    %cst_80 = arith.constant 1.000000e+00 : f32
    %497 = vector.broadcast %cst_80 : f32 to vector<8x32xf32>
    %498 = arith.addf %497, %496 : vector<8x32xf32>
    %499 = arith.divf %497, %498 : vector<8x32xf32>
    %500 = arith.mulf %491, %444 : vector<8x32xf32>
    %501 = arith.mulf %485, %493 : vector<8x32xf32>
    %502 = arith.addf %500, %501 : vector<8x32xf32>
    %503 = math.tanh %502 : vector<8x32xf32>
    %504 = arith.mulf %499, %503 : vector<8x32xf32>
    %505 = vector.extract_strided_slice %10 {offsets = [1, 0, 128], sizes = [1, 8, 128], strides = [1, 1, 1]} : vector<10x8x256xf32> to vector<1x8x128xf32>
    %506 = vector.shape_cast %505 : vector<1x8x128xf32> to vector<8x128xf32>
    %cst_81 = arith.constant dense<0.000000e+00> : vector<8x128xf32>
    %507 = tpu.matmul %475, %2, %cst_81 {dimension_numbers = #tpu.dot_dimension_numbers<[1], [0], [0], [1], [0, 0, 1, 1], [], []>} : vector<8x32xf32>, vector<32x128xf32>, vector<8x128xf32> -> vector<8x128xf32>
    %508 = arith.addf %506, %507 : vector<8x128xf32>
    %509 = vector.extract_strided_slice %508 {offsets = [0, 0], sizes = [8, 32], strides = [1, 1]} : vector<8x128xf32> to vector<8x32xf32>
    %510 = arith.negf %509 : vector<8x32xf32>
    %511 = math.exp %510 : vector<8x32xf32>
    %cst_82 = arith.constant 1.000000e+00 : f32
    %512 = vector.broadcast %cst_82 : f32 to vector<8x32xf32>
    %513 = arith.addf %512, %511 : vector<8x32xf32>
    %514 = arith.divf %512, %513 : vector<8x32xf32>
    %515 = vector.extract_strided_slice %508 {offsets = [0, 32], sizes = [8, 32], strides = [1, 1]} : vector<8x128xf32> to vector<8x32xf32>
    %516 = arith.negf %515 : vector<8x32xf32>
    %517 = math.exp %516 : vector<8x32xf32>
    %cst_83 = arith.constant 1.000000e+00 : f32
    %518 = vector.broadcast %cst_83 : f32 to vector<8x32xf32>
    %519 = arith.addf %518, %517 : vector<8x32xf32>
    %520 = arith.divf %518, %519 : vector<8x32xf32>
    %521 = vector.extract_strided_slice %508 {offsets = [0, 64], sizes = [8, 32], strides = [1, 1]} : vector<8x128xf32> to vector<8x32xf32>
    %522 = math.tanh %521 : vector<8x32xf32>
    %523 = vector.extract_strided_slice %508 {offsets = [0, 96], sizes = [8, 32], strides = [1, 1]} : vector<8x128xf32> to vector<8x32xf32>
    %524 = arith.negf %523 : vector<8x32xf32>
    %525 = math.exp %524 : vector<8x32xf32>
    %cst_84 = arith.constant 1.000000e+00 : f32
    %526 = vector.broadcast %cst_84 : f32 to vector<8x32xf32>
    %527 = arith.addf %526, %525 : vector<8x32xf32>
    %528 = arith.divf %526, %527 : vector<8x32xf32>
    %529 = arith.mulf %520, %473 : vector<8x32xf32>
    %530 = arith.mulf %514, %522 : vector<8x32xf32>
    %531 = arith.addf %529, %530 : vector<8x32xf32>
    %532 = math.tanh %531 : vector<8x32xf32>
    %533 = arith.mulf %528, %532 : vector<8x32xf32>
    %534 = vector.extract_strided_slice %10 {offsets = [9, 0, 0], sizes = [1, 8, 128], strides = [1, 1, 1]} : vector<10x8x256xf32> to vector<1x8x128xf32>
    %535 = vector.shape_cast %534 : vector<1x8x128xf32> to vector<8x128xf32>
    %cst_85 = arith.constant dense<0.000000e+00> : vector<8x128xf32>
    %536 = tpu.matmul %504, %1, %cst_85 {dimension_numbers = #tpu.dot_dimension_numbers<[1], [0], [0], [1], [0, 0, 1, 1], [], []>} : vector<8x32xf32>, vector<32x128xf32>, vector<8x128xf32> -> vector<8x128xf32>
    %537 = arith.addf %535, %536 : vector<8x128xf32>
    %538 = vector.extract_strided_slice %537 {offsets = [0, 0], sizes = [8, 32], strides = [1, 1]} : vector<8x128xf32> to vector<8x32xf32>
    %539 = arith.negf %538 : vector<8x32xf32>
    %540 = math.exp %539 : vector<8x32xf32>
    %cst_86 = arith.constant 1.000000e+00 : f32
    %541 = vector.broadcast %cst_86 : f32 to vector<8x32xf32>
    %542 = arith.addf %541, %540 : vector<8x32xf32>
    %543 = arith.divf %541, %542 : vector<8x32xf32>
    %544 = vector.extract_strided_slice %537 {offsets = [0, 32], sizes = [8, 32], strides = [1, 1]} : vector<8x128xf32> to vector<8x32xf32>
    %545 = arith.negf %544 : vector<8x32xf32>
    %546 = math.exp %545 : vector<8x32xf32>
    %cst_87 = arith.constant 1.000000e+00 : f32
    %547 = vector.broadcast %cst_87 : f32 to vector<8x32xf32>
    %548 = arith.addf %547, %546 : vector<8x32xf32>
    %549 = arith.divf %547, %548 : vector<8x32xf32>
    %550 = vector.extract_strided_slice %537 {offsets = [0, 64], sizes = [8, 32], strides = [1, 1]} : vector<8x128xf32> to vector<8x32xf32>
    %551 = math.tanh %550 : vector<8x32xf32>
    %552 = vector.extract_strided_slice %537 {offsets = [0, 96], sizes = [8, 32], strides = [1, 1]} : vector<8x128xf32> to vector<8x32xf32>
    %553 = arith.negf %552 : vector<8x32xf32>
    %554 = math.exp %553 : vector<8x32xf32>
    %cst_88 = arith.constant 1.000000e+00 : f32
    %555 = vector.broadcast %cst_88 : f32 to vector<8x32xf32>
    %556 = arith.addf %555, %554 : vector<8x32xf32>
    %557 = arith.divf %555, %556 : vector<8x32xf32>
    %558 = arith.mulf %549, %502 : vector<8x32xf32>
    %559 = arith.mulf %543, %551 : vector<8x32xf32>
    %560 = arith.addf %558, %559 : vector<8x32xf32>
    %561 = math.tanh %560 : vector<8x32xf32>
    %562 = arith.mulf %557, %561 : vector<8x32xf32>
    %563 = vector.extract_strided_slice %10 {offsets = [0, 0, 128], sizes = [1, 8, 128], strides = [1, 1, 1]} : vector<10x8x256xf32> to vector<1x8x128xf32>
    %564 = vector.shape_cast %563 : vector<1x8x128xf32> to vector<8x128xf32>
    %cst_89 = arith.constant dense<0.000000e+00> : vector<8x128xf32>
    %565 = tpu.matmul %533, %2, %cst_89 {dimension_numbers = #tpu.dot_dimension_numbers<[1], [0], [0], [1], [0, 0, 1, 1], [], []>} : vector<8x32xf32>, vector<32x128xf32>, vector<8x128xf32> -> vector<8x128xf32>
    %566 = arith.addf %564, %565 : vector<8x128xf32>
    %567 = vector.extract_strided_slice %566 {offsets = [0, 0], sizes = [8, 32], strides = [1, 1]} : vector<8x128xf32> to vector<8x32xf32>
    %568 = arith.negf %567 : vector<8x32xf32>
    %569 = math.exp %568 : vector<8x32xf32>
    %cst_90 = arith.constant 1.000000e+00 : f32
    %570 = vector.broadcast %cst_90 : f32 to vector<8x32xf32>
    %571 = arith.addf %570, %569 : vector<8x32xf32>
    %572 = arith.divf %570, %571 : vector<8x32xf32>
    %573 = vector.extract_strided_slice %566 {offsets = [0, 32], sizes = [8, 32], strides = [1, 1]} : vector<8x128xf32> to vector<8x32xf32>
    %574 = arith.negf %573 : vector<8x32xf32>
    %575 = math.exp %574 : vector<8x32xf32>
    %cst_91 = arith.constant 1.000000e+00 : f32
    %576 = vector.broadcast %cst_91 : f32 to vector<8x32xf32>
    %577 = arith.addf %576, %575 : vector<8x32xf32>
    %578 = arith.divf %576, %577 : vector<8x32xf32>
    %579 = vector.extract_strided_slice %566 {offsets = [0, 64], sizes = [8, 32], strides = [1, 1]} : vector<8x128xf32> to vector<8x32xf32>
    %580 = math.tanh %579 : vector<8x32xf32>
    %581 = vector.extract_strided_slice %566 {offsets = [0, 96], sizes = [8, 32], strides = [1, 1]} : vector<8x128xf32> to vector<8x32xf32>
    %582 = arith.negf %581 : vector<8x32xf32>
    %583 = math.exp %582 : vector<8x32xf32>
    %cst_92 = arith.constant 1.000000e+00 : f32
    %584 = vector.broadcast %cst_92 : f32 to vector<8x32xf32>
    %585 = arith.addf %584, %583 : vector<8x32xf32>
    %586 = arith.divf %584, %585 : vector<8x32xf32>
    %587 = arith.mulf %578, %531 : vector<8x32xf32>
    %588 = arith.mulf %572, %580 : vector<8x32xf32>
    %589 = arith.addf %587, %588 : vector<8x32xf32>
    %590 = math.tanh %589 : vector<8x32xf32>
    %591 = arith.mulf %586, %590 : vector<8x32xf32>
    %592 = tpu.concatenate %40, %591 in 1 : vector<8x32xf32>, vector<8x32xf32> -> vector<8x64xf32>
    %593 = tpu.concatenate %98, %533 in 1 : vector<8x32xf32>, vector<8x32xf32> -> vector<8x64xf32>
    %594 = tpu.concatenate %156, %475 in 1 : vector<8x32xf32>, vector<8x32xf32> -> vector<8x64xf32>
    %595 = tpu.concatenate %214, %417 in 1 : vector<8x32xf32>, vector<8x32xf32> -> vector<8x64xf32>
    %596 = tpu.concatenate %272, %359 in 1 : vector<8x32xf32>, vector<8x32xf32> -> vector<8x64xf32>
    %597 = tpu.concatenate %330, %301 in 1 : vector<8x32xf32>, vector<8x32xf32> -> vector<8x64xf32>
    %598 = tpu.concatenate %388, %243 in 1 : vector<8x32xf32>, vector<8x32xf32> -> vector<8x64xf32>
    %599 = tpu.concatenate %446, %185 in 1 : vector<8x32xf32>, vector<8x32xf32> -> vector<8x64xf32>
    %600 = tpu.concatenate %504, %127 in 1 : vector<8x32xf32>, vector<8x32xf32> -> vector<8x64xf32>
    %601 = tpu.concatenate %562, %69 in 1 : vector<8x32xf32>, vector<8x32xf32> -> vector<8x64xf32>
    %602 = vector.shape_cast %592 : vector<8x64xf32> to vector<1x8x64xf32>
    %603 = vector.shape_cast %593 : vector<8x64xf32> to vector<1x8x64xf32>
    %604 = vector.shape_cast %594 : vector<8x64xf32> to vector<1x8x64xf32>
    %605 = vector.shape_cast %595 : vector<8x64xf32> to vector<1x8x64xf32>
    %606 = vector.shape_cast %596 : vector<8x64xf32> to vector<1x8x64xf32>
    %607 = vector.shape_cast %597 : vector<8x64xf32> to vector<1x8x64xf32>
    %608 = vector.shape_cast %598 : vector<8x64xf32> to vector<1x8x64xf32>
    %609 = vector.shape_cast %599 : vector<8x64xf32> to vector<1x8x64xf32>
    %610 = vector.shape_cast %600 : vector<8x64xf32> to vector<1x8x64xf32>
    %611 = vector.shape_cast %601 : vector<8x64xf32> to vector<1x8x64xf32>
    %612 = tpu.concatenate %602, %603, %604, %605, %606, %607, %608, %609, %610, %611 in 0 : vector<1x8x64xf32>, vector<1x8x64xf32>, vector<1x8x64xf32>, vector<1x8x64xf32>, vector<1x8x64xf32>, vector<1x8x64xf32>, vector<1x8x64xf32>, vector<1x8x64xf32>, vector<1x8x64xf32>, vector<1x8x64xf32> -> vector<10x8x64xf32>
    %613 = vector.shape_cast %612 : vector<10x8x64xf32> to vector<80x64xf32>
    %c0_93 = arith.constant 0 : index
    %c0_94 = arith.constant 0 : index
    %614 = vector.load %arg6[%c0_93, %c0_94] : memref<64x128xf32, #tpu.memory_space<vmem>>, vector<64x128xf32>
    %cst_95 = arith.constant dense<0.000000e+00> : vector<80x128xf32>
    %615 = tpu.matmul %613, %614, %cst_95 {dimension_numbers = #tpu.dot_dimension_numbers<[1], [0], [0], [1], [0, 0, 1, 1], [], []>} : vector<80x64xf32>, vector<64x128xf32>, vector<80x128xf32> -> vector<80x128xf32>
    %c0_96 = arith.constant 0 : index
    %c0_97 = arith.constant 0 : index
    %616 = vector.load %arg8[%c0_96, %c0_97] : memref<1x128xf32, #tpu.memory_space<vmem>>, vector<1x128xf32>
    %617 = vector.broadcast %616 : vector<1x128xf32> to vector<80x128xf32>
    %618 = arith.addf %615, %617 : vector<80x128xf32>
    %619 = vector.shape_cast %618 : vector<80x128xf32> to vector<10x8x128xf32>
    %620 = vector.extract_strided_slice %619 {offsets = [0, 0, 0], sizes = [1, 8, 128], strides = [1, 1, 1]} : vector<10x8x128xf32> to vector<1x8x128xf32>
    %621 = vector.shape_cast %620 : vector<1x8x128xf32> to vector<8x128xf32>
    %cst_98 = arith.constant dense<0.000000e+00> : vector<8x128xf32>
    %622 = tpu.matmul %11, %3, %cst_98 {dimension_numbers = #tpu.dot_dimension_numbers<[1], [0], [0], [1], [0, 0, 1, 1], [], []>} : vector<8x32xf32>, vector<32x128xf32>, vector<8x128xf32> -> vector<8x128xf32>
    %623 = arith.addf %621, %622 : vector<8x128xf32>
    %624 = vector.extract_strided_slice %623 {offsets = [0, 0], sizes = [8, 32], strides = [1, 1]} : vector<8x128xf32> to vector<8x32xf32>
    %625 = arith.negf %624 : vector<8x32xf32>
    %626 = math.exp %625 : vector<8x32xf32>
    %cst_99 = arith.constant 1.000000e+00 : f32
    %627 = vector.broadcast %cst_99 : f32 to vector<8x32xf32>
    %628 = arith.addf %627, %626 : vector<8x32xf32>
    %629 = arith.divf %627, %628 : vector<8x32xf32>
    %630 = vector.extract_strided_slice %623 {offsets = [0, 32], sizes = [8, 32], strides = [1, 1]} : vector<8x128xf32> to vector<8x32xf32>
    %631 = arith.negf %630 : vector<8x32xf32>
    %632 = math.exp %631 : vector<8x32xf32>
    %cst_100 = arith.constant 1.000000e+00 : f32
    %633 = vector.broadcast %cst_100 : f32 to vector<8x32xf32>
    %634 = arith.addf %633, %632 : vector<8x32xf32>
    %635 = arith.divf %633, %634 : vector<8x32xf32>
    %636 = vector.extract_strided_slice %623 {offsets = [0, 64], sizes = [8, 32], strides = [1, 1]} : vector<8x128xf32> to vector<8x32xf32>
    %637 = math.tanh %636 : vector<8x32xf32>
    %638 = vector.extract_strided_slice %623 {offsets = [0, 96], sizes = [8, 32], strides = [1, 1]} : vector<8x128xf32> to vector<8x32xf32>
    %639 = arith.negf %638 : vector<8x32xf32>
    %640 = math.exp %639 : vector<8x32xf32>
    %cst_101 = arith.constant 1.000000e+00 : f32
    %641 = vector.broadcast %cst_101 : f32 to vector<8x32xf32>
    %642 = arith.addf %641, %640 : vector<8x32xf32>
    %643 = arith.divf %641, %642 : vector<8x32xf32>
    %644 = arith.mulf %635, %11 : vector<8x32xf32>
    %645 = arith.mulf %629, %637 : vector<8x32xf32>
    %646 = arith.addf %644, %645 : vector<8x32xf32>
    %647 = math.tanh %646 : vector<8x32xf32>
    %648 = arith.mulf %643, %647 : vector<8x32xf32>
    %649 = vector.extract_strided_slice %619 {offsets = [1, 0, 0], sizes = [1, 8, 128], strides = [1, 1, 1]} : vector<10x8x128xf32> to vector<1x8x128xf32>
    %650 = vector.shape_cast %649 : vector<1x8x128xf32> to vector<8x128xf32>
    %cst_102 = arith.constant dense<0.000000e+00> : vector<8x128xf32>
    %651 = tpu.matmul %648, %3, %cst_102 {dimension_numbers = #tpu.dot_dimension_numbers<[1], [0], [0], [1], [0, 0, 1, 1], [], []>} : vector<8x32xf32>, vector<32x128xf32>, vector<8x128xf32> -> vector<8x128xf32>
    %652 = arith.addf %650, %651 : vector<8x128xf32>
    %653 = vector.extract_strided_slice %652 {offsets = [0, 0], sizes = [8, 32], strides = [1, 1]} : vector<8x128xf32> to vector<8x32xf32>
    %654 = arith.negf %653 : vector<8x32xf32>
    %655 = math.exp %654 : vector<8x32xf32>
    %cst_103 = arith.constant 1.000000e+00 : f32
    %656 = vector.broadcast %cst_103 : f32 to vector<8x32xf32>
    %657 = arith.addf %656, %655 : vector<8x32xf32>
    %658 = arith.divf %656, %657 : vector<8x32xf32>
    %659 = vector.extract_strided_slice %652 {offsets = [0, 32], sizes = [8, 32], strides = [1, 1]} : vector<8x128xf32> to vector<8x32xf32>
    %660 = arith.negf %659 : vector<8x32xf32>
    %661 = math.exp %660 : vector<8x32xf32>
    %cst_104 = arith.constant 1.000000e+00 : f32
    %662 = vector.broadcast %cst_104 : f32 to vector<8x32xf32>
    %663 = arith.addf %662, %661 : vector<8x32xf32>
    %664 = arith.divf %662, %663 : vector<8x32xf32>
    %665 = vector.extract_strided_slice %652 {offsets = [0, 64], sizes = [8, 32], strides = [1, 1]} : vector<8x128xf32> to vector<8x32xf32>
    %666 = math.tanh %665 : vector<8x32xf32>
    %667 = vector.extract_strided_slice %652 {offsets = [0, 96], sizes = [8, 32], strides = [1, 1]} : vector<8x128xf32> to vector<8x32xf32>
    %668 = arith.negf %667 : vector<8x32xf32>
    %669 = math.exp %668 : vector<8x32xf32>
    %cst_105 = arith.constant 1.000000e+00 : f32
    %670 = vector.broadcast %cst_105 : f32 to vector<8x32xf32>
    %671 = arith.addf %670, %669 : vector<8x32xf32>
    %672 = arith.divf %670, %671 : vector<8x32xf32>
    %673 = arith.mulf %664, %646 : vector<8x32xf32>
    %674 = arith.mulf %658, %666 : vector<8x32xf32>
    %675 = arith.addf %673, %674 : vector<8x32xf32>
    %676 = math.tanh %675 : vector<8x32xf32>
    %677 = arith.mulf %672, %676 : vector<8x32xf32>
    %678 = vector.extract_strided_slice %619 {offsets = [2, 0, 0], sizes = [1, 8, 128], strides = [1, 1, 1]} : vector<10x8x128xf32> to vector<1x8x128xf32>
    %679 = vector.shape_cast %678 : vector<1x8x128xf32> to vector<8x128xf32>
    %cst_106 = arith.constant dense<0.000000e+00> : vector<8x128xf32>
    %680 = tpu.matmul %677, %3, %cst_106 {dimension_numbers = #tpu.dot_dimension_numbers<[1], [0], [0], [1], [0, 0, 1, 1], [], []>} : vector<8x32xf32>, vector<32x128xf32>, vector<8x128xf32> -> vector<8x128xf32>
    %681 = arith.addf %679, %680 : vector<8x128xf32>
    %682 = vector.extract_strided_slice %681 {offsets = [0, 0], sizes = [8, 32], strides = [1, 1]} : vector<8x128xf32> to vector<8x32xf32>
    %683 = arith.negf %682 : vector<8x32xf32>
    %684 = math.exp %683 : vector<8x32xf32>
    %cst_107 = arith.constant 1.000000e+00 : f32
    %685 = vector.broadcast %cst_107 : f32 to vector<8x32xf32>
    %686 = arith.addf %685, %684 : vector<8x32xf32>
    %687 = arith.divf %685, %686 : vector<8x32xf32>
    %688 = vector.extract_strided_slice %681 {offsets = [0, 32], sizes = [8, 32], strides = [1, 1]} : vector<8x128xf32> to vector<8x32xf32>
    %689 = arith.negf %688 : vector<8x32xf32>
    %690 = math.exp %689 : vector<8x32xf32>
    %cst_108 = arith.constant 1.000000e+00 : f32
    %691 = vector.broadcast %cst_108 : f32 to vector<8x32xf32>
    %692 = arith.addf %691, %690 : vector<8x32xf32>
    %693 = arith.divf %691, %692 : vector<8x32xf32>
    %694 = vector.extract_strided_slice %681 {offsets = [0, 64], sizes = [8, 32], strides = [1, 1]} : vector<8x128xf32> to vector<8x32xf32>
    %695 = math.tanh %694 : vector<8x32xf32>
    %696 = vector.extract_strided_slice %681 {offsets = [0, 96], sizes = [8, 32], strides = [1, 1]} : vector<8x128xf32> to vector<8x32xf32>
    %697 = arith.negf %696 : vector<8x32xf32>
    %698 = math.exp %697 : vector<8x32xf32>
    %cst_109 = arith.constant 1.000000e+00 : f32
    %699 = vector.broadcast %cst_109 : f32 to vector<8x32xf32>
    %700 = arith.addf %699, %698 : vector<8x32xf32>
    %701 = arith.divf %699, %700 : vector<8x32xf32>
    %702 = arith.mulf %693, %675 : vector<8x32xf32>
    %703 = arith.mulf %687, %695 : vector<8x32xf32>
    %704 = arith.addf %702, %703 : vector<8x32xf32>
    %705 = math.tanh %704 : vector<8x32xf32>
    %706 = arith.mulf %701, %705 : vector<8x32xf32>
    %707 = vector.extract_strided_slice %619 {offsets = [3, 0, 0], sizes = [1, 8, 128], strides = [1, 1, 1]} : vector<10x8x128xf32> to vector<1x8x128xf32>
    %708 = vector.shape_cast %707 : vector<1x8x128xf32> to vector<8x128xf32>
    %cst_110 = arith.constant dense<0.000000e+00> : vector<8x128xf32>
    %709 = tpu.matmul %706, %3, %cst_110 {dimension_numbers = #tpu.dot_dimension_numbers<[1], [0], [0], [1], [0, 0, 1, 1], [], []>} : vector<8x32xf32>, vector<32x128xf32>, vector<8x128xf32> -> vector<8x128xf32>
    %710 = arith.addf %708, %709 : vector<8x128xf32>
    %711 = vector.extract_strided_slice %710 {offsets = [0, 0], sizes = [8, 32], strides = [1, 1]} : vector<8x128xf32> to vector<8x32xf32>
    %712 = arith.negf %711 : vector<8x32xf32>
    %713 = math.exp %712 : vector<8x32xf32>
    %cst_111 = arith.constant 1.000000e+00 : f32
    %714 = vector.broadcast %cst_111 : f32 to vector<8x32xf32>
    %715 = arith.addf %714, %713 : vector<8x32xf32>
    %716 = arith.divf %714, %715 : vector<8x32xf32>
    %717 = vector.extract_strided_slice %710 {offsets = [0, 32], sizes = [8, 32], strides = [1, 1]} : vector<8x128xf32> to vector<8x32xf32>
    %718 = arith.negf %717 : vector<8x32xf32>
    %719 = math.exp %718 : vector<8x32xf32>
    %cst_112 = arith.constant 1.000000e+00 : f32
    %720 = vector.broadcast %cst_112 : f32 to vector<8x32xf32>
    %721 = arith.addf %720, %719 : vector<8x32xf32>
    %722 = arith.divf %720, %721 : vector<8x32xf32>
    %723 = vector.extract_strided_slice %710 {offsets = [0, 64], sizes = [8, 32], strides = [1, 1]} : vector<8x128xf32> to vector<8x32xf32>
    %724 = math.tanh %723 : vector<8x32xf32>
    %725 = vector.extract_strided_slice %710 {offsets = [0, 96], sizes = [8, 32], strides = [1, 1]} : vector<8x128xf32> to vector<8x32xf32>
    %726 = arith.negf %725 : vector<8x32xf32>
    %727 = math.exp %726 : vector<8x32xf32>
    %cst_113 = arith.constant 1.000000e+00 : f32
    %728 = vector.broadcast %cst_113 : f32 to vector<8x32xf32>
    %729 = arith.addf %728, %727 : vector<8x32xf32>
    %730 = arith.divf %728, %729 : vector<8x32xf32>
    %731 = arith.mulf %722, %704 : vector<8x32xf32>
    %732 = arith.mulf %716, %724 : vector<8x32xf32>
    %733 = arith.addf %731, %732 : vector<8x32xf32>
    %734 = math.tanh %733 : vector<8x32xf32>
    %735 = arith.mulf %730, %734 : vector<8x32xf32>
    %736 = vector.extract_strided_slice %619 {offsets = [4, 0, 0], sizes = [1, 8, 128], strides = [1, 1, 1]} : vector<10x8x128xf32> to vector<1x8x128xf32>
    %737 = vector.shape_cast %736 : vector<1x8x128xf32> to vector<8x128xf32>
    %cst_114 = arith.constant dense<0.000000e+00> : vector<8x128xf32>
    %738 = tpu.matmul %735, %3, %cst_114 {dimension_numbers = #tpu.dot_dimension_numbers<[1], [0], [0], [1], [0, 0, 1, 1], [], []>} : vector<8x32xf32>, vector<32x128xf32>, vector<8x128xf32> -> vector<8x128xf32>
    %739 = arith.addf %737, %738 : vector<8x128xf32>
    %740 = vector.extract_strided_slice %739 {offsets = [0, 0], sizes = [8, 32], strides = [1, 1]} : vector<8x128xf32> to vector<8x32xf32>
    %741 = arith.negf %740 : vector<8x32xf32>
    %742 = math.exp %741 : vector<8x32xf32>
    %cst_115 = arith.constant 1.000000e+00 : f32
    %743 = vector.broadcast %cst_115 : f32 to vector<8x32xf32>
    %744 = arith.addf %743, %742 : vector<8x32xf32>
    %745 = arith.divf %743, %744 : vector<8x32xf32>
    %746 = vector.extract_strided_slice %739 {offsets = [0, 32], sizes = [8, 32], strides = [1, 1]} : vector<8x128xf32> to vector<8x32xf32>
    %747 = arith.negf %746 : vector<8x32xf32>
    %748 = math.exp %747 : vector<8x32xf32>
    %cst_116 = arith.constant 1.000000e+00 : f32
    %749 = vector.broadcast %cst_116 : f32 to vector<8x32xf32>
    %750 = arith.addf %749, %748 : vector<8x32xf32>
    %751 = arith.divf %749, %750 : vector<8x32xf32>
    %752 = vector.extract_strided_slice %739 {offsets = [0, 64], sizes = [8, 32], strides = [1, 1]} : vector<8x128xf32> to vector<8x32xf32>
    %753 = math.tanh %752 : vector<8x32xf32>
    %754 = vector.extract_strided_slice %739 {offsets = [0, 96], sizes = [8, 32], strides = [1, 1]} : vector<8x128xf32> to vector<8x32xf32>
    %755 = arith.negf %754 : vector<8x32xf32>
    %756 = math.exp %755 : vector<8x32xf32>
    %cst_117 = arith.constant 1.000000e+00 : f32
    %757 = vector.broadcast %cst_117 : f32 to vector<8x32xf32>
    %758 = arith.addf %757, %756 : vector<8x32xf32>
    %759 = arith.divf %757, %758 : vector<8x32xf32>
    %760 = arith.mulf %751, %733 : vector<8x32xf32>
    %761 = arith.mulf %745, %753 : vector<8x32xf32>
    %762 = arith.addf %760, %761 : vector<8x32xf32>
    %763 = math.tanh %762 : vector<8x32xf32>
    %764 = arith.mulf %759, %763 : vector<8x32xf32>
    %765 = vector.extract_strided_slice %619 {offsets = [5, 0, 0], sizes = [1, 8, 128], strides = [1, 1, 1]} : vector<10x8x128xf32> to vector<1x8x128xf32>
    %766 = vector.shape_cast %765 : vector<1x8x128xf32> to vector<8x128xf32>
    %cst_118 = arith.constant dense<0.000000e+00> : vector<8x128xf32>
    %767 = tpu.matmul %764, %3, %cst_118 {dimension_numbers = #tpu.dot_dimension_numbers<[1], [0], [0], [1], [0, 0, 1, 1], [], []>} : vector<8x32xf32>, vector<32x128xf32>, vector<8x128xf32> -> vector<8x128xf32>
    %768 = arith.addf %766, %767 : vector<8x128xf32>
    %769 = vector.extract_strided_slice %768 {offsets = [0, 0], sizes = [8, 32], strides = [1, 1]} : vector<8x128xf32> to vector<8x32xf32>
    %770 = arith.negf %769 : vector<8x32xf32>
    %771 = math.exp %770 : vector<8x32xf32>
    %cst_119 = arith.constant 1.000000e+00 : f32
    %772 = vector.broadcast %cst_119 : f32 to vector<8x32xf32>
    %773 = arith.addf %772, %771 : vector<8x32xf32>
    %774 = arith.divf %772, %773 : vector<8x32xf32>
    %775 = vector.extract_strided_slice %768 {offsets = [0, 32], sizes = [8, 32], strides = [1, 1]} : vector<8x128xf32> to vector<8x32xf32>
    %776 = arith.negf %775 : vector<8x32xf32>
    %777 = math.exp %776 : vector<8x32xf32>
    %cst_120 = arith.constant 1.000000e+00 : f32
    %778 = vector.broadcast %cst_120 : f32 to vector<8x32xf32>
    %779 = arith.addf %778, %777 : vector<8x32xf32>
    %780 = arith.divf %778, %779 : vector<8x32xf32>
    %781 = vector.extract_strided_slice %768 {offsets = [0, 64], sizes = [8, 32], strides = [1, 1]} : vector<8x128xf32> to vector<8x32xf32>
    %782 = math.tanh %781 : vector<8x32xf32>
    %783 = vector.extract_strided_slice %768 {offsets = [0, 96], sizes = [8, 32], strides = [1, 1]} : vector<8x128xf32> to vector<8x32xf32>
    %784 = arith.negf %783 : vector<8x32xf32>
    %785 = math.exp %784 : vector<8x32xf32>
    %cst_121 = arith.constant 1.000000e+00 : f32
    %786 = vector.broadcast %cst_121 : f32 to vector<8x32xf32>
    %787 = arith.addf %786, %785 : vector<8x32xf32>
    %788 = arith.divf %786, %787 : vector<8x32xf32>
    %789 = arith.mulf %780, %762 : vector<8x32xf32>
    %790 = arith.mulf %774, %782 : vector<8x32xf32>
    %791 = arith.addf %789, %790 : vector<8x32xf32>
    %792 = math.tanh %791 : vector<8x32xf32>
    %793 = arith.mulf %788, %792 : vector<8x32xf32>
    %794 = vector.extract_strided_slice %619 {offsets = [6, 0, 0], sizes = [1, 8, 128], strides = [1, 1, 1]} : vector<10x8x128xf32> to vector<1x8x128xf32>
    %795 = vector.shape_cast %794 : vector<1x8x128xf32> to vector<8x128xf32>
    %cst_122 = arith.constant dense<0.000000e+00> : vector<8x128xf32>
    %796 = tpu.matmul %793, %3, %cst_122 {dimension_numbers = #tpu.dot_dimension_numbers<[1], [0], [0], [1], [0, 0, 1, 1], [], []>} : vector<8x32xf32>, vector<32x128xf32>, vector<8x128xf32> -> vector<8x128xf32>
    %797 = arith.addf %795, %796 : vector<8x128xf32>
    %798 = vector.extract_strided_slice %797 {offsets = [0, 0], sizes = [8, 32], strides = [1, 1]} : vector<8x128xf32> to vector<8x32xf32>
    %799 = arith.negf %798 : vector<8x32xf32>
    %800 = math.exp %799 : vector<8x32xf32>
    %cst_123 = arith.constant 1.000000e+00 : f32
    %801 = vector.broadcast %cst_123 : f32 to vector<8x32xf32>
    %802 = arith.addf %801, %800 : vector<8x32xf32>
    %803 = arith.divf %801, %802 : vector<8x32xf32>
    %804 = vector.extract_strided_slice %797 {offsets = [0, 32], sizes = [8, 32], strides = [1, 1]} : vector<8x128xf32> to vector<8x32xf32>
    %805 = arith.negf %804 : vector<8x32xf32>
    %806 = math.exp %805 : vector<8x32xf32>
    %cst_124 = arith.constant 1.000000e+00 : f32
    %807 = vector.broadcast %cst_124 : f32 to vector<8x32xf32>
    %808 = arith.addf %807, %806 : vector<8x32xf32>
    %809 = arith.divf %807, %808 : vector<8x32xf32>
    %810 = vector.extract_strided_slice %797 {offsets = [0, 64], sizes = [8, 32], strides = [1, 1]} : vector<8x128xf32> to vector<8x32xf32>
    %811 = math.tanh %810 : vector<8x32xf32>
    %812 = vector.extract_strided_slice %797 {offsets = [0, 96], sizes = [8, 32], strides = [1, 1]} : vector<8x128xf32> to vector<8x32xf32>
    %813 = arith.negf %812 : vector<8x32xf32>
    %814 = math.exp %813 : vector<8x32xf32>
    %cst_125 = arith.constant 1.000000e+00 : f32
    %815 = vector.broadcast %cst_125 : f32 to vector<8x32xf32>
    %816 = arith.addf %815, %814 : vector<8x32xf32>
    %817 = arith.divf %815, %816 : vector<8x32xf32>
    %818 = arith.mulf %809, %791 : vector<8x32xf32>
    %819 = arith.mulf %803, %811 : vector<8x32xf32>
    %820 = arith.addf %818, %819 : vector<8x32xf32>
    %821 = math.tanh %820 : vector<8x32xf32>
    %822 = arith.mulf %817, %821 : vector<8x32xf32>
    %823 = vector.extract_strided_slice %619 {offsets = [7, 0, 0], sizes = [1, 8, 128], strides = [1, 1, 1]} : vector<10x8x128xf32> to vector<1x8x128xf32>
    %824 = vector.shape_cast %823 : vector<1x8x128xf32> to vector<8x128xf32>
    %cst_126 = arith.constant dense<0.000000e+00> : vector<8x128xf32>
    %825 = tpu.matmul %822, %3, %cst_126 {dimension_numbers = #tpu.dot_dimension_numbers<[1], [0], [0], [1], [0, 0, 1, 1], [], []>} : vector<8x32xf32>, vector<32x128xf32>, vector<8x128xf32> -> vector<8x128xf32>
    %826 = arith.addf %824, %825 : vector<8x128xf32>
    %827 = vector.extract_strided_slice %826 {offsets = [0, 0], sizes = [8, 32], strides = [1, 1]} : vector<8x128xf32> to vector<8x32xf32>
    %828 = arith.negf %827 : vector<8x32xf32>
    %829 = math.exp %828 : vector<8x32xf32>
    %cst_127 = arith.constant 1.000000e+00 : f32
    %830 = vector.broadcast %cst_127 : f32 to vector<8x32xf32>
    %831 = arith.addf %830, %829 : vector<8x32xf32>
    %832 = arith.divf %830, %831 : vector<8x32xf32>
    %833 = vector.extract_strided_slice %826 {offsets = [0, 32], sizes = [8, 32], strides = [1, 1]} : vector<8x128xf32> to vector<8x32xf32>
    %834 = arith.negf %833 : vector<8x32xf32>
    %835 = math.exp %834 : vector<8x32xf32>
    %cst_128 = arith.constant 1.000000e+00 : f32
    %836 = vector.broadcast %cst_128 : f32 to vector<8x32xf32>
    %837 = arith.addf %836, %835 : vector<8x32xf32>
    %838 = arith.divf %836, %837 : vector<8x32xf32>
    %839 = vector.extract_strided_slice %826 {offsets = [0, 64], sizes = [8, 32], strides = [1, 1]} : vector<8x128xf32> to vector<8x32xf32>
    %840 = math.tanh %839 : vector<8x32xf32>
    %841 = vector.extract_strided_slice %826 {offsets = [0, 96], sizes = [8, 32], strides = [1, 1]} : vector<8x128xf32> to vector<8x32xf32>
    %842 = arith.negf %841 : vector<8x32xf32>
    %843 = math.exp %842 : vector<8x32xf32>
    %cst_129 = arith.constant 1.000000e+00 : f32
    %844 = vector.broadcast %cst_129 : f32 to vector<8x32xf32>
    %845 = arith.addf %844, %843 : vector<8x32xf32>
    %846 = arith.divf %844, %845 : vector<8x32xf32>
    %847 = arith.mulf %838, %820 : vector<8x32xf32>
    %848 = arith.mulf %832, %840 : vector<8x32xf32>
    %849 = arith.addf %847, %848 : vector<8x32xf32>
    %850 = math.tanh %849 : vector<8x32xf32>
    %851 = arith.mulf %846, %850 : vector<8x32xf32>
    %852 = vector.extract_strided_slice %619 {offsets = [8, 0, 0], sizes = [1, 8, 128], strides = [1, 1, 1]} : vector<10x8x128xf32> to vector<1x8x128xf32>
    %853 = vector.shape_cast %852 : vector<1x8x128xf32> to vector<8x128xf32>
    %cst_130 = arith.constant dense<0.000000e+00> : vector<8x128xf32>
    %854 = tpu.matmul %851, %3, %cst_130 {dimension_numbers = #tpu.dot_dimension_numbers<[1], [0], [0], [1], [0, 0, 1, 1], [], []>} : vector<8x32xf32>, vector<32x128xf32>, vector<8x128xf32> -> vector<8x128xf32>
    %855 = arith.addf %853, %854 : vector<8x128xf32>
    %856 = vector.extract_strided_slice %855 {offsets = [0, 0], sizes = [8, 32], strides = [1, 1]} : vector<8x128xf32> to vector<8x32xf32>
    %857 = arith.negf %856 : vector<8x32xf32>
    %858 = math.exp %857 : vector<8x32xf32>
    %cst_131 = arith.constant 1.000000e+00 : f32
    %859 = vector.broadcast %cst_131 : f32 to vector<8x32xf32>
    %860 = arith.addf %859, %858 : vector<8x32xf32>
    %861 = arith.divf %859, %860 : vector<8x32xf32>
    %862 = vector.extract_strided_slice %855 {offsets = [0, 32], sizes = [8, 32], strides = [1, 1]} : vector<8x128xf32> to vector<8x32xf32>
    %863 = arith.negf %862 : vector<8x32xf32>
    %864 = math.exp %863 : vector<8x32xf32>
    %cst_132 = arith.constant 1.000000e+00 : f32
    %865 = vector.broadcast %cst_132 : f32 to vector<8x32xf32>
    %866 = arith.addf %865, %864 : vector<8x32xf32>
    %867 = arith.divf %865, %866 : vector<8x32xf32>
    %868 = vector.extract_strided_slice %855 {offsets = [0, 64], sizes = [8, 32], strides = [1, 1]} : vector<8x128xf32> to vector<8x32xf32>
    %869 = math.tanh %868 : vector<8x32xf32>
    %870 = vector.extract_strided_slice %855 {offsets = [0, 96], sizes = [8, 32], strides = [1, 1]} : vector<8x128xf32> to vector<8x32xf32>
    %871 = arith.negf %870 : vector<8x32xf32>
    %872 = math.exp %871 : vector<8x32xf32>
    %cst_133 = arith.constant 1.000000e+00 : f32
    %873 = vector.broadcast %cst_133 : f32 to vector<8x32xf32>
    %874 = arith.addf %873, %872 : vector<8x32xf32>
    %875 = arith.divf %873, %874 : vector<8x32xf32>
    %876 = arith.mulf %867, %849 : vector<8x32xf32>
    %877 = arith.mulf %861, %869 : vector<8x32xf32>
    %878 = arith.addf %876, %877 : vector<8x32xf32>
    %879 = math.tanh %878 : vector<8x32xf32>
    %880 = arith.mulf %875, %879 : vector<8x32xf32>
    %881 = vector.extract_strided_slice %619 {offsets = [9, 0, 0], sizes = [1, 8, 128], strides = [1, 1, 1]} : vector<10x8x128xf32> to vector<1x8x128xf32>
    %882 = vector.shape_cast %881 : vector<1x8x128xf32> to vector<8x128xf32>
    %cst_134 = arith.constant dense<0.000000e+00> : vector<8x128xf32>
    %883 = tpu.matmul %880, %3, %cst_134 {dimension_numbers = #tpu.dot_dimension_numbers<[1], [0], [0], [1], [0, 0, 1, 1], [], []>} : vector<8x32xf32>, vector<32x128xf32>, vector<8x128xf32> -> vector<8x128xf32>
    %884 = arith.addf %882, %883 : vector<8x128xf32>
    %885 = vector.extract_strided_slice %884 {offsets = [0, 0], sizes = [8, 32], strides = [1, 1]} : vector<8x128xf32> to vector<8x32xf32>
    %886 = arith.negf %885 : vector<8x32xf32>
    %887 = math.exp %886 : vector<8x32xf32>
    %cst_135 = arith.constant 1.000000e+00 : f32
    %888 = vector.broadcast %cst_135 : f32 to vector<8x32xf32>
    %889 = arith.addf %888, %887 : vector<8x32xf32>
    %890 = arith.divf %888, %889 : vector<8x32xf32>
    %891 = vector.extract_strided_slice %884 {offsets = [0, 32], sizes = [8, 32], strides = [1, 1]} : vector<8x128xf32> to vector<8x32xf32>
    %892 = arith.negf %891 : vector<8x32xf32>
    %893 = math.exp %892 : vector<8x32xf32>
    %cst_136 = arith.constant 1.000000e+00 : f32
    %894 = vector.broadcast %cst_136 : f32 to vector<8x32xf32>
    %895 = arith.addf %894, %893 : vector<8x32xf32>
    %896 = arith.divf %894, %895 : vector<8x32xf32>
    %897 = vector.extract_strided_slice %884 {offsets = [0, 64], sizes = [8, 32], strides = [1, 1]} : vector<8x128xf32> to vector<8x32xf32>
    %898 = math.tanh %897 : vector<8x32xf32>
    %899 = vector.extract_strided_slice %884 {offsets = [0, 96], sizes = [8, 32], strides = [1, 1]} : vector<8x128xf32> to vector<8x32xf32>
    %900 = arith.negf %899 : vector<8x32xf32>
    %901 = math.exp %900 : vector<8x32xf32>
    %cst_137 = arith.constant 1.000000e+00 : f32
    %902 = vector.broadcast %cst_137 : f32 to vector<8x32xf32>
    %903 = arith.addf %902, %901 : vector<8x32xf32>
    %904 = arith.divf %902, %903 : vector<8x32xf32>
    %905 = arith.mulf %896, %878 : vector<8x32xf32>
    %906 = arith.mulf %890, %898 : vector<8x32xf32>
    %907 = arith.addf %905, %906 : vector<8x32xf32>
    %908 = math.tanh %907 : vector<8x32xf32>
    %909 = arith.mulf %904, %908 : vector<8x32xf32>
    %910 = vector.shape_cast %648 : vector<8x32xf32> to vector<1x8x32xf32>
    %911 = vector.shape_cast %677 : vector<8x32xf32> to vector<1x8x32xf32>
    %912 = vector.shape_cast %706 : vector<8x32xf32> to vector<1x8x32xf32>
    %913 = vector.shape_cast %735 : vector<8x32xf32> to vector<1x8x32xf32>
    %914 = vector.shape_cast %764 : vector<8x32xf32> to vector<1x8x32xf32>
    %915 = vector.shape_cast %793 : vector<8x32xf32> to vector<1x8x32xf32>
    %916 = vector.shape_cast %822 : vector<8x32xf32> to vector<1x8x32xf32>
    %917 = vector.shape_cast %851 : vector<8x32xf32> to vector<1x8x32xf32>
    %918 = vector.shape_cast %880 : vector<8x32xf32> to vector<1x8x32xf32>
    %919 = vector.shape_cast %909 : vector<8x32xf32> to vector<1x8x32xf32>
    %920 = tpu.concatenate %910, %911, %912, %913, %914, %915, %916, %917, %918, %919 in 0 : vector<1x8x32xf32>, vector<1x8x32xf32>, vector<1x8x32xf32>, vector<1x8x32xf32>, vector<1x8x32xf32>, vector<1x8x32xf32>, vector<1x8x32xf32>, vector<1x8x32xf32>, vector<1x8x32xf32>, vector<1x8x32xf32> -> vector<10x8x32xf32>
    %921 = vector.shape_cast %920 : vector<10x8x32xf32> to vector<80x32xf32>
    %c0_138 = arith.constant 0 : index
    %c0_139 = arith.constant 0 : index
    %922 = vector.load %arg9[%c0_138, %c0_139] : memref<32x16xf32, #tpu.memory_space<vmem>>, vector<32x16xf32>
    %cst_140 = arith.constant dense<0.000000e+00> : vector<80x16xf32>
    %923 = tpu.matmul %921, %922, %cst_140 {dimension_numbers = #tpu.dot_dimension_numbers<[1], [0], [0], [1], [0, 0, 1, 1], [], []>} : vector<80x32xf32>, vector<32x16xf32>, vector<80x16xf32> -> vector<80x16xf32>
    %c0_141 = arith.constant 0 : index
    %c0_142 = arith.constant 0 : index
    %924 = vector.load %arg10[%c0_141, %c0_142] : memref<1x16xf32, #tpu.memory_space<vmem>>, vector<1x16xf32>
    %925 = vector.broadcast %924 : vector<1x16xf32> to vector<80x16xf32>
    %926 = arith.addf %923, %925 : vector<80x16xf32>
    %cst_143 = arith.constant 0.000000e+00 : f32
    %927 = vector.broadcast %cst_143 : f32 to vector<80x16xf32>
    %928 = arith.maximumf %926, %927 : vector<80x16xf32>
    %c0_144 = arith.constant 0 : index
    %c0_145 = arith.constant 0 : index
    %929 = vector.load %arg11[%c0_144, %c0_145] : memref<16x1xf32, #tpu.memory_space<vmem>>, vector<16x1xf32>
    %cst_146 = arith.constant dense<0.000000e+00> : vector<80x1xf32>
    %930 = tpu.matmul %928, %929, %cst_146 {dimension_numbers = #tpu.dot_dimension_numbers<[1], [0], [0], [1], [0, 0, 1, 1], [], []>} : vector<80x16xf32>, vector<16x1xf32>, vector<80x1xf32> -> vector<80x1xf32>
    %c0_147 = arith.constant 0 : index
    %c0_148 = arith.constant 0 : index
    %931 = vector.load %arg12[%c0_147, %c0_148] : memref<1x1xf32, #tpu.memory_space<vmem>>, vector<1x1xf32>
    %932 = vector.broadcast %931 : vector<1x1xf32> to vector<80x1xf32>
    %933 = arith.addf %930, %932 : vector<80x1xf32>
    %c0_149 = arith.constant 0 : index
    %c0_150 = arith.constant 0 : index
    %934 = vector.load %arg13[%c0_149, %c0_150] : memref<80x1xf32, #tpu.memory_space<vmem>>, vector<80x1xf32>
    tpu.vector_store %arg13[%c0_149, %c0_150], %933 {strides = array<i32>} : memref<80x1xf32, #tpu.memory_space<vmem>>, vector<80x1xf32>,
    return
  }
  func.func @transform_0(%arg0: i32) -> (i32, i32, i32) {
    %c0_i32 = arith.constant 0 : i32
    %c0_i32_0 = arith.constant 0 : i32
    %c0_i32_1 = arith.constant 0 : i32
    %c0_i32_2 = arith.constant 0 : i32
    return %c0_i32, %c0_i32_0, %c0_i32_1 : i32, i32, i32
  }
  func.func @transform_1(%arg0: i32) -> (i32, i32) {
    %c0_i32 = arith.constant 0 : i32
    %c0_i32_0 = arith.constant 0 : i32
    %c0_i32_1 = arith.constant 0 : i32
    return %c0_i32, %c0_i32_0 : i32, i32
  }
  func.func @transform_2(%arg0: i32) -> (i32, i32) {
    %c0_i32 = arith.constant 0 : i32
    %c0_i32_0 = arith.constant 0 : i32
    %c0_i32_1 = arith.constant 0 : i32
    return %c0_i32, %c0_i32_0 : i32, i32
  }
  func.func @transform_3(%arg0: i32) -> (i32, i32) {
    %c0_i32 = arith.constant 0 : i32
    %c0_i32_0 = arith.constant 0 : i32
    %c0_i32_1 = arith.constant 0 : i32
    return %c0_i32, %c0_i32_0 : i32, i32
  }
  func.func @transform_4(%arg0: i32) -> (i32, i32) {
    %c0_i32 = arith.constant 0 : i32
    %c0_i32_0 = arith.constant 0 : i32
    %c0_i32_1 = arith.constant 0 : i32
    return %c0_i32, %c0_i32_0 : i32, i32
  }
  func.func @transform_5(%arg0: i32) -> (i32, i32) {
    %c0_i32 = arith.constant 0 : i32
    %c0_i32_0 = arith.constant 0 : i32
    %c0_i32_1 = arith.constant 0 : i32
    return %c0_i32, %c0_i32_0 : i32, i32
  }
  func.func @transform_6(%arg0: i32) -> (i32, i32) {
    %c0_i32 = arith.constant 0 : i32
    %c0_i32_0 = arith.constant 0 : i32
    %c0_i32_1 = arith.constant 0 : i32
    return %c0_i32, %c0_i32_0 : i32, i32
  }
  func.func @transform_7(%arg0: i32) -> (i32, i32) {
    %c0_i32 = arith.constant 0 : i32
    %c0_i32_0 = arith.constant 0 : i32
    %c0_i32_1 = arith.constant 0 : i32
    return %c0_i32, %c0_i32_0 : i32, i32
  }
  func.func @transform_8(%arg0: i32) -> (i32, i32) {
    %c0_i32 = arith.constant 0 : i32
    %c0_i32_0 = arith.constant 0 : i32
    %c0_i32_1 = arith.constant 0 : i32
    return %c0_i32, %c0_i32_0 : i32, i32
  }
  func.func @transform_9(%arg0: i32) -> (i32, i32) {
    %c0_i32 = arith.constant 0 : i32
    %c0_i32_0 = arith.constant 0 : i32
    %c0_i32_1 = arith.constant 0 : i32
    return %c0_i32, %c0_i32_0 : i32, i32
  }
  func.func @transform_10(%arg0: i32) -> (i32, i32) {
    %c0_i32 = arith.constant 0 : i32
    %c0_i32_0 = arith.constant 0 : i32
    %c0_i32_1 = arith.constant 0 : i32
    return %c0_i32, %c0_i32_0 : i32, i32
  }
  func.func @transform_11(%arg0: i32) -> (i32, i32) {
    %c0_i32 = arith.constant 0 : i32
    %c0_i32_0 = arith.constant 0 : i32
    %c0_i32_1 = arith.constant 0 : i32
    return %c0_i32, %c0_i32_0 : i32, i32
  }
  func.func @transform_12(%arg0: i32) -> (i32, i32) {
    %c0_i32 = arith.constant 0 : i32
    %c0_i32_0 = arith.constant 0 : i32
    %c0_i32_1 = arith.constant 0 : i32
    return %c0_i32, %c0_i32_0 : i32, i32
  }
}

</mosaic_0001>

<bundles_post_ra>
// kernel: tpu_custom_call.1
= control target key start
LH: loop header
LB: loop body
LE: loop exit
PB: predicated region body
PF: predicated region fallthrough
CT: control target
= control target key end

     0   :  { %s3756_s0 = inlined_call_operand.vmem [shape: f32[10,8,8], index: 0, kind: input, shape index: {}]   ;;  %s3757_s1 = inlined_call_operand.vmem [shape: f32[8,256], index: 1, kind: input, shape index: {}]   ;;  %s3758_s2 = inlined_call_operand.vmem [shape: f32[1,256], index: 2, kind: input, shape index: {}]   ;;  %s3759_s3 = inlined_call_operand.vmem [shape: f32[32,128], index: 3, kind: input, shape index: {}]   ;;  %s3760_s4 = inlined_call_operand.vmem [shape: f32[32,128], index: 4, kind: input, shape index: {}]   ;;  %s3761_s5 = inlined_call_operand.vmem [shape: f32[64,128], index: 5, kind: input, shape index: {}]   ;;  %s3762_s6 = inlined_call_operand.hbm [shape: f32[32,128], index: 6, kind: input, shape index: {}]   ;;  %s3763_s7 = inlined_call_operand.vmem [shape: f32[1,128], index: 7, kind: input, shape index: {}]   ;;  %s3764_s8 = inlined_call_operand.vmem [shape: f32[32,16], index: 8, kind: input, shape index: {}]   ;;  %s3765_s9 = inlined_call_operand.vmem [shape: f32[1,16], index: 9, kind: input, shape index: {}]   ;;  %s3766_s10 = inlined_call_operand.vmem [shape: f32[16,1], index: 10, kind: input, shape index: {}]   ;;  %s3767_s11 = inlined_call_operand.<no memory space> [shape: f32[1,1], index: 11, kind: input, shape index: {}]   ;;  %s3768_s12 = inlined_call_operand.vmem [shape: f32[80,1], index: 12, kind: output, shape index: {}]  }
   0x1   :  { %v17_v0 = vstv %s3767_s11 }
   0x2   :  { %18 = vst [vmem:[#allocation2] sm:$0x1] %v17_v0 }
   0x3   :  { %19 = vsyncpa [#allocation4], 0  ;;  %s36_s25 = sshll.u32 %s3762_s6, 4  ;;  %s2804_s26 = smov [#allocation3]   ;;  %s37_s25 = int_to_ptr.hbm [resolvable:$true] %s36_s25 }
   0x4   :  { %s38_s27 = sshll.u32 %s2804_s26, 4  ;;  %s2805_s28 = smov 128   ;;  %s39_s27 = int_to_ptr.vmem [resolvable:$true] %s38_s27 }
   0x5   :  { %s2806_s29 = smov 8  }
   0x6   :  { %44 = dma.hbm_to_vmem [thread:$0]  %s37_s25, 512, %s39_s27, [#allocation4], %s2805_s28, %s2805_s28, %s2806_s29  }
   0x7   :  { %2802 = dma.done.wait [#allocation4], 512  }
   0x8   :  { %2803 = vsyncadd [#allocation4], 4294966784  ;;  %vm89_vm0 = vcmask 64512   ;;  %v82_v1 = vld [vmem:[%s3757_s1 + $0x8] sm:$0xff]  ;;  %v2887_v2 = vld [vmem:[%s3756_s0] sm:$0xff]  ;;  %v2807_v11 = vmov 0.0  }
   0x9   :  { %182 = vmatpush.msra.mxu1 %v82_v1  ;;  %v2894_v3 = vld [vmem:[%s3756_s0 + $0x8] sm:$0xff]  ;;  %v2901_v4 = vld [vmem:[%s3756_s0 + $0x10] sm:$0xff]  ;;  %v2908_v5 = vld [vmem:[%s3756_s0 + $0x18] sm:$0xff]  ;;  %s2808_s21 = smov 64   ;;  %vm214_vm5 = vcmask 261120  }
   0xa   :  { %2417 = vmatmul.msk.f32.vlgmr.msra.gmra.mxu1 %vm89_vm0, %v2887_v2  ;;  %v2915_v6 = vld [vmem:[%s3760_s4 + $0x18] sm:$0xff]  ;;  %v2920_v7 = vld [vmem:[%s3760_s4 + $0x10] sm:$0xff]  ;;  %v2927_v8 = vld [vmem:[%s3756_s0 + $0x20] sm:$0xff] }
   0xb   :  { %288 = vmatpush.msra.mxu3 %v2915_v6  ;;  %v2934_v9 = vld [vmem:[%s3760_s4 + $0x8] sm:$0xff]  ;;  %v2939_v10 = vld [vmem:[%s3760_s4] sm:$0xff]  ;;  %v2959_v13 = vld [vmem:[%s3756_s0 + $0x30] sm:$0xff] }
   0xc   :  { %v2947_v12 = vld [vmem:[%s3756_s0 + $0x28] sm:$0xff]  ;;  %v2969_v14 = vld [vmem:[%s3756_s0 + $0x38] sm:$0xff]  ;;  %v2976_v15 = vld [vmem:[%s3756_s0 + $0x40] sm:$0xff] }
   0xd   :  { %289 = vmatpush.msra.mxu3 %v2920_v7  ;;  %v2983_v16 = vld [vmem:[%s3756_s0 + $0x48] sm:$0xff]  ;;  %v3006_v26 = vld [vmem:[%s3758_s2] sm:$0x3]  ;;  %s2809_s2 = smov 32  }
   0xe   :  { %v3009_v27 = vperm.slane %v3006_v26, 1 }
   0xf   :  { %290 = vmatpush.msra.mxu3 %v2934_v9 }
  0x11   :  { %291 = vmatpush.msra.mxu3 %v2939_v10 }
  0x12   :  { %2418 = vmatmul.msk.f32.gmra.mxu1 %vm89_vm0, %v2894_v3  ;;  %292 = vmatmul.f32.vlgmr.msra.gmra.mxu3 %v2807_v11 }
  0x13   :  { %414 = vmatpush.msrb.mxu3 %v2915_v6 }
  0x15   :  { %415 = vmatpush.msrb.mxu3 %v2920_v7 }
  0x17   :  { %416 = vmatpush.msrb.mxu3 %v2934_v9 }
  0x19   :  { %417 = vmatpush.msrb.mxu3 %v2939_v10 }
  0x1a   :  { %2419 = vmatmul.msk.f32.gmra.mxu1 %vm89_vm0, %v2901_v4 }
  0x1b   :  { %540 = vmatpush.msra.mxu3 %v2915_v6 }
  0x1d   :  { %541 = vmatpush.msra.mxu3 %v2920_v7 }
  0x1f   :  { %542 = vmatpush.msra.mxu3 %v2934_v9 }
  0x21   :  { %543 = vmatpush.msra.mxu3 %v2939_v10 }
  0x22   :  { %2420 = vmatmul.msk.f32.gmra.mxu1 %vm89_vm0, %v2908_v5 }
  0x2a   :  { %2421 = vmatmul.msk.f32.gmra.mxu1 %vm89_vm0, %v2927_v8 }
  0x32   :  { %2422 = vmatmul.msk.f32.gmra.mxu1 %vm89_vm0, %v2947_v12 }
  0x3a   :  { %2423 = vmatmul.msk.f32.gmra.mxu1 %vm89_vm0, %v2959_v13 }
  0x42   :  { %2424 = vmatmul.msk.f32.gmra.mxu1 %vm89_vm0, %v2969_v14 }
  0x4a   :  { %2425 = vmatmul.msk.f32.gmra.mxu1 %vm89_vm0, %v2976_v15 }
  0x52   :  { %2426 = vmatmul.msk.f32.gmra.mxu1 %vm89_vm0, %v2983_v16 }
  0x87   :  { %v2987_v17 = vpop.f32.mrf.mxu1 }
  0x8f   :  { %v2989_v18 = vpop.f32.mrf.mxu1 }
  0x95   :  { %v293_v29 = vpop.f32.mrf.mxu3 }
  0x97   :  { %v2991_v19 = vpop.f32.mrf.mxu1 }
  0x9f   :  { %v2993_v20 = vpop.f32.mrf.mxu1 }
  0xa7   :  { %v2995_v21 = vpop.f32.mrf.mxu1 }
  0xaf   :  { %v2997_v22 = vpop.f32.mrf.mxu1 }
  0xb7   :  { %v2999_v23 = vpop.f32.mrf.mxu1 }
  0xbf   :  { %v3001_v24 = vpop.f32.mrf.mxu1 }
  0xc7   :  { %v208_v25 = vpop.f32.mrf.mxu1 }
  0xc8   :  { %v209_v55 = vadd.f32 %v208_v25, %v3009_v27 }
  0xcf   :  { %v211_v28 = vpop.f32.mrf.mxu1 }
  0xd0   :  { %v212_v30 = vadd.f32 %v211_v28, %v3009_v27 }
  0xd2   :  { %v296_v31 = vadd.f32 %v293_v29, %v212_v30 }
  0xd4   :  { %2529 = vtanh.f32 %v296_v31  ;;  %v2428_v33 = vmul.f32 -1.442695, %v296_v31 }
  0xd6   :  { %2531 = vpow2.f32 %v2428_v33 }
  0xda   :  { %v2530_v32 = vpop.eup %2529 }
  0xdb   :  { %319 = vrot.lane.b32.xlu0 %v2530_v32, %s2808_s21 }
  0xdc   :  { %v2532_v34 = vpop.eup %2531 }
  0xdd   :  { %v300_v35 = vadd.f32 1.0, %v2532_v34 }
  0xdf   :  { %2533 = vrcp.f32 %v300_v35  ;;  %v312_v41 = vand.u32 2147483648, %v300_v35  ;;  %vm306_vm2 = vweird.f32 %v300_v35  ;;  %v310_v42 = vand.u32 2147483647, %v300_v35 }
  0xe1   :  { %v313_v44 = vor.u32 1.1754944e-38, %v312_v41  ;;  %vm311_vm4 = vcmp.eq.f32.partialorder %v310_v42, 8.507059e+37 }
  0xe5   :  { %v2534_v36 = vpop.eup %2533 }
  0xe6   :  { %v302_v37 = vmul.f32 %v2534_v36, %v300_v35  ;;  %vm307_vm1 = vweird.f32 %v2534_v36  ;;  %v3033_v35 = vld [vmem:[%s3759_s3 + $0x18] sm:$0xff] }
  0xe7   :  { %vm308_vm3 = vmor %vm306_vm2, %vm307_vm1  ;;  %230 = vmatpush.msra.mxu2 %v3033_v35 }
  0xe8   :  { %v303_v38 = vsub.f32 1.0, %v302_v37  ;;  %v81_v37 = vld [vmem:[%s3757_s1] sm:$0xff] }
  0xe9   :  { %135 = vmatpush.msra.mxu0 %v81_v37 }
  0xea   :  { %v304_v39 = vmul.f32 %v2534_v36, %v303_v38  ;;  %v3047_v38 = vld [vmem:[%s3759_s3 + $0x8] sm:$0xff]  ;;  %2407 = vmatmul.msk.f32.vlgmr.msra.gmra.mxu0 %vm89_vm0, %v2887_v2 }
  0xec   :  { %v305_v40 = vadd.f32 %v2534_v36, %v304_v39  ;;  %v3055_v39 = vld [vmem:[%s3759_s3] sm:$0xff] }
  0xee   :  { %v309_v43 = vsel %vm308_vm3, %v2534_v36, %v305_v40  ;;  %v3038_v36 = vld [vmem:[%s3759_s3 + $0x10] sm:$0xff] }
  0xef   :  { %v314_v46 = vsel %vm311_vm4, %v313_v44, %v309_v43  ;;  %231 = vmatpush.msra.mxu2 %v3038_v36 }
  0xf0   :  { %v317_v48 = vmul.f32 0.0, %v314_v46 }
  0xf1   :  { %232 = vmatpush.msra.mxu2 %v3047_v38 }
  0xf2   :  { %2408 = vmatmul.msk.f32.gmra.mxu0 %vm89_vm0, %v2894_v3 }
  0xf3   :  { %233 = vmatpush.msra.mxu2 %v3055_v39 }
  0xf4   :  { %234 = vmatmul.f32.vlgmr.msra.gmra.mxu2 %v2807_v11 }
  0xf5   :  { %351 = vmatpush.msrb.mxu2 %v3033_v35 }
  0xf7   :  { %352 = vmatpush.msrb.mxu2 %v3038_v36 }
  0xf9   :  { %353 = vmatpush.msrb.mxu2 %v3047_v38 }
  0xfa   :  { %2409 = vmatmul.msk.f32.gmra.mxu0 %vm89_vm0, %v2901_v4  ;;  %v3092_v4 = vperm.slane %v3006_v26, 0 }
  0xfb   :  { %354 = vmatpush.msrb.mxu2 %v3055_v39 }
  0xfd   :  { %477 = vmatpush.msra.mxu2 %v3033_v35 }
  0xff   :  { %478 = vmatpush.msra.mxu2 %v3038_v36 }
 0x101   :  { %479 = vmatpush.msra.mxu2 %v3047_v38 }
 0x102   :  { %2410 = vmatmul.msk.f32.gmra.mxu0 %vm89_vm0, %v2908_v5 }
 0x103   :  { %480 = vmatpush.msra.mxu2 %v3055_v39 }
 0x10a   :  { %2411 = vmatmul.msk.f32.gmra.mxu0 %vm89_vm0, %v2927_v8 }
 0x112   :  { %2412 = vmatmul.msk.f32.gmra.mxu0 %vm89_vm0, %v2947_v12 }
 0x11a   :  { %2413 = vmatmul.msk.f32.gmra.mxu0 %vm89_vm0, %v2959_v13 }
 0x122   :  { %2414 = vmatmul.msk.f32.gmra.mxu0 %vm89_vm0, %v2969_v14 }
 0x12a   :  { %2415 = vmatmul.msk.f32.gmra.mxu0 %vm89_vm0, %v2976_v15 }
 0x132   :  { %2416 = vmatmul.msk.f32.gmra.mxu0 %vm89_vm0, %v2983_v16 }
 0x14d   :  { %v320_v45 = vpop.permute.xlu0 %319 }
 0x14e   :  { %v322_v47 = vmul.f32 %v320_v45, %v314_v46 }
 0x150   :  { %324 = vrot.lane.b32.xlu0 %v322_v47, %s2809_s2 }
 0x167   :  { %v137_v5 = vpop.f32.mrf.mxu0 }
 0x168   :  { %v138_v8 = vadd.f32 %v137_v5, %v3092_v4 }
 0x177   :  { %v235_v42 = vpop.f32.mrf.mxu2 }
 0x178   :  { %v238_v12 = vadd.f32 %v235_v42, %v138_v8 }
 0x17a   :  { %v2427_v14 = vmul.f32 -1.442695, %v238_v12 }
 0x1c2   :  { %v325_v49 = vpop.permute.xlu0 %324 }
 0x1c3   :  { %v3014_v50 = vadd.f32 %v325_v49, %v317_v48 }
 0x1c5   :  { %2535 = vtanh.f32 %v3014_v50 }
 0x1cb   :  { %v2536_v51 = vpop.eup %2535 }
 0x1cc   :  { %330 = vrot.lane.b32.xlu1 %v2536_v51, %s2808_s21 }
 0x23e   :  { %v331_v52 = vpop.permute.xlu1 %330 }
 0x23f   :  { %v3018_v53 = vmul.f32 %v331_v52, %v314_v46 }
 0x241   :  { %398 = vrot.lane.b32.xlu1 %v3018_v53, %s2809_s2 }
 0x2b3   :  { %v399_v54 = vpop.permute.xlu1 %398 }
 0x2b4   :  { %2431 = vmatmul.msk.f32.vlgmr.msrb.gmra.mxu3 %vm214_vm5, %v399_v54 }
 0x2b5   :  { %666 = vmatpush.msrb.mxu3 %v2915_v6 }
 0x2b7   :  { %667 = vmatpush.msrb.mxu3 %v2920_v7 }
 0x2b9   :  { %668 = vmatpush.msrb.mxu3 %v2934_v9 }
 0x2bb   :  { %669 = vmatpush.msrb.mxu3 %v2939_v10 }
 0x337   :  { %v419_v56 = vpop.f32.mrf.mxu3 }
 0x338   :  { %v422_v57 = vadd.f32 %v419_v56, %v209_v55 }
 0x33a   :  { %2537 = vtanh.f32 %v422_v57  ;;  %v2432_v59 = vmul.f32 -1.442695, %v422_v57 }
 0x33c   :  { %2539 = vpow2.f32 %v2432_v59 }
 0x340   :  { %v2538_v58 = vpop.eup %2537 }
 0x341   :  { %445 = vrot.lane.b32.xlu2 %v2538_v58, %s2808_s21  ;;  %v206_v58 = vadd.f32 %v3001_v24, %v3009_v27 }
 0x342   :  { %v2540_v60 = vpop.eup %2539 }
 0x343   :  { %v426_v61 = vadd.f32 1.0, %v2540_v60 }
 0x345   :  { %2541 = vrcp.f32 %v426_v61  ;;  %v438_v29 = vand.u32 2147483648, %v426_v61  ;;  %vm432_vm7 = vweird.f32 %v426_v61  ;;  %v436_v25 = vand.u32 2147483647, %v426_v61 }
 0x347   :  { %v439_v31 = vor.u32 1.1754944e-38, %v438_v29  ;;  %vm437_vm9 = vcmp.eq.f32.partialorder %v436_v25, 8.507059e+37 }
 0x34b   :  { %v2542_v62 = vpop.eup %2541 }
 0x34c   :  { %v428_v63 = vmul.f32 %v2542_v62, %v426_v61  ;;  %vm433_vm6 = vweird.f32 %v2542_v62 }
 0x34d   :  { %vm434_vm8 = vmor %vm432_vm7, %vm433_vm6 }
 0x34e   :  { %v429_v0 = vsub.f32 1.0, %v428_v63 }
 0x350   :  { %v430_v1 = vmul.f32 %v2542_v62, %v429_v0 }
 0x352   :  { %v431_v28 = vadd.f32 %v2542_v62, %v430_v1 }
 0x354   :  { %v435_v30 = vsel %vm434_vm8, %v2542_v62, %v431_v28 }
 0x355   :  { %v440_v33 = vsel %vm437_vm9, %v439_v31, %v435_v30 }
 0x356   :  { %v443_v2 = vmul.f32 %v440_v33, %v3014_v50 }
 0x39b   :  { %v446_v32 = vpop.permute.xlu2 %445 }
 0x39c   :  { %v448_v34 = vmul.f32 %v446_v32, %v440_v33 }
 0x39e   :  { %450 = vrot.lane.b32.xlu2 %v448_v34, %s2809_s2 }
 0x3f8   :  { %v451_v40 = vpop.permute.xlu2 %450 }
 0x3f9   :  { %v3073_v41 = vadd.f32 %v451_v40, %v443_v2 }
 0x3fb   :  { %2543 = vtanh.f32 %v3073_v41 }
 0x3fc   :  { %2545 = vtanh.f32 %v238_v12 }
 0x3fd   :  { %2547 = vpow2.f32 %v2427_v14 }
 0x401   :  { %v2544_v3 = vpop.eup %2543 }
 0x402   :  { %456 = vrot.lane.b32.xlu0 %v2544_v3, %s2808_s21  ;;  %v2546_v44 = vpop.eup %2545 }
 0x403   :  { %261 = vrot.lane.b32.xlu2 %v2546_v44, %s2808_s21  ;;  %v2548_v15 = vpop.eup %2547 }
 0x404   :  { %v242_v16 = vadd.f32 1.0, %v2548_v15 }
 0x406   :  { %2549 = vrcp.f32 %v242_v16  ;;  %v254_v46 = vand.u32 2147483648, %v242_v16  ;;  %vm248_vm10 = vweird.f32 %v242_v16  ;;  %v252_v48 = vand.u32 2147483647, %v242_v16 }
 0x408   :  { %v255_v50 = vor.u32 1.1754944e-38, %v254_v46  ;;  %vm253_vm13 = vcmp.eq.f32.partialorder %v252_v48, 8.507059e+37 }
 0x40c   :  { %v2550_v26 = vpop.eup %2549 }
 0x40d   :  { %v244_v45 = vmul.f32 %v2550_v26, %v242_v16  ;;  %vm249_vm11 = vweird.f32 %v2550_v26 }
 0x40e   :  { %vm250_vm12 = vmor %vm248_vm10, %vm249_vm11 }
 0x40f   :  { %v245_v47 = vsub.f32 1.0, %v244_v45  ;;  %v140_v45 = vpop.f32.mrf.mxu0 }
 0x410   :  { %v141_v46 = vadd.f32 %v140_v45, %v3092_v4 }
 0x411   :  { %v246_v49 = vmul.f32 %v2550_v26, %v245_v47 }
 0x413   :  { %v247_v51 = vadd.f32 %v2550_v26, %v246_v49 }
 0x415   :  { %v251_v54 = vsel %vm250_vm12, %v2550_v26, %v247_v51 }
 0x416   :  { %v256_v55 = vsel %vm253_vm13, %v255_v50, %v251_v54 }
 0x417   :  { %v259_v61 = vmul.f32 0.0, %v256_v55 }
 0x45d   :  { %v262_v52 = vpop.permute.xlu2 %261 }
 0x45e   :  { %v264_v56 = vmul.f32 %v262_v52, %v256_v55 }
 0x474   :  { %v457_v43 = vpop.permute.xlu0 %456 }
 0x475   :  { %v3095_v13 = vmul.f32 %v457_v43, %v440_v33 }
 0x477   :  { %524 = vrot.lane.b32.xlu1 %v3095_v13, %s2809_s2 }
 0x47f   :  { %266 = vrot.lane.b32.xlu1 %v264_v56, %s2809_s2 }
 0x4e9   :  { %v525_v57 = vpop.permute.xlu1 %524 }
 0x4ea   :  { %2435 = vmatmul.msk.f32.vlgmr.msra.gmra.mxu3 %vm214_vm5, %v525_v57 }
 0x4eb   :  { %792 = vmatpush.msra.mxu3 %v2915_v6 }
 0x4ed   :  { %793 = vmatpush.msra.mxu3 %v2920_v7 }
 0x4ef   :  { %794 = vmatpush.msra.mxu3 %v2934_v9 }
 0x4f1   :  { %795 = vmatpush.msra.mxu3 %v2939_v10  ;;  %v267_v62 = vpop.permute.xlu1 %266 }
 0x4f2   :  { %v3108_v63 = vadd.f32 %v267_v62, %v259_v61 }
 0x56d   :  { %v545_v59 = vpop.f32.mrf.mxu3 }
 0x56e   :  { %v548_v60 = vadd.f32 %v545_v59, %v206_v58 }
 0x570   :  { %2551 = vtanh.f32 %v548_v60  ;;  %v2436_v28 = vmul.f32 -1.442695, %v548_v60 }
 0x571   :  { %2553 = vtanh.f32 %v3108_v63 }
 0x572   :  { %2555 = vpow2.f32 %v2436_v28 }
 0x576   :  { %v2552_v0 = vpop.eup %2551 }
 0x577   :  { %571 = vrot.lane.b32.xlu0 %v2552_v0, %s2808_s21  ;;  %v2554_v1 = vpop.eup %2553 }
 0x578   :  { %v2556_v29 = vpop.eup %2555 }
 0x579   :  { %v552_v25 = vadd.f32 1.0, %v2556_v29 }
 0x57b   :  { %2557 = vrcp.f32 %v552_v25  ;;  %v564_v34 = vand.u32 2147483648, %v552_v25  ;;  %vm558_vm15 = vweird.f32 %v552_v25  ;;  %v562_v37 = vand.u32 2147483647, %v552_v25 }
 0x57d   :  { %v565_v40 = vor.u32 1.1754944e-38, %v564_v34  ;;  %vm563_vm1 = vcmp.eq.f32.partialorder %v562_v37, 8.507059e+37 }
 0x57f   :  { %272 = vrot.lane.b32.xlu0 %v2554_v1, %s2808_s21 }
 0x581   :  { %v2558_v24 = vpop.eup %2557 }
 0x582   :  { %v554_v30 = vmul.f32 %v2558_v24, %v552_v25  ;;  %vm559_vm14 = vweird.f32 %v2558_v24  ;;  %v203_v25 = vadd.f32 %v2999_v23, %v3009_v27 }
 0x583   :  { %vm560_vm0 = vmor %vm558_vm15, %vm559_vm14 }
 0x584   :  { %v555_v31 = vsub.f32 1.0, %v554_v30 }
 0x586   :  { %v556_v32 = vmul.f32 %v2558_v24, %v555_v31 }
 0x588   :  { %v557_v33 = vadd.f32 %v2558_v24, %v556_v32 }
 0x58a   :  { %v561_v2 = vsel %vm560_vm0, %v2558_v24, %v557_v33 }
 0x58b   :  { %v566_v5 = vsel %vm563_vm1, %v565_v40, %v561_v2 }
 0x58c   :  { %v569_v43 = vmul.f32 %v566_v5, %v3073_v41 }
 0x5e9   :  { %v572_v3 = vpop.permute.xlu0 %571 }
 0x5ea   :  { %v574_v8 = vmul.f32 %v572_v3, %v566_v5 }
 0x5ec   :  { %576 = vrot.lane.b32.xlu2 %v574_v8, %s2809_s2 }
 0x5f1   :  { %v273_v42 = vpop.permute.xlu0 %272 }
 0x5f2   :  { %v275_v12 = vmul.f32 %v273_v42, %v256_v55 }
 0x5f4   :  { %335 = vrot.lane.b32.xlu2 %v275_v12, %s2809_s2 }
 0x646   :  { %v577_v44 = vpop.permute.xlu2 %576 }
 0x647   :  { %v3116_v14 = vadd.f32 %v577_v44, %v569_v43 }
 0x649   :  { %2559 = vtanh.f32 %v3116_v14 }
 0x64e   :  { %v3119_v15 = vpop.permute.xlu2 %335 }
 0x64f   :  { %v2560_v16 = vpop.eup %2559  ;;  %2429 = vmatmul.msk.f32.vlgmr.msrb.gmra.mxu2 %vm214_vm5, %v3119_v15 }
 0x650   :  { %582 = vrot.lane.b32.xlu1 %v2560_v16, %s2808_s21  ;;  %603 = vmatpush.msrb.mxu2 %v3033_v35 }
 0x652   :  { %604 = vmatpush.msrb.mxu2 %v3038_v36 }
 0x654   :  { %605 = vmatpush.msrb.mxu2 %v3047_v38 }
 0x656   :  { %606 = vmatpush.msrb.mxu2 %v3055_v39 }
 0x6c2   :  { %v583_v41 = vpop.permute.xlu1 %582 }
 0x6c3   :  { %v3128_v26 = vmul.f32 %v583_v41, %v566_v5 }
 0x6c5   :  { %650 = vrot.lane.b32.xlu0 %v3128_v26, %s2809_s2 }
 0x6d2   :  { %v356_v47 = vpop.f32.mrf.mxu2 }
 0x6d3   :  { %v359_v48 = vadd.f32 %v356_v47, %v141_v46 }
 0x6d5   :  { %2561 = vtanh.f32 %v359_v48  ;;  %v2430_v50 = vmul.f32 -1.442695, %v359_v48 }
 0x6d7   :  { %2563 = vpow2.f32 %v2430_v50 }
 0x6db   :  { %v2562_v49 = vpop.eup %2561 }
 0x6dc   :  { %382 = vrot.lane.b32.xlu1 %v2562_v49, %s2808_s21 }
 0x6dd   :  { %v2564_v51 = vpop.eup %2563 }
 0x6de   :  { %v363_v52 = vadd.f32 1.0, %v2564_v51 }
 0x6e0   :  { %2565 = vrcp.f32 %v363_v52  ;;  %v375_v60 = vand.u32 2147483648, %v363_v52  ;;  %vm369_vm3 = vweird.f32 %v363_v52  ;;  %v373_v61 = vand.u32 2147483647, %v363_v52 }
 0x6e2   :  { %v376_v0 = vor.u32 1.1754944e-38, %v375_v60  ;;  %vm374_vm6 = vcmp.eq.f32.partialorder %v373_v61, 8.507059e+37 }
 0x6e6   :  { %v2566_v55 = vpop.eup %2565 }
 0x6e7   :  { %v365_v56 = vmul.f32 %v2566_v55, %v363_v52  ;;  %vm370_vm2 = vweird.f32 %v2566_v55 }
 0x6e8   :  { %vm371_vm4 = vmor %vm369_vm3, %vm370_vm2 }
 0x6e9   :  { %v366_v57 = vsub.f32 1.0, %v365_v56  ;;  %v143_v56 = vpop.f32.mrf.mxu0 }
 0x6eb   :  { %v367_v58 = vmul.f32 %v2566_v55, %v366_v57  ;;  %v144_v57 = vadd.f32 %v143_v56, %v3092_v4 }
 0x6ed   :  { %v368_v59 = vadd.f32 %v2566_v55, %v367_v58 }
 0x6ef   :  { %v372_v62 = vsel %vm371_vm4, %v2566_v55, %v368_v59 }
 0x6f0   :  { %v377_v28 = vsel %vm374_vm6, %v376_v0, %v372_v62 }
 0x6f1   :  { %v380_v31 = vmul.f32 %v377_v28, %v3108_v63 }
 0x737   :  { %v651_v54 = vpop.permute.xlu0 %650 }
 0x738   :  { %2439 = vmatmul.msk.f32.vlgmr.msrb.gmra.mxu3 %vm214_vm5, %v651_v54 }
 0x739   :  { %918 = vmatpush.msrb.mxu3 %v2915_v6 }
 0x73b   :  { %919 = vmatpush.msrb.mxu3 %v2920_v7 }
 0x73d   :  { %920 = vmatpush.msrb.mxu3 %v2934_v9 }
 0x73f   :  { %921 = vmatpush.msrb.mxu3 %v2939_v10 }
 0x74e   :  { %v383_v1 = vpop.permute.xlu1 %382 }
 0x74f   :  { %v385_v29 = vmul.f32 %v383_v1, %v377_v28 }
 0x751   :  { %387 = vrot.lane.b32.xlu0 %v385_v29, %s2809_s2 }
 0x7bb   :  { %v671_v24 = vpop.f32.mrf.mxu3 }
 0x7bc   :  { %v674_v30 = vadd.f32 %v671_v24, %v203_v25 }
 0x7be   :  { %2567 = vtanh.f32 %v674_v30  ;;  %v2440_v2 = vmul.f32 -1.442695, %v674_v30 }
 0x7c3   :  { %v388_v32 = vpop.permute.xlu0 %387 }
 0x7c4   :  { %v2568_v33 = vpop.eup %2567  ;;  %v3143_v34 = vadd.f32 %v388_v32, %v380_v31 }
 0x7c5   :  { %697 = vrot.lane.b32.xlu2 %v2568_v33, %s2808_s21 }
 0x7c6   :  { %2569 = vtanh.f32 %v3143_v34 }
 0x7c7   :  { %2571 = vpow2.f32 %v2440_v2 }
 0x7cc   :  { %v2570_v37 = vpop.eup %2569 }
 0x7cd   :  { %393 = vrot.lane.b32.xlu2 %v2570_v37, %s2808_s21  ;;  %v2572_v40 = vpop.eup %2571 }
 0x7ce   :  { %v678_v23 = vadd.f32 1.0, %v2572_v40 }
 0x7d0   :  { %2573 = vrcp.f32 %v678_v23  ;;  %v690_v12 = vand.u32 2147483648, %v678_v23  ;;  %vm684_vm8 = vweird.f32 %v678_v23  ;;  %v688_v43 = vand.u32 2147483647, %v678_v23 }
 0x7d2   :  { %v691_v16 = vor.u32 1.1754944e-38, %v690_v12  ;;  %vm689_vm10 = vcmp.eq.f32.partialorder %v688_v43, 8.507059e+37 }
 0x7d6   :  { %v2574_v3 = vpop.eup %2573 }
 0x7d7   :  { %v680_v5 = vmul.f32 %v2574_v3, %v678_v23  ;;  %vm685_vm7 = vweird.f32 %v2574_v3 }
 0x7d8   :  { %vm686_vm9 = vmor %vm684_vm8, %vm685_vm7 }
 0x7d9   :  { %v681_v8 = vsub.f32 1.0, %v680_v5 }
 0x7db   :  { %v682_v63 = vmul.f32 %v2574_v3, %v681_v8 }
 0x7dd   :  { %v683_v42 = vadd.f32 %v2574_v3, %v682_v63 }
 0x7df   :  { %v687_v44 = vsel %vm686_vm9, %v2574_v3, %v683_v42  ;;  %v200_v3 = vadd.f32 %v2997_v22, %v3009_v27 }
 0x7e0   :  { %v692_v45 = vsel %vm689_vm10, %v691_v16, %v687_v44 }
 0x7e1   :  { %v695_v49 = vmul.f32 %v692_v45, %v3116_v14 }
 0x81f   :  { %v698_v41 = vpop.permute.xlu2 %697 }
 0x820   :  { %v700_v46 = vmul.f32 %v698_v41, %v692_v45 }
 0x822   :  { %702 = vrot.lane.b32.xlu1 %v700_v46, %s2809_s2 }
 0x827   :  { %v394_v47 = vpop.permute.xlu2 %393 }
 0x828   :  { %v396_v48 = vmul.f32 %v394_v47, %v377_v28 }
 0x82a   :  { %461 = vrot.lane.b32.xlu1 %v396_v48, %s2809_s2 }
 0x894   :  { %v703_v50 = vpop.permute.xlu1 %702 }
 0x895   :  { %v3151_v51 = vadd.f32 %v703_v50, %v695_v49 }
 0x897   :  { %2575 = vtanh.f32 %v3151_v51 }
 0x89c   :  { %v3154_v52 = vpop.permute.xlu1 %461 }
 0x89d   :  { %v2576_v54 = vpop.eup %2575  ;;  %2433 = vmatmul.msk.f32.vlgmr.msra.gmra.mxu2 %vm214_vm5, %v3154_v52 }
 0x89e   :  { %708 = vrot.lane.b32.xlu0 %v2576_v54, %s2808_s21  ;;  %729 = vmatpush.msra.mxu2 %v3033_v35 }
 0x8a0   :  { %730 = vmatpush.msra.mxu2 %v3038_v36 }
 0x8a2   :  { %731 = vmatpush.msra.mxu2 %v3047_v38 }
 0x8a4   :  { %732 = vmatpush.msra.mxu2 %v3055_v39 }
 0x910   :  { %v709_v14 = vpop.permute.xlu0 %708 }
 0x911   :  { %v3163_v55 = vmul.f32 %v709_v14, %v692_v45 }
 0x913   :  { %776 = vrot.lane.b32.xlu2 %v3163_v55, %s2809_s2 }
 0x920   :  { %v482_v58 = vpop.f32.mrf.mxu2 }
 0x921   :  { %v485_v59 = vadd.f32 %v482_v58, %v144_v57 }
 0x923   :  { %2577 = vtanh.f32 %v485_v59  ;;  %v2434_v62 = vmul.f32 -1.442695, %v485_v59 }
 0x925   :  { %2579 = vpow2.f32 %v2434_v62 }
 0x929   :  { %v2578_v60 = vpop.eup %2577 }
 0x92a   :  { %508 = vrot.lane.b32.xlu0 %v2578_v60, %s2808_s21 }
 0x92b   :  { %v2580_v0 = vpop.eup %2579 }
 0x92c   :  { %v489_v1 = vadd.f32 1.0, %v2580_v0 }
 0x92e   :  { %2581 = vrcp.f32 %v489_v1  ;;  %v501_v31 = vand.u32 2147483648, %v489_v1  ;;  %vm495_vm12 = vweird.f32 %v489_v1  ;;  %v499_v32 = vand.u32 2147483647, %v489_v1 }
 0x930   :  { %v502_v37 = vor.u32 1.1754944e-38, %v501_v31  ;;  %vm500_vm14 = vcmp.eq.f32.partialorder %v499_v32, 8.507059e+37 }
 0x934   :  { %v2582_v28 = vpop.eup %2581 }
 0x935   :  { %v491_v29 = vmul.f32 %v2582_v28, %v489_v1  ;;  %vm496_vm11 = vweird.f32 %v2582_v28 }
 0x936   :  { %vm497_vm13 = vmor %vm495_vm12, %vm496_vm11 }
 0x937   :  { %v492_v25 = vsub.f32 1.0, %v491_v29 }
 0x939   :  { %v493_v24 = vmul.f32 %v2582_v28, %v492_v25  ;;  %v146_v25 = vpop.f32.mrf.mxu0 }
 0x93b   :  { %v494_v30 = vadd.f32 %v2582_v28, %v493_v24  ;;  %v147_v24 = vadd.f32 %v146_v25, %v3092_v4 }
 0x93d   :  { %v498_v33 = vsel %vm497_vm13, %v2582_v28, %v494_v30 }
 0x93e   :  { %v503_v2 = vsel %vm500_vm14, %v502_v37, %v498_v33 }
 0x93f   :  { %v506_v63 = vmul.f32 %v503_v2, %v3143_v34 }
 0x96d   :  { %v777_v61 = vpop.permute.xlu2 %776 }
 0x96e   :  { %2443 = vmatmul.msk.f32.vlgmr.msra.gmra.mxu3 %vm214_vm5, %v777_v61 }
 0x96f   :  { %1044 = vmatpush.msra.mxu3 %v2915_v6 }
 0x971   :  { %1045 = vmatpush.msra.mxu3 %v2920_v7 }
 0x973   :  { %1046 = vmatpush.msra.mxu3 %v2934_v9 }
 0x975   :  { %1047 = vmatpush.msra.mxu3 %v2939_v10 }
 0x99c   :  { %v509_v40 = vpop.permute.xlu0 %508 }
 0x99d   :  { %v511_v23 = vmul.f32 %v509_v40, %v503_v2 }
 0x99f   :  { %513 = vrot.lane.b32.xlu2 %v511_v23, %s2809_s2 }
 0x9f1   :  { %v797_v5 = vpop.f32.mrf.mxu3 }
 0x9f2   :  { %v800_v8 = vadd.f32 %v797_v5, %v200_v3 }
 0x9f4   :  { %2583 = vtanh.f32 %v800_v8  ;;  %v2444_v16 = vmul.f32 -1.442695, %v800_v8 }
 0x9f9   :  { %v514_v42 = vpop.permute.xlu2 %513 }
 0x9fa   :  { %v2584_v12 = vpop.eup %2583  ;;  %v3178_v43 = vadd.f32 %v514_v42, %v506_v63 }
 0x9fb   :  { %823 = vrot.lane.b32.xlu1 %v2584_v12, %s2808_s21 }
 0x9fc   :  { %2585 = vtanh.f32 %v3178_v43 }
 0x9fd   :  { %2587 = vpow2.f32 %v2444_v16 }
 0xa02   :  { %v2586_v44 = vpop.eup %2585 }
 0xa03   :  { %519 = vrot.lane.b32.xlu1 %v2586_v44, %s2808_s21  ;;  %v2588_v41 = vpop.eup %2587 }
 0xa04   :  { %v804_v22 = vadd.f32 1.0, %v2588_v41 }
 0xa06   :  { %2589 = vrcp.f32 %v804_v22  ;;  %v816_v49 = vand.u32 2147483648, %v804_v22  ;;  %vm810_vm0 = vweird.f32 %v804_v22  ;;  %v814_v50 = vand.u32 2147483647, %v804_v22 }
 0xa08   :  { %v817_v14 = vor.u32 1.1754944e-38, %v816_v49  ;;  %vm815_vm2 = vcmp.eq.f32.partialorder %v814_v50, 8.507059e+37 }
 0xa0c   :  { %v2590_v45 = vpop.eup %2589 }
 0xa0d   :  { %v806_v46 = vmul.f32 %v2590_v45, %v804_v22  ;;  %vm811_vm15 = vweird.f32 %v2590_v45 }
 0xa0e   :  { %vm812_vm1 = vmor %vm810_vm0, %vm811_vm15 }
 0xa0f   :  { %v807_v47 = vsub.f32 1.0, %v806_v46 }
 0xa11   :  { %v808_v34 = vmul.f32 %v2590_v45, %v807_v47 }
 0xa13   :  { %v809_v48 = vadd.f32 %v2590_v45, %v808_v34 }
 0xa15   :  { %v813_v54 = vsel %vm812_vm1, %v2590_v45, %v809_v48 }
 0xa16   :  { %v818_v57 = vsel %vm815_vm2, %v817_v14, %v813_v54 }
 0xa17   :  { %v821_v61 = vmul.f32 %v818_v57, %v3151_v51 }
 0xa6d   :  { %v824_v56 = vpop.permute.xlu1 %823 }
 0xa6e   :  { %v826_v58 = vmul.f32 %v824_v56, %v818_v57 }
 0xa70   :  { %828 = vrot.lane.b32.xlu0 %v826_v58, %s2809_s2 }
 0xa75   :  { %v520_v59 = vpop.permute.xlu1 %519 }
 0xa76   :  { %v522_v60 = vmul.f32 %v520_v59, %v503_v2 }
 0xa78   :  { %587 = vrot.lane.b32.xlu0 %v522_v60, %s2809_s2 }
 0xae2   :  { %v829_v62 = vpop.permute.xlu0 %828 }
 0xae3   :  { %v3186_v0 = vadd.f32 %v829_v62, %v821_v61 }
 0xae5   :  { %2591 = vtanh.f32 %v3186_v0 }
 0xaea   :  { %v3189_v1 = vpop.permute.xlu0 %587 }
 0xaeb   :  { %v2592_v28 = vpop.eup %2591  ;;  %2437 = vmatmul.msk.f32.vlgmr.msrb.gmra.mxu2 %vm214_vm5, %v3189_v1 }
 0xaec   :  { %834 = vrot.lane.b32.xlu2 %v2592_v28, %s2808_s21  ;;  %855 = vmatpush.msrb.mxu2 %v3033_v35 }
 0xaee   :  { %856 = vmatpush.msrb.mxu2 %v3038_v36 }
 0xaf0   :  { %857 = vmatpush.msrb.mxu2 %v3047_v38 }
 0xaf2   :  { %858 = vmatpush.msrb.mxu2 %v3055_v39 }
 0xb46   :  { %v835_v51 = vpop.permute.xlu2 %834 }
 0xb47   :  { %v3198_v29 = vmul.f32 %v835_v51, %v818_v57 }
 0xb49   :  { %902 = vrot.lane.b32.xlu1 %v3198_v29, %s2809_s2 }
 0xb6e   :  { %v608_v30 = vpop.f32.mrf.mxu2 }
 0xb6f   :  { %v611_v31 = vadd.f32 %v608_v30, %v147_v24 }
 0xb71   :  { %2593 = vtanh.f32 %v611_v31  ;;  %v2438_v33 = vmul.f32 -1.442695, %v611_v31 }
 0xb73   :  { %2595 = vpow2.f32 %v2438_v33 }
 0xb77   :  { %v2594_v32 = vpop.eup %2593 }
 0xb78   :  { %634 = vrot.lane.b32.xlu2 %v2594_v32, %s2808_s21 }
 0xb79   :  { %v2596_v37 = vpop.eup %2595 }
 0xb7a   :  { %v615_v2 = vadd.f32 1.0, %v2596_v37 }
 0xb7c   :  { %2597 = vrcp.f32 %v615_v2  ;;  %v627_v42 = vand.u32 2147483648, %v615_v2  ;;  %vm621_vm4 = vweird.f32 %v615_v2  ;;  %v625_v12 = vand.u32 2147483647, %v615_v2 }
 0xb7e   :  { %v628_v16 = vor.u32 1.1754944e-38, %v627_v42  ;;  %vm626_vm7 = vcmp.eq.f32.partialorder %v625_v12, 8.507059e+37 }
 0xb82   :  { %v2598_v23 = vpop.eup %2597 }
 0xb83   :  { %v617_v3 = vmul.f32 %v2598_v23, %v615_v2  ;;  %vm622_vm3 = vweird.f32 %v2598_v23 }
 0xb84   :  { %vm623_vm6 = vmor %vm621_vm4, %vm622_vm3 }
 0xb85   :  { %v618_v5 = vsub.f32 1.0, %v617_v3 }
 0xb87   :  { %v619_v8 = vmul.f32 %v2598_v23, %v618_v5 }
 0xb89   :  { %v620_v63 = vadd.f32 %v2598_v23, %v619_v8 }
 0xb8b   :  { %v624_v44 = vsel %vm623_vm6, %v2598_v23, %v620_v63 }
 0xbbb   :  { %v903_v40 = vpop.permute.xlu1 %902 }
 0xbbc   :  { %2447 = vmatmul.msk.f32.vlgmr.msrb.gmra.mxu3 %vm214_vm5, %v903_v40  ;;  %v149_v40 = vpop.f32.mrf.mxu0 }
 0xbbd   :  { %1170 = vmatpush.msrb.mxu3 %v2915_v6  ;;  %v629_v6 = vsel %vm626_vm7, %v628_v16, %v624_v44  ;;  %v150_v23 = vadd.f32 %v149_v40, %v3092_v4 }
 0xbbe   :  { %v632_v45 = vmul.f32 %v629_v6, %v3178_v43 }
 0xbbf   :  { %1171 = vmatpush.msrb.mxu3 %v2920_v7  ;;  %v197_v7 = vadd.f32 %v2995_v21, %v3009_v27 }
 0xbc1   :  { %1172 = vmatpush.msrb.mxu3 %v2934_v9 }
 0xbc3   :  { %1173 = vmatpush.msrb.mxu3 %v2939_v10 }
 0xbd2   :  { %v635_v41 = vpop.permute.xlu2 %634 }
 0xbd3   :  { %v637_v22 = vmul.f32 %v635_v41, %v629_v6  ;;  %v3243_v41 = vld [vmem:[%s3760_s4 + $0x18] sm:$0xff] }
 0xbd5   :  { %639 = vrot.lane.b32.xlu1 %v637_v22, %s2809_s2  ;;  %v3249_v22 = vld [vmem:[%s3760_s4 + $0x10] sm:$0xff] }
 0xc3f   :  { %v923_v9 = vpop.f32.mrf.mxu3 }
 0xc40   :  { %v926_v10 = vadd.f32 %v923_v9, %v197_v7  ;;  %v3255_v7 = vld [vmem:[%s3760_s4 + $0x8] sm:$0xff] }
 0xc42   :  { %2599 = vtanh.f32 %v926_v10  ;;  %v2448_v49 = vmul.f32 -1.442695, %v926_v10  ;;  %v3261_v10 = vld [vmem:[%s3760_s4] sm:$0xff] }
 0xc47   :  { %v640_v46 = vpop.permute.xlu1 %639 }
 0xc48   :  { %v2600_v47 = vpop.eup %2599  ;;  %v3213_v34 = vadd.f32 %v640_v46, %v632_v45 }
 0xc49   :  { %949 = vrot.lane.b32.xlu0 %v2600_v47, %s2808_s21 }
 0xc4a   :  { %2601 = vtanh.f32 %v3213_v34 }
 0xc4b   :  { %2603 = vpow2.f32 %v2448_v49 }
 0xc50   :  { %v2602_v48 = vpop.eup %2601 }
 0xc51   :  { %645 = vrot.lane.b32.xlu0 %v2602_v48, %s2808_s21  ;;  %v2604_v50 = vpop.eup %2603 }
 0xc52   :  { %v930_v21 = vadd.f32 1.0, %v2604_v50 }
 0xc54   :  { %2605 = vrcp.f32 %v930_v21  ;;  %v942_v58 = vand.u32 2147483648, %v930_v21  ;;  %vm936_vm9 = vweird.f32 %v930_v21  ;;  %v940_v59 = vand.u32 2147483647, %v930_v21 }
 0xc56   :  { %v943_v61 = vor.u32 1.1754944e-38, %v942_v58  ;;  %vm941_vm11 = vcmp.eq.f32.partialorder %v940_v59, 8.507059e+37 }
 0xc5a   :  { %v2606_v54 = vpop.eup %2605 }
 0xc5b   :  { %v932_v14 = vmul.f32 %v2606_v54, %v930_v21  ;;  %vm937_vm8 = vweird.f32 %v2606_v54 }
 0xc5c   :  { %vm938_vm10 = vmor %vm936_vm9, %vm937_vm8 }
 0xc5d   :  { %v933_v56 = vsub.f32 1.0, %v932_v14 }
 0xc5f   :  { %v934_v43 = vmul.f32 %v2606_v54, %v933_v56  ;;  %v194_v56 = vadd.f32 %v2993_v20, %v3009_v27 }
 0xc61   :  { %v935_v57 = vadd.f32 %v2606_v54, %v934_v43 }
 0xc63   :  { %v939_v60 = vsel %vm938_vm10, %v2606_v54, %v935_v57 }
 0xc64   :  { %v944_v62 = vsel %vm941_vm11, %v943_v61, %v939_v60 }
 0xc65   :  { %v947_v30 = vmul.f32 %v944_v62, %v3186_v0 }
 0xcbb   :  { %v950_v28 = vpop.permute.xlu0 %949 }
 0xcbc   :  { %v952_v51 = vmul.f32 %v950_v28, %v944_v62 }
 0xcbe   :  { %954 = vrot.lane.b32.xlu2 %v952_v51, %s2809_s2 }
 0xcc3   :  { %v646_v25 = vpop.permute.xlu0 %645 }
 0xcc4   :  { %v648_v24 = vmul.f32 %v646_v25, %v629_v6 }
 0xcc6   :  { %713 = vrot.lane.b32.xlu2 %v648_v24, %s2809_s2 }
 0xd18   :  { %v955_v31 = vpop.permute.xlu2 %954 }
 0xd19   :  { %v3221_v32 = vadd.f32 %v955_v31, %v947_v30 }
 0xd1b   :  { %2607 = vtanh.f32 %v3221_v32 }
 0xd20   :  { %v3224_v33 = vpop.permute.xlu2 %713 }
 0xd21   :  { %v2608_v37 = vpop.eup %2607  ;;  %2441 = vmatmul.msk.f32.vlgmr.msra.gmra.mxu2 %vm214_vm5, %v3224_v33 }
 0xd22   :  { %960 = vrot.lane.b32.xlu1 %v2608_v37, %s2808_s21  ;;  %981 = vmatpush.msra.mxu2 %v3033_v35 }
 0xd24   :  { %982 = vmatpush.msra.mxu2 %v3038_v36 }
 0xd26   :  { %983 = vmatpush.msra.mxu2 %v3047_v38 }
 0xd28   :  { %984 = vmatpush.msra.mxu2 %v3055_v39 }
 0xd94   :  { %v961_v0 = vpop.permute.xlu1 %960 }
 0xd95   :  { %v3233_v2 = vmul.f32 %v961_v0, %v944_v62 }
 0xd97   :  { %1028 = vrot.lane.b32.xlu0 %v3233_v2, %s2809_s2 }
 0xda4   :  { %v734_v3 = vpop.f32.mrf.mxu2 }
 0xda5   :  { %v737_v5 = vadd.f32 %v734_v3, %v150_v23 }
 0xda7   :  { %2609 = vtanh.f32 %v737_v5  ;;  %v2442_v63 = vmul.f32 -1.442695, %v737_v5 }
 0xda9   :  { %2611 = vpow2.f32 %v2442_v63 }
 0xdad   :  { %v2610_v8 = vpop.eup %2609 }
 0xdae   :  { %760 = vrot.lane.b32.xlu1 %v2610_v8, %s2808_s21 }
 0xdaf   :  { %v2612_v42 = vpop.eup %2611 }
 0xdb0   :  { %v741_v12 = vadd.f32 1.0, %v2612_v42 }
 0xdb2   :  { %2613 = vrcp.f32 %v741_v12  ;;  %v753_v47 = vand.u32 2147483648, %v741_v12  ;;  %vm747_vm13 = vweird.f32 %v741_v12  ;;  %v751_v48 = vand.u32 2147483647, %v741_v12 }
 0xdb4   :  { %v754_v50 = vor.u32 1.1754944e-38, %v753_v47  ;;  %vm752_vm15 = vcmp.eq.f32.partialorder %v751_v48, 8.507059e+37 }
 0xdb8   :  { %v2614_v16 = vpop.eup %2613 }
 0xdb9   :  { %v743_v6 = vmul.f32 %v2614_v16, %v741_v12  ;;  %vm748_vm12 = vweird.f32 %v2614_v16 }
 0xdba   :  { %vm749_vm14 = vmor %vm747_vm13, %vm748_vm12 }
 0xdbb   :  { %v744_v9 = vsub.f32 1.0, %v743_v6 }
 0xdbd   :  { %v745_v45 = vmul.f32 %v2614_v16, %v744_v9 }
 0xdbf   :  { %v746_v46 = vadd.f32 %v2614_v16, %v745_v45 }
 0xdc1   :  { %v750_v49 = vsel %vm749_vm14, %v2614_v16, %v746_v46  ;;  %v152_v46 = vpop.f32.mrf.mxu0 }
 0xdc2   :  { %v755_v54 = vsel %vm752_vm15, %v754_v50, %v750_v49  ;;  %v153_v47 = vadd.f32 %v152_v46, %v3092_v4 }
 0xdc3   :  { %v758_v58 = vmul.f32 %v755_v54, %v3213_v34 }
 0xe09   :  { %v1029_v44 = vpop.permute.xlu0 %1028 }
 0xe0a   :  { %2451 = vmatmul.msk.f32.vlgmr.msra.gmra.mxu3 %vm214_vm5, %v1029_v44 }
 0xe0b   :  { %1296 = vmatpush.msra.mxu3 %v3243_v41 }
 0xe0d   :  { %1297 = vmatpush.msra.mxu3 %v3249_v22 }
 0xe0f   :  { %1298 = vmatpush.msra.mxu3 %v3255_v7 }
 0xe11   :  { %1299 = vmatpush.msra.mxu3 %v3261_v10 }
 0xe20   :  { %v761_v21 = vpop.permute.xlu1 %760 }
 0xe21   :  { %v763_v14 = vmul.f32 %v761_v21, %v755_v54 }
 0xe23   :  { %765 = vrot.lane.b32.xlu0 %v763_v14, %s2809_s2 }
 0xe8d   :  { %v1049_v43 = vpop.f32.mrf.mxu3 }
 0xe8e   :  { %v1052_v57 = vadd.f32 %v1049_v43, %v194_v56 }
 0xe90   :  { %2615 = vtanh.f32 %v1052_v57  ;;  %v2452_v28 = vmul.f32 -1.442695, %v1052_v57 }
 0xe95   :  { %v766_v59 = vpop.permute.xlu0 %765 }
 0xe96   :  { %v2616_v60 = vpop.eup %2615  ;;  %v3268_v61 = vadd.f32 %v766_v59, %v758_v58 }
 0xe97   :  { %1075 = vrot.lane.b32.xlu2 %v2616_v60, %s2808_s21 }
 0xe98   :  { %2617 = vtanh.f32 %v3268_v61 }
 0xe99   :  { %2619 = vpow2.f32 %v2452_v28 }
 0xe9e   :  { %v2618_v62 = vpop.eup %2617 }
 0xe9f   :  { %771 = vrot.lane.b32.xlu2 %v2618_v62, %s2808_s21  ;;  %v2620_v51 = vpop.eup %2619 }
 0xea0   :  { %v1056_v20 = vadd.f32 1.0, %v2620_v51 }
 0xea2   :  { %2621 = vrcp.f32 %v1056_v20  ;;  %v1068_v37 = vand.u32 2147483648, %v1056_v20  ;;  %vm1062_vm1 = vweird.f32 %v1056_v20  ;;  %v1066_v0 = vand.u32 2147483647, %v1056_v20 }
 0xea4   :  { %v1069_v23 = vor.u32 1.1754944e-38, %v1068_v37  ;;  %vm1067_vm3 = vcmp.eq.f32.partialorder %v1066_v0, 8.507059e+37 }
 0xea8   :  { %v2622_v25 = vpop.eup %2621 }
 0xea9   :  { %v1058_v24 = vmul.f32 %v2622_v25, %v1056_v20  ;;  %vm1063_vm0 = vweird.f32 %v2622_v25 }
 0xeaa   :  { %vm1064_vm2 = vmor %vm1062_vm1, %vm1063_vm0 }
 0xeab   :  { %v1059_v30 = vsub.f32 1.0, %v1058_v24 }
 0xead   :  { %v1060_v34 = vmul.f32 %v2622_v25, %v1059_v30 }
 0xeaf   :  { %v1061_v31 = vadd.f32 %v2622_v25, %v1060_v34 }
 0xeb1   :  { %v1065_v40 = vsel %vm1064_vm2, %v2622_v25, %v1061_v31 }
 0xeb2   :  { %v1070_v5 = vsel %vm1067_vm3, %v1069_v23, %v1065_v40 }
 0xeb3   :  { %v1073_v12 = vmul.f32 %v1070_v5, %v3221_v32 }
 0xef1   :  { %v1076_v3 = vpop.permute.xlu2 %1075 }
 0xef2   :  { %v1078_v8 = vmul.f32 %v1076_v3, %v1070_v5 }
 0xef4   :  { %1080 = vrot.lane.b32.xlu1 %v1078_v8, %s2809_s2 }
 0xef9   :  { %v772_v63 = vpop.permute.xlu2 %771 }
 0xefa   :  { %v774_v42 = vmul.f32 %v772_v63, %v755_v54 }
 0xefc   :  { %839 = vrot.lane.b32.xlu1 %v774_v42, %s2809_s2 }
 0xf66   :  { %v1081_v44 = vpop.permute.xlu1 %1080 }
 0xf67   :  { %v3276_v16 = vadd.f32 %v1081_v44, %v1073_v12 }
 0xf69   :  { %2623 = vtanh.f32 %v3276_v16 }
 0xf6e   :  { %v3279_v6 = vpop.permute.xlu1 %839 }
 0xf6f   :  { %v2624_v9 = vpop.eup %2623  ;;  %2445 = vmatmul.msk.f32.vlgmr.msrb.gmra.mxu2 %vm214_vm5, %v3279_v6 }
 0xf70   :  { %1086 = vrot.lane.b32.xlu0 %v2624_v9, %s2808_s21  ;;  %1107 = vmatpush.msrb.mxu2 %v3033_v35 }
 0xf72   :  { %1108 = vmatpush.msrb.mxu2 %v3038_v36 }
 0xf74   :  { %1109 = vmatpush.msrb.mxu2 %v3047_v38 }
 0xf76   :  { %1110 = vmatpush.msrb.mxu2 %v3055_v39 }
 0xfe2   :  { %v1087_v32 = vpop.permute.xlu0 %1086 }
 0xfe3   :  { %v3288_v45 = vmul.f32 %v1087_v32, %v1070_v5 }
 0xfe5   :  { %1154 = vrot.lane.b32.xlu2 %v3288_v45, %s2809_s2 }
 0xff2   :  { %v860_v48 = vpop.f32.mrf.mxu2 }
 0xff3   :  { %v863_v49 = vadd.f32 %v860_v48, %v153_v47 }
 0xff5   :  { %2625 = vtanh.f32 %v863_v49  ;;  %v2446_v36 = vmul.f32 -1.442695, %v863_v49 }
 0xff7   :  { %2627 = vpow2.f32 %v2446_v36  ;;  %v3334_v36 = vld [vmem:[%s3759_s3 + $0x8] sm:$0xff] }
 0xffb   :  { %v2626_v50 = vpop.eup %2625 }
 0xffc   :  { %886 = vrot.lane.b32.xlu0 %v2626_v50, %s2808_s21 }
 0xffd   :  { %v2628_v38 = vpop.eup %2627 }
 0xffe   :  { %v867_v39 = vadd.f32 1.0, %v2628_v38  ;;  %v3340_v38 = vld [vmem:[%s3759_s3] sm:$0xff] }
0x1000   :  { %2629 = vrcp.f32 %v867_v39  ;;  %v879_v57 = vand.u32 2147483648, %v867_v39  ;;  %vm873_vm6 = vweird.f32 %v867_v39  ;;  %v877_v58 = vand.u32 2147483647, %v867_v39 }
0x1002   :  { %vm878_vm8 = vcmp.eq.f32.partialorder %v877_v58, 8.507059e+37 }
0x1006   :  { %v2630_v21 = vpop.eup %2629 }
0x1007   :  { %v869_v54 = vmul.f32 %v2630_v21, %v867_v39  ;;  %vm874_vm4 = vweird.f32 %v2630_v21 }
0x1008   :  { %vm875_vm7 = vmor %vm873_vm6, %vm874_vm4 }
0x1009   :  { %v870_v14 = vsub.f32 1.0, %v869_v54  ;;  %v155_v54 = vpop.f32.mrf.mxu0 }
0x100b   :  { %v871_v56 = vmul.f32 %v2630_v21, %v870_v14  ;;  %v156_v14 = vadd.f32 %v155_v54, %v3092_v4 }
0x100d   :  { %v872_v43 = vadd.f32 %v2630_v21, %v871_v56 }
0x103f   :  { %v1155_v35 = vpop.permute.xlu2 %1154 }
0x1040   :  { %2455 = vmatmul.msk.f32.vlgmr.msrb.gmra.mxu3 %vm214_vm5, %v1155_v35  ;;  %v3322_v35 = vld [vmem:[%s3759_s3 + $0x18] sm:$0xff] }
0x1041   :  { %1422 = vmatpush.msrb.mxu3 %v3243_v41  ;;  %v876_v41 = vsel %vm875_vm7, %v2630_v21, %v872_v43 }
0x1043   :  { %1423 = vmatpush.msrb.mxu3 %v3249_v22  ;;  %v880_v22 = vor.u32 1.1754944e-38, %v879_v57 }
0x1045   :  { %1424 = vmatpush.msrb.mxu3 %v3255_v7  ;;  %v881_v59 = vsel %vm878_vm8, %v880_v22, %v876_v41 }
0x1046   :  { %v884_v51 = vmul.f32 %v881_v59, %v3268_v61 }
0x1047   :  { %1425 = vmatpush.msrb.mxu3 %v3261_v10  ;;  %v191_v10 = vadd.f32 %v2991_v19, %v3009_v27 }
0x106e   :  { %v887_v7 = vpop.permute.xlu0 %886 }
0x106f   :  { %v889_v60 = vmul.f32 %v887_v7, %v881_v59 }
0x1071   :  { %891 = vrot.lane.b32.xlu2 %v889_v60, %s2809_s2 }
0x10c3   :  { %v1175_v62 = vpop.f32.mrf.mxu3 }
0x10c4   :  { %v1178_v28 = vadd.f32 %v1175_v62, %v191_v10 }
0x10c6   :  { %2631 = vtanh.f32 %v1178_v28  ;;  %v2456_v34 = vmul.f32 -1.442695, %v1178_v28 }
0x10cb   :  { %v892_v20 = vpop.permute.xlu2 %891 }
0x10cc   :  { %v2632_v25 = vpop.eup %2631  ;;  %v3303_v24 = vadd.f32 %v892_v20, %v884_v51 }
0x10cd   :  { %1201 = vrot.lane.b32.xlu1 %v2632_v25, %s2808_s21 }
0x10ce   :  { %2633 = vtanh.f32 %v3303_v24 }
0x10cf   :  { %2635 = vpow2.f32 %v2456_v34 }
0x10d4   :  { %v2634_v30 = vpop.eup %2633 }
0x10d5   :  { %897 = vrot.lane.b32.xlu1 %v2634_v30, %s2808_s21  ;;  %v2636_v31 = vpop.eup %2635 }
0x10d6   :  { %v1182_v19 = vadd.f32 1.0, %v2636_v31 }
0x10d8   :  { %2637 = vrcp.f32 %v1182_v19  ;;  %v1194_v3 = vand.u32 2147483648, %v1182_v19  ;;  %vm1188_vm10 = vweird.f32 %v1182_v19  ;;  %v1192_v5 = vand.u32 2147483647, %v1182_v19 }
0x10da   :  { %v1195_v63 = vor.u32 1.1754944e-38, %v1194_v3  ;;  %vm1193_vm12 = vcmp.eq.f32.partialorder %v1192_v5, 8.507059e+37 }
0x10de   :  { %v2638_v37 = vpop.eup %2637 }
0x10df   :  { %v1184_v0 = vmul.f32 %v2638_v37, %v1182_v19  ;;  %vm1189_vm9 = vweird.f32 %v2638_v37 }
0x10e0   :  { %vm1190_vm11 = vmor %vm1188_vm10, %vm1189_vm9 }
0x10e1   :  { %v1185_v40 = vsub.f32 1.0, %v1184_v0 }
0x10e3   :  { %v1186_v61 = vmul.f32 %v2638_v37, %v1185_v40 }
0x10e5   :  { %v1187_v23 = vadd.f32 %v2638_v37, %v1186_v61 }
0x10e7   :  { %v1191_v8 = vsel %vm1190_vm11, %v2638_v37, %v1187_v23  ;;  %v188_v37 = vadd.f32 %v2989_v18, %v3009_v27 }
0x10e8   :  { %v1196_v12 = vsel %vm1193_vm12, %v1195_v63, %v1191_v8 }
0x10e9   :  { %v1199_v46 = vmul.f32 %v1196_v12, %v3276_v16  ;;  %v3328_v16 = vld [vmem:[%s3759_s3 + $0x10] sm:$0xff] }
0x113f   :  { %v1202_v42 = vpop.permute.xlu1 %1201 }
0x1140   :  { %v1204_v44 = vmul.f32 %v1202_v42, %v1196_v12 }
0x1142   :  { %1206 = vrot.lane.b32.xlu0 %v1204_v44, %s2809_s2 }
0x1147   :  { %v898_v9 = vpop.permute.xlu1 %897 }
0x1148   :  { %v900_v32 = vmul.f32 %v898_v9, %v881_v59 }
0x114a   :  { %965 = vrot.lane.b32.xlu0 %v900_v32, %s2809_s2 }
0x11b4   :  { %v1207_v47 = vpop.permute.xlu0 %1206 }
0x11b5   :  { %v3311_v48 = vadd.f32 %v1207_v47, %v1199_v46 }
0x11b7   :  { %2639 = vtanh.f32 %v3311_v48 }
0x11bc   :  { %v3314_v49 = vpop.permute.xlu0 %965 }
0x11bd   :  { %v2640_v50 = vpop.eup %2639  ;;  %2449 = vmatmul.msk.f32.vlgmr.msra.gmra.mxu2 %vm214_vm5, %v3314_v49 }
0x11be   :  { %1212 = vrot.lane.b32.xlu2 %v2640_v50, %s2808_s21  ;;  %1233 = vmatpush.msra.mxu2 %v3322_v35 }
0x11c0   :  { %1234 = vmatpush.msra.mxu2 %v3328_v16 }
0x11c2   :  { %1235 = vmatpush.msra.mxu2 %v3334_v36 }
0x11c4   :  { %1236 = vmatpush.msra.mxu2 %v3340_v38 }
0x1218   :  { %v1213_v39 = vpop.permute.xlu2 %1212 }
0x1219   :  { %v3343_v21 = vmul.f32 %v1213_v39, %v1196_v12 }
0x121b   :  { %1280 = vrot.lane.b32.xlu1 %v3343_v21, %s2809_s2 }
0x1240   :  { %v986_v56 = vpop.f32.mrf.mxu2 }
0x1241   :  { %v989_v43 = vadd.f32 %v986_v56, %v156_v14 }
0x1243   :  { %2641 = vtanh.f32 %v989_v43  ;;  %v2450_v58 = vmul.f32 -1.442695, %v989_v43 }
0x1245   :  { %2643 = vpow2.f32 %v2450_v58 }
0x1249   :  { %v2642_v57 = vpop.eup %2641 }
0x124a   :  { %1012 = vrot.lane.b32.xlu2 %v2642_v57, %s2808_s21 }
0x124b   :  { %v2644_v41 = vpop.eup %2643 }
0x124c   :  { %v993_v22 = vadd.f32 1.0, %v2644_v41 }
0x124e   :  { %2645 = vrcp.f32 %v993_v22  ;;  %v1005_v51 = vand.u32 2147483648, %v993_v22  ;;  %vm999_vm14 = vweird.f32 %v993_v22  ;;  %v1003_v20 = vand.u32 2147483647, %v993_v22 }
0x1250   :  { %v1006_v30 = vor.u32 1.1754944e-38, %v1005_v51  ;;  %vm1004_vm0 = vcmp.eq.f32.partialorder %v1003_v20, 8.507059e+37 }
0x1254   :  { %v2646_v7 = vpop.eup %2645 }
0x1255   :  { %v995_v60 = vmul.f32 %v2646_v7, %v993_v22  ;;  %vm1000_vm13 = vweird.f32 %v2646_v7 }
0x1256   :  { %vm1001_vm15 = vmor %vm999_vm14, %vm1000_vm13  ;;  %vm1534_vm14 = vcmask 523264  }
0x1257   :  { %v996_v10 = vsub.f32 1.0, %v995_v60 }
0x1259   :  { %v997_v62 = vmul.f32 %v2646_v7, %v996_v10  ;;  %v158_v10 = vpop.f32.mrf.mxu0 }
0x125b   :  { %v998_v28 = vadd.f32 %v2646_v7, %v997_v62  ;;  %v159_v62 = vadd.f32 %v158_v10, %v3092_v4 }
0x125d   :  { %v1002_v25 = vsel %vm1001_vm15, %v2646_v7, %v998_v28 }
0x125e   :  { %v1007_v31 = vsel %vm1004_vm0, %v1006_v30, %v1002_v25 }
0x125f   :  { %v1010_v61 = vmul.f32 %v1007_v31, %v3303_v24 }
0x128d   :  { %v1281_v59 = vpop.permute.xlu1 %1280 }
0x128e   :  { %2459 = vmatmul.msk.f32.vlgmr.msra.gmra.mxu3 %vm214_vm5, %v1281_v59 }
0x12a4   :  { %v1013_v34 = vpop.permute.xlu2 %1012 }
0x12a5   :  { %v1015_v19 = vmul.f32 %v1013_v34, %v1007_v31 }
0x12a7   :  { %1017 = vrot.lane.b32.xlu1 %v1015_v19, %s2809_s2 }
0x1311   :  { %v1301_v0 = vpop.f32.mrf.mxu3 }
0x1312   :  { %v1304_v40 = vadd.f32 %v1301_v0, %v188_v37 }
0x1314   :  { %2647 = vtanh.f32 %v1304_v40  ;;  %v2460_v63 = vmul.f32 -1.442695, %v1304_v40 }
0x1319   :  { %v1018_v23 = vpop.permute.xlu1 %1017 }
0x131a   :  { %v2648_v3 = vpop.eup %2647  ;;  %v3354_v5 = vadd.f32 %v1018_v23, %v1010_v61 }
0x131b   :  { %1327 = vrot.lane.b32.xlu0 %v2648_v3, %s2808_s21 }
0x131c   :  { %2649 = vtanh.f32 %v3354_v5 }
0x131d   :  { %2651 = vpow2.f32 %v2460_v63  ;;  %v185_v63 = vadd.f32 %v2987_v17, %v3009_v27 }
0x1322   :  { %v2650_v8 = vpop.eup %2649 }
0x1323   :  { %1023 = vrot.lane.b32.xlu0 %v2650_v8, %s2808_s21  ;;  %v2652_v42 = vpop.eup %2651 }
0x1324   :  { %v1308_v18 = vadd.f32 1.0, %v2652_v42 }
0x1326   :  { %2653 = vrcp.f32 %v1308_v18  ;;  %v1320_v46 = vand.u32 2147483648, %v1308_v18  ;;  %vm1314_vm2 = vweird.f32 %v1308_v18  ;;  %v1318_v47 = vand.u32 2147483647, %v1308_v18 }
0x1328   :  { %v1321_v39 = vor.u32 1.1754944e-38, %v1320_v46  ;;  %vm1319_vm4 = vcmp.eq.f32.partialorder %v1318_v47, 8.507059e+37 }
0x132c   :  { %v2654_v12 = vpop.eup %2653 }
0x132d   :  { %v1310_v44 = vmul.f32 %v2654_v12, %v1308_v18  ;;  %vm1315_vm1 = vweird.f32 %v2654_v12 }
0x132e   :  { %vm1316_vm3 = vmor %vm1314_vm2, %vm1315_vm1 }
0x132f   :  { %v1311_v9 = vsub.f32 1.0, %v1310_v44 }
0x1331   :  { %v1312_v24 = vmul.f32 %v2654_v12, %v1311_v9 }
0x1333   :  { %v1313_v32 = vadd.f32 %v2654_v12, %v1312_v24 }
0x1335   :  { %v1317_v50 = vsel %vm1316_vm3, %v2654_v12, %v1313_v32 }
0x1336   :  { %v1322_v54 = vsel %vm1319_vm4, %v1321_v39, %v1317_v50 }
0x1337   :  { %v1325_v58 = vmul.f32 %v1322_v54, %v3311_v48 }
0x138d   :  { %v1328_v14 = vpop.permute.xlu0 %1327 }
0x138e   :  { %v1330_v56 = vmul.f32 %v1328_v14, %v1322_v54 }
0x1390   :  { %1332 = vrot.lane.b32.xlu2 %v1330_v56, %s2809_s2 }
0x1395   :  { %v1024_v43 = vpop.permute.xlu0 %1023 }
0x1396   :  { %v1026_v57 = vmul.f32 %v1024_v43, %v1007_v31 }
0x1398   :  { %1091 = vrot.lane.b32.xlu2 %v1026_v57, %s2809_s2 }
0x13ea   :  { %v1333_v41 = vpop.permute.xlu2 %1332 }
0x13eb   :  { %v3362_v22 = vadd.f32 %v1333_v41, %v1325_v58 }
0x13ed   :  { %2655 = vtanh.f32 %v3362_v22 }
0x13f2   :  { %v3365_v59 = vpop.permute.xlu2 %1091 }
0x13f3   :  { %v2656_v7 = vpop.eup %2655  ;;  %2453 = vmatmul.msk.f32.vlgmr.msrb.gmra.mxu2 %vm214_vm5, %v3365_v59 }
0x13f4   :  { %1338 = vrot.lane.b32.xlu1 %v2656_v7, %s2808_s21  ;;  %1359 = vmatpush.msrb.mxu2 %v3322_v35 }
0x13f6   :  { %1360 = vmatpush.msrb.mxu2 %v3328_v16 }
0x13f8   :  { %1361 = vmatpush.msrb.mxu2 %v3334_v36 }
0x13fa   :  { %1362 = vmatpush.msrb.mxu2 %v3340_v38 }
0x1466   :  { %v1339_v48 = vpop.permute.xlu1 %1338 }
0x1467   :  { %v3374_v60 = vmul.f32 %v1339_v48, %v1322_v54 }
0x1469   :  { %1406 = vrot.lane.b32.xlu0 %v3374_v60, %s2809_s2 }
0x1476   :  { %v1112_v28 = vpop.f32.mrf.mxu2 }
0x1477   :  { %v1115_v51 = vadd.f32 %v1112_v28, %v159_v62 }
0x1479   :  { %2657 = vtanh.f32 %v1115_v51  ;;  %v2454_v35 = vmul.f32 -1.442695, %v1115_v51 }
0x147b   :  { %2659 = vpow2.f32 %v2454_v35 }
0x147f   :  { %v2658_v20 = vpop.eup %2657 }
0x1480   :  { %1138 = vrot.lane.b32.xlu1 %v2658_v20, %s2808_s21 }
0x1481   :  { %v2660_v16 = vpop.eup %2659 }
0x1482   :  { %v1119_v36 = vadd.f32 1.0, %v2660_v16  ;;  %v1529_v16 = vld [vmem:[%s3761_s5 + $0x38] sm:$0xff] }
0x1483   :  { %1573 = vmatpush.msrb.mxu0 %v1529_v16 }
0x1484   :  { %2661 = vrcp.f32 %v1119_v36  ;;  %v1131_v37 = vand.u32 2147483648, %v1119_v36  ;;  %vm1125_vm7 = vweird.f32 %v1119_v36  ;;  %v1129_v0 = vand.u32 2147483647, %v1119_v36 }
0x1486   :  { %v1132_v61 = vor.u32 1.1754944e-38, %v1131_v37  ;;  %vm1130_vm9 = vcmp.eq.f32.partialorder %v1129_v0, 8.507059e+37  ;;  %v1525_v37 = vld [vmem:[%s3761_s5 + $0x18] sm:$0xff]  ;;  %v3426_v0 = vld [vmem:[#allocation3] sm:$0xff] }
0x148a   :  { %v2662_v25 = vpop.eup %2661 }
0x148b   :  { %v1121_v30 = vmul.f32 %v2662_v25, %v1119_v36  ;;  %vm1126_vm6 = vweird.f32 %v2662_v25  ;;  %v3401_v36 = vld [vmem:[#allocation3 + $0x18] sm:$0xff] }
0x148c   :  { %vm1127_vm8 = vmor %vm1125_vm7, %vm1126_vm6  ;;  %1624 = vmatpush.msrb.mxu1 %v3401_v36  ;;  %1750 = vmatpush.msra.mxu3 %v3401_v36 }
0x148d   :  { %v1122_v34 = vsub.f32 1.0, %v1121_v30 }
0x148f   :  { %v1123_v31 = vmul.f32 %v2662_v25, %v1122_v34  ;;  %v1526_v34 = vld [vmem:[%s3761_s5 + $0x20] sm:$0xff] }
0x1491   :  { %v1124_v19 = vadd.f32 %v2662_v25, %v1123_v31 }
0x1493   :  { %v1128_v40 = vsel %vm1127_vm8, %v2662_v25, %v1124_v19  ;;  %v3410_v25 = vld [vmem:[#allocation3 + $0x10] sm:$0xff]  ;;  %v3418_v19 = vld [vmem:[#allocation3 + $0x8] sm:$0xff] }
0x1494   :  { %v1133_v3 = vsel %vm1130_vm9, %v1132_v61, %v1128_v40  ;;  %1625 = vmatpush.msrb.mxu1 %v3410_v25  ;;  %1751 = vmatpush.msra.mxu3 %v3410_v25  ;;  %v1524_v40 = vld [vmem:[%s3761_s5 + $0x10] sm:$0xff]  ;;  %v1523_v61 = vld [vmem:[%s3761_s5 + $0x8] sm:$0xff] }
0x1495   :  { %v1136_v12 = vmul.f32 %v1133_v3, %v3354_v5 }
0x1496   :  { %1626 = vmatpush.msrb.mxu1 %v3418_v19  ;;  %1752 = vmatpush.msra.mxu3 %v3418_v19 }
0x1498   :  { %1627 = vmatpush.msrb.mxu1 %v3426_v0  ;;  %1753 = vmatpush.msra.mxu3 %v3426_v0 }
0x1499   :  { %1628 = vmatmul.f32.vlgmr.msrb.gmra.mxu1 %v2807_v11 }
0x149a   :  { %1813 = vmatpush.msra.mxu1 %v3401_v36 }
0x149c   :  { %1814 = vmatpush.msra.mxu1 %v3410_v25 }
0x149e   :  { %1815 = vmatpush.msra.mxu1 %v3418_v19 }
0x14a0   :  { %1816 = vmatpush.msra.mxu1 %v3426_v0 }
0x14a2   :  { %2002 = vmatpush.msrb.mxu1 %v3401_v36 }
0x14a4   :  { %2003 = vmatpush.msrb.mxu1 %v3410_v25 }
0x14a6   :  { %2004 = vmatpush.msrb.mxu1 %v3418_v19 }
0x14a8   :  { %2005 = vmatpush.msrb.mxu1 %v3426_v0 }
0x14db   :  { %v1407_v38 = vpop.permute.xlu0 %1406 }
0x14dc   :  { %2463 = vmatmul.msk.f32.vlgmr.msrb.gmra.mxu3 %vm214_vm5, %v1407_v38  ;;  %v1527_v38 = vld [vmem:[%s3761_s5 + $0x28] sm:$0xff] }
0x14dd   :  { %1939 = vmatpush.msrb.mxu3 %v3401_v36 }
0x14df   :  { %1940 = vmatpush.msrb.mxu3 %v3410_v25 }
0x14e1   :  { %1941 = vmatpush.msrb.mxu3 %v3418_v19 }
0x14e3   :  { %1942 = vmatpush.msrb.mxu3 %v3426_v0 }
0x14f2   :  { %v1139_v23 = vpop.permute.xlu1 %1138 }
0x14f3   :  { %v1141_v8 = vmul.f32 %v1139_v23, %v1133_v3  ;;  %v1522_v23 = vld [vmem:[%s3761_s5] sm:$0xff] }
0x14f5   :  { %1143 = vrot.lane.b32.xlu0 %v1141_v8, %s2809_s2 }
0x155f   :  { %v1427_v42 = vpop.f32.mrf.mxu3 }
0x1560   :  { %v1430_v18 = vadd.f32 %v1427_v42, %v185_v63 }
0x1562   :  { %2663 = vtanh.f32 %v1430_v18  ;;  %v2464_v46 = vmul.f32 -1.442695, %v1430_v18 }
0x1567   :  { %v1144_v44 = vpop.permute.xlu0 %1143 }
0x1568   :  { %v2664_v9 = vpop.eup %2663  ;;  %v3385_v24 = vadd.f32 %v1144_v44, %v1136_v12 }
0x1569   :  { %1453 = vrot.lane.b32.xlu2 %v2664_v9, %s2808_s21 }
0x156a   :  { %2665 = vtanh.f32 %v3385_v24 }
0x156b   :  { %2667 = vpow2.f32 %v2464_v46 }
0x1570   :  { %v2666_v32 = vpop.eup %2665 }
0x1571   :  { %1149 = vrot.lane.b32.xlu2 %v2666_v32, %s2808_s21  ;;  %v2668_v47 = vpop.eup %2667 }
0x1572   :  { %v1434_v17 = vadd.f32 1.0, %v2668_v47 }
0x1574   :  { %2669 = vrcp.f32 %v1434_v17  ;;  %v1446_v14 = vand.u32 2147483648, %v1434_v17  ;;  %vm1440_vm11 = vweird.f32 %v1434_v17  ;;  %v1444_v56 = vand.u32 2147483647, %v1434_v17 }
0x1576   :  { %v1447_v57 = vor.u32 1.1754944e-38, %v1446_v14  ;;  %vm1445_vm13 = vcmp.eq.f32.partialorder %v1444_v56, 8.507059e+37 }
0x157a   :  { %v2670_v27 = vpop.eup %2669 }
0x157b   :  { %v1436_v50 = vmul.f32 %v2670_v27, %v1434_v17  ;;  %vm1441_vm10 = vweird.f32 %v2670_v27 }
0x157c   :  { %vm1442_vm12 = vmor %vm1440_vm11, %vm1441_vm10 }
0x157d   :  { %v1437_v39 = vsub.f32 1.0, %v1436_v50 }
0x157f   :  { %v1438_v5 = vmul.f32 %v2670_v27, %v1437_v39 }
0x1581   :  { %v1439_v54 = vadd.f32 %v2670_v27, %v1438_v5 }
0x1583   :  { %v1443_v43 = vsel %vm1442_vm12, %v2670_v27, %v1439_v54 }
0x1584   :  { %v1448_v41 = vsel %vm1445_vm13, %v1447_v57, %v1443_v43 }
0x1585   :  { %v1451_v62 = vmul.f32 %v1448_v41, %v3362_v22  ;;  %v1528_v22 = vld [vmem:[%s3761_s5 + $0x30] sm:$0xff] }
0x1586   :  { %1574 = vmatpush.msrb.mxu0 %v1528_v22 }
0x1588   :  { %1575 = vmatpush.msrb.mxu0 %v1527_v38 }
0x158a   :  { %1576 = vmatpush.msrb.mxu0 %v1526_v34 }
0x158c   :  { %1577 = vmatpush.msrb.mxu0 %v1525_v37 }
0x158e   :  { %1578 = vmatpush.msrb.mxu0 %v1524_v40 }
0x1590   :  { %1579 = vmatpush.msrb.mxu0 %v1523_v61 }
0x1592   :  { %1580 = vmatpush.msrb.mxu0 %v1522_v23 }
0x15c3   :  { %v1454_v58 = vpop.permute.xlu2 %1453 }
0x15c4   :  { %v1456_v7 = vmul.f32 %v1454_v58, %v1448_v41  ;;  %v3467_v58 = vld [vmem:[%s3763_s7] ss:$0 sm:$0xff] }
0x15c6   :  { %1458 = vrot.lane.b32.xlu1 %v1456_v7, %s2809_s2  ;;  %v1629_v7 = vpop.f32.mrf.mxu1 }
0x15cb   :  { %v1150_v48 = vpop.permute.xlu2 %1149 }
0x15cc   :  { %v1152_v10 = vmul.f32 %v1150_v48, %v1133_v3  ;;  %v161_v3 = vpop.f32.mrf.mxu0 }
0x15cd   :  { %v162_v11 = vadd.f32 %v161_v3, %v3092_v4 }
0x15ce   :  { %1217 = vrot.lane.b32.xlu1 %v1152_v10, %s2809_s2 }
0x15d4   :  { %v3462_v57 = vpop.f32.mrf.mxu0 }
0x1638   :  { %v1459_v28 = vpop.permute.xlu1 %1458 }
0x1639   :  { %v1461_v51 = vadd.f32 %v1459_v28, %v1451_v62 }
0x163b   :  { %2671 = vtanh.f32 %v1461_v51 }
0x1640   :  { %v3393_v20 = vpop.permute.xlu1 %1217 }
0x1641   :  { %v2672_v35 = vpop.eup %2671  ;;  %2457 = vmatmul.msk.f32.vlgmr.msra.gmra.mxu2 %vm214_vm5, %v3393_v20 }
0x1642   :  { %1464 = vrot.lane.b32.xlu0 %v2672_v35, %s2808_s21  ;;  %1687 = vmatpush.msra.mxu2 %v3401_v36 }
0x1644   :  { %1688 = vmatpush.msra.mxu2 %v3410_v25 }
0x1646   :  { %1689 = vmatpush.msra.mxu2 %v3418_v19 }
0x1648   :  { %1690 = vmatpush.msra.mxu2 %v3426_v0 }
0x16b4   :  { %v1465_v30 = vpop.permute.xlu0 %1464 }
0x16b5   :  { %v1467_v31 = vmul.f32 %v1465_v30, %v1448_v41 }
0x16b7   :  { %1470 = vrot.lane.b32.xlu2 %v1467_v31, %s2808_s21 }
0x16c4   :  { %v1238_v8 = vpop.f32.mrf.mxu2 }
0x16c5   :  { %v1241_v63 = vadd.f32 %v1238_v8, %v162_v11 }
0x16c7   :  { %2673 = vtanh.f32 %v1241_v63  ;;  %v2458_v44 = vmul.f32 -1.442695, %v1241_v63 }
0x16c9   :  { %2675 = vpow2.f32 %v2458_v44 }
0x16cd   :  { %v2674_v42 = vpop.eup %2673 }
0x16ce   :  { %1264 = vrot.lane.b32.xlu0 %v2674_v42, %s2808_s21 }
0x16cf   :  { %v2676_v9 = vpop.eup %2675 }
0x16d0   :  { %v1245_v32 = vadd.f32 1.0, %v2676_v9 }
0x16d2   :  { %2677 = vrcp.f32 %v1245_v32  ;;  %v1257_v39 = vand.u32 2147483648, %v1245_v32  ;;  %vm1251_vm0 = vweird.f32 %v1245_v32  ;;  %v1255_v5 = vand.u32 2147483647, %v1245_v32 }
0x16d4   :  { %v1258_v14 = vor.u32 1.1754944e-38, %v1257_v39  ;;  %vm1256_vm2 = vcmp.eq.f32.partialorder %v1255_v5, 8.507059e+37 }
0x16d8   :  { %v2678_v46 = vpop.eup %2677 }
0x16d9   :  { %v1247_v47 = vmul.f32 %v2678_v46, %v1245_v32  ;;  %vm1252_vm15 = vweird.f32 %v2678_v46 }
0x16da   :  { %vm1253_vm1 = vmor %vm1251_vm0, %vm1252_vm15 }
0x16db   :  { %v1248_v17 = vsub.f32 1.0, %v1247_v47 }
0x16dd   :  { %v1249_v27 = vmul.f32 %v2678_v46, %v1248_v17 }
0x16df   :  { %v1250_v50 = vadd.f32 %v2678_v46, %v1249_v27 }
0x16e1   :  { %v1254_v54 = vsel %vm1253_vm1, %v2678_v46, %v1250_v50 }
0x1711   :  { %v1471_v18 = vpop.permute.xlu2 %1470 }
0x1712   :  { %v1473_v12 = vsel %vm214_vm5, %v3119_v15, %v1471_v18  ;;  %v1259_v15 = vsel %vm1256_vm2, %v1258_v14, %v1254_v54 }
0x1713   :  { %2465 = vmatmul.msk.f32.vlgmr.msrb.gmra.mxu0 %vm1534_vm14, %v1473_v12  ;;  %v1262_v28 = vmul.f32 %v1259_v15, %v3385_v24 }
0x1740   :  { %v1265_v56 = vpop.permute.xlu0 %1264 }
0x1741   :  { %v1267_v43 = vmul.f32 %v1265_v56, %v1259_v15 }
0x1743   :  { %1269 = vrot.lane.b32.xlu2 %v1267_v43, %s2809_s2 }
0x1790   :  { %v1582_v41 = vpop.f32.mrf.mxu0 }
0x1791   :  { %v1583_v48 = vadd.f32 %v3467_v58, %v1582_v41 }
0x1793   :  { %v1632_v10 = vadd.f32 %v1629_v7, %v1583_v48 }
0x1795   :  { %2679 = vtanh.f32 %v1632_v10  ;;  %v2475_v22 = vmul.f32 -1.442695, %v1632_v10 }
0x179b   :  { %v2680_v62 = vpop.eup %2679 }
0x179c   :  { %1655 = vrot.lane.b32.xlu1 %v2680_v62, %s2808_s21 }
0x179d   :  { %v1270_v51 = vpop.permute.xlu2 %1269 }
0x179e   :  { %v3472_v35 = vadd.f32 %v1270_v51, %v1262_v28 }
0x17a0   :  { %2681 = vtanh.f32 %v3472_v35 }
0x17a1   :  { %2683 = vpow2.f32 %v2475_v22 }
0x17a6   :  { %v2682_v16 = vpop.eup %2681 }
0x17a7   :  { %1275 = vrot.lane.b32.xlu1 %v2682_v16, %s2808_s21  ;;  %v2684_v38 = vpop.eup %2683 }
0x17a8   :  { %v1636_v30 = vadd.f32 1.0, %v2684_v38 }
0x17aa   :  { %2685 = vrcp.f32 %v1636_v30  ;;  %v1648_v24 = vand.u32 2147483648, %v1636_v30  ;;  %vm1642_vm4 = vweird.f32 %v1636_v30  ;;  %v1646_v23 = vand.u32 2147483647, %v1636_v30 }
0x17ac   :  { %v1649_v11 = vor.u32 1.1754944e-38, %v1648_v24  ;;  %vm1647_vm7 = vcmp.eq.f32.partialorder %v1646_v23, 8.507059e+37 }
0x17b0   :  { %v2686_v34 = vpop.eup %2685 }
0x17b1   :  { %v1638_v31 = vmul.f32 %v2686_v34, %v1636_v30  ;;  %vm1643_vm3 = vweird.f32 %v2686_v34 }
0x17b2   :  { %vm1644_vm6 = vmor %vm1642_vm4, %vm1643_vm3 }
0x17b3   :  { %v1639_v37 = vsub.f32 1.0, %v1638_v31 }
0x17b5   :  { %v1640_v40 = vmul.f32 %v2686_v34, %v1639_v37 }
0x17b7   :  { %v1641_v61 = vadd.f32 %v2686_v34, %v1640_v40 }
0x17b9   :  { %v1645_v3 = vsel %vm1644_vm6, %v2686_v34, %v1641_v61 }
0x17ba   :  { %v1650_v63 = vsel %vm1647_vm7, %v1649_v11, %v1645_v3 }
0x17bb   :  { %v1653_v44 = vmul.f32 0.0, %v1650_v63 }
0x180e   :  { %v1656_v8 = vpop.permute.xlu1 %1655 }
0x180f   :  { %v1658_v42 = vmul.f32 %v1656_v8, %v1650_v63 }
0x1811   :  { %1660 = vrot.lane.b32.xlu0 %v1658_v42, %s2809_s2 }
0x1819   :  { %v1276_v18 = vpop.permute.xlu1 %1275 }
0x181a   :  { %v1278_v12 = vmul.f32 %v1276_v18, %v1259_v15 }
0x181c   :  { %1343 = vrot.lane.b32.xlu0 %v1278_v12, %s2809_s2 }
0x1883   :  { %v1661_v9 = vpop.permute.xlu0 %1660 }
0x1884   :  { %v1663_v32 = vadd.f32 %v1661_v9, %v1653_v44 }
0x1886   :  { %2687 = vtanh.f32 %v1663_v32 }
0x188c   :  { %v2688_v46 = vpop.eup %2687 }
0x188d   :  { %1666 = vrot.lane.b32.xlu2 %v2688_v46, %s2808_s21 }
0x188e   :  { %v3479_v47 = vpop.permute.xlu0 %1343 }
0x188f   :  { %2461 = vmatmul.msk.f32.vlgmr.msrb.gmra.mxu2 %vm214_vm5, %v3479_v47 }
0x1890   :  { %1876 = vmatpush.msrb.mxu2 %v3401_v36 }
0x1892   :  { %1877 = vmatpush.msrb.mxu2 %v3410_v25 }
0x1894   :  { %1878 = vmatpush.msrb.mxu2 %v3418_v19 }
0x1895   :  { %1475 = vrot.lane.b32.xlu2 %v3374_v60, %s2808_s21 }
0x1896   :  { %1879 = vmatpush.msrb.mxu2 %v3426_v0 }
0x18e7   :  { %v1667_v17 = vpop.permute.xlu2 %1666 }
0x18e8   :  { %v1669_v27 = vmul.f32 %v1667_v17, %v1650_v63 }
0x18ea   :  { %1671 = vrot.lane.b32.xlu1 %v1669_v27, %s2809_s2 }
0x18ef   :  { %v1476_v50 = vpop.permute.xlu2 %1475 }
0x18f0   :  { %v1478_v39 = vsel %vm214_vm5, %v3154_v52, %v1476_v50 }
0x18f1   :  { %2466 = vmatmul.msk.f32.gmra.mxu0 %vm1534_vm14, %v1478_v39 }
0x1912   :  { %v3501_v60 = vpop.f32.mrf.mxu2 }
0x195c   :  { %v3493_v5 = vpop.permute.xlu1 %1671 }
0x195d   :  { %2476 = vmatmul.msk.f32.vlgmr.msra.gmra.mxu2 %vm214_vm5, %v3493_v5 }
0x195e   :  { %2065 = vmatpush.msra.mxu2 %v3401_v36 }
0x1960   :  { %2066 = vmatpush.msra.mxu2 %v3410_v25 }
0x1962   :  { %2067 = vmatpush.msra.mxu2 %v3418_v19 }
0x1964   :  { %2068 = vmatpush.msra.mxu2 %v3426_v0 }
0x196e   :  { %v1585_v54 = vpop.f32.mrf.mxu0 }
0x196f   :  { %v1586_v52 = vadd.f32 %v3467_v58, %v1585_v54 }
0x19e0   :  { %v1692_v14 = vpop.f32.mrf.mxu2 }
0x19e1   :  { %v1695_v15 = vadd.f32 %v1692_v14, %v1586_v52 }
0x19e3   :  { %2689 = vtanh.f32 %v1695_v15  ;;  %v2477_v43 = vmul.f32 -1.442695, %v1695_v15 }
0x19e5   :  { %2691 = vpow2.f32 %v2477_v43 }
0x19e9   :  { %v2690_v56 = vpop.eup %2689 }
0x19ea   :  { %1718 = vrot.lane.b32.xlu0 %v2690_v56, %s2808_s21 }
0x19eb   :  { %v2692_v41 = vpop.eup %2691 }
0x19ec   :  { %v1699_v7 = vadd.f32 1.0, %v2692_v41 }
0x19ee   :  { %2693 = vrcp.f32 %v1699_v7  ;;  %v1711_v16 = vand.u32 2147483648, %v1699_v7  ;;  %vm1705_vm9 = vweird.f32 %v1699_v7  ;;  %v1709_v22 = vand.u32 2147483647, %v1699_v7 }
0x19f0   :  { %v1712_v30 = vor.u32 1.1754944e-38, %v1711_v16  ;;  %vm1710_vm11 = vcmp.eq.f32.partialorder %v1709_v22, 8.507059e+37 }
0x19f4   :  { %v2694_v48 = vpop.eup %2693 }
0x19f5   :  { %v1701_v10 = vmul.f32 %v2694_v48, %v1699_v7  ;;  %vm1706_vm8 = vweird.f32 %v2694_v48 }
0x19f6   :  { %vm1707_vm10 = vmor %vm1705_vm9, %vm1706_vm8 }
0x19f7   :  { %v1702_v62 = vsub.f32 1.0, %v1701_v10 }
0x19f9   :  { %v1703_v28 = vmul.f32 %v2694_v48, %v1702_v62 }
0x19fb   :  { %v1704_v51 = vadd.f32 %v2694_v48, %v1703_v28 }
0x19fd   :  { %v1708_v38 = vsel %vm1707_vm10, %v2694_v48, %v1704_v51 }
0x19fe   :  { %v1713_v31 = vsel %vm1710_vm11, %v1712_v30, %v1708_v38 }
0x19ff   :  { %v1716_v40 = vmul.f32 %v1713_v31, %v1663_v32 }
0x1a5c   :  { %v1719_v34 = vpop.permute.xlu0 %1718 }
0x1a5d   :  { %v1721_v37 = vmul.f32 %v1719_v34, %v1713_v31 }
0x1a5f   :  { %1723 = vrot.lane.b32.xlu1 %v1721_v37, %s2809_s2 }
0x1a67   :  { %1480 = vrot.lane.b32.xlu1 %v3343_v21, %s2808_s21 }
0x1ad1   :  { %v1724_v61 = vpop.permute.xlu1 %1723 }
0x1ad2   :  { %v1726_v24 = vadd.f32 %v1724_v61, %v1716_v40 }
0x1ad4   :  { %2695 = vtanh.f32 %v1726_v24 }
0x1ad9   :  { %v1481_v23 = vpop.permute.xlu1 %1480 }
0x1ada   :  { %v2696_v3 = vpop.eup %2695  ;;  %v1483_v11 = vsel %vm214_vm5, %v3189_v1, %v1481_v23 }
0x1adb   :  { %2467 = vmatmul.msk.f32.gmra.mxu0 %vm1534_vm14, %v1483_v11  ;;  %1729 = vrot.lane.b32.xlu2 %v2696_v3, %s2808_s21 }
0x1b35   :  { %v1730_v8 = vpop.permute.xlu2 %1729 }
0x1b36   :  { %v1732_v63 = vmul.f32 %v1730_v8, %v1713_v31 }
0x1b38   :  { %1734 = vrot.lane.b32.xlu0 %v1732_v63, %s2809_s2 }
0x1b58   :  { %v1588_v1 = vpop.f32.mrf.mxu0 }
0x1b59   :  { %v1589_v21 = vadd.f32 %v3467_v58, %v1588_v1 }
0x1baa   :  { %v3513_v42 = vpop.permute.xlu0 %1734 }
0x1bab   :  { %2478 = vmatmul.msk.f32.vlgmr.msra.gmra.mxu3 %vm214_vm5, %v3513_v42 }
0x1bac   :  { %2128 = vmatpush.msra.mxu3 %v3401_v36 }
0x1bae   :  { %2129 = vmatpush.msra.mxu3 %v3410_v25 }
0x1bb0   :  { %2130 = vmatpush.msra.mxu3 %v3418_v19 }
0x1bb2   :  { %2131 = vmatpush.msra.mxu3 %v3426_v0 }
0x1c2e   :  { %v1755_v18 = vpop.f32.mrf.mxu3 }
0x1c2f   :  { %v1758_v12 = vadd.f32 %v1755_v18, %v1589_v21 }
0x1c31   :  { %2697 = vtanh.f32 %v1758_v12  ;;  %v2479_v9 = vmul.f32 -1.442695, %v1758_v12 }
0x1c33   :  { %2699 = vpow2.f32 %v2479_v9 }
0x1c37   :  { %v2698_v44 = vpop.eup %2697 }
0x1c38   :  { %1781 = vrot.lane.b32.xlu2 %v2698_v44, %s2808_s21 }
0x1c39   :  { %v2700_v32 = vpop.eup %2699 }
0x1c3a   :  { %v1762_v46 = vadd.f32 1.0, %v2700_v32 }
0x1c3c   :  { %2701 = vrcp.f32 %v1762_v46  ;;  %v1774_v52 = vand.u32 2147483648, %v1762_v46  ;;  %vm1768_vm13 = vweird.f32 %v1762_v46  ;;  %v1772_v14 = vand.u32 2147483647, %v1762_v46 }
0x1c3e   :  { %v1775_v56 = vor.u32 1.1754944e-38, %v1774_v52  ;;  %vm1773_vm0 = vcmp.eq.f32.partialorder %v1772_v14, 8.507059e+37 }
0x1c40   :  { %1485 = vrot.lane.b32.xlu2 %v3288_v45, %s2808_s21 }
0x1c42   :  { %v2702_v17 = vpop.eup %2701 }
0x1c43   :  { %v1764_v27 = vmul.f32 %v2702_v17, %v1762_v46  ;;  %vm1769_vm12 = vweird.f32 %v2702_v17 }
0x1c44   :  { %vm1770_vm15 = vmor %vm1768_vm13, %vm1769_vm12 }
0x1c45   :  { %v1765_v50 = vsub.f32 1.0, %v1764_v27 }
0x1c47   :  { %v1766_v39 = vmul.f32 %v2702_v17, %v1765_v50 }
0x1c49   :  { %v1767_v54 = vadd.f32 %v2702_v17, %v1766_v39 }
0x1c4b   :  { %v1771_v15 = vsel %vm1770_vm15, %v2702_v17, %v1767_v54 }
0x1c4c   :  { %v1776_v45 = vsel %vm1773_vm0, %v1775_v56, %v1771_v15 }
0x1c4d   :  { %v1779_v10 = vmul.f32 %v1776_v45, %v1726_v24 }
0x1c92   :  { %v1782_v43 = vpop.permute.xlu2 %1781 }
0x1c93   :  { %v1784_v41 = vmul.f32 %v1782_v43, %v1776_v45 }
0x1c95   :  { %1786 = vrot.lane.b32.xlu0 %v1784_v41, %s2809_s2 }
0x1c9a   :  { %v1486_v7 = vpop.permute.xlu2 %1485 }
0x1c9b   :  { %v1488_v48 = vsel %vm214_vm5, %v3224_v33, %v1486_v7 }
0x1c9c   :  { %2468 = vmatmul.msk.f32.gmra.mxu0 %vm1534_vm14, %v1488_v48 }
0x1d07   :  { %v1787_v62 = vpop.permute.xlu0 %1786 }
0x1d08   :  { %v1789_v28 = vadd.f32 %v1787_v62, %v1779_v10 }
0x1d0a   :  { %2703 = vtanh.f32 %v1789_v28 }
0x1d10   :  { %v2704_v51 = vpop.eup %2703 }
0x1d11   :  { %1792 = vrot.lane.b32.xlu1 %v2704_v51, %s2808_s21 }
0x1d19   :  { %v1591_v33 = vpop.f32.mrf.mxu0 }
0x1d1a   :  { %v1592_v30 = vadd.f32 %v3467_v58, %v1591_v33 }
0x1d83   :  { %v1793_v16 = vpop.permute.xlu1 %1792 }
0x1d84   :  { %v1795_v22 = vmul.f32 %v1793_v16, %v1776_v45 }
0x1d86   :  { %1797 = vrot.lane.b32.xlu0 %v1795_v22, %s2809_s2 }
0x1df8   :  { %v3531_v38 = vpop.permute.xlu0 %1797 }
0x1df9   :  { %2480 = vmatmul.msk.f32.vlgmr.msra.gmra.mxu1 %vm214_vm5, %v3531_v38 }
0x1dfa   :  { %2191 = vmatpush.msra.mxu1 %v3401_v36 }
0x1dfc   :  { %2192 = vmatpush.msra.mxu1 %v3410_v25 }
0x1dfe   :  { %2193 = vmatpush.msra.mxu1 %v3418_v19 }
0x1e00   :  { %2194 = vmatpush.msra.mxu1 %v3426_v0 }
0x1e76   :  { %v1818_v34 = vpop.f32.mrf.mxu1 }
0x1e77   :  { %v1821_v31 = vadd.f32 %v1818_v34, %v1592_v30 }
0x1e79   :  { %2705 = vtanh.f32 %v1821_v31  ;;  %v2481_v40 = vmul.f32 -1.442695, %v1821_v31 }
0x1e7b   :  { %2707 = vpow2.f32 %v2481_v40 }
0x1e7f   :  { %v2706_v37 = vpop.eup %2705 }
0x1e80   :  { %1844 = vrot.lane.b32.xlu1 %v2706_v37, %s2808_s21 }
0x1e81   :  { %v2708_v61 = vpop.eup %2707 }
0x1e82   :  { %v1825_v24 = vadd.f32 1.0, %v2708_v61 }
0x1e84   :  { %2709 = vrcp.f32 %v1825_v24  ;;  %v1837_v0 = vand.u32 2147483648, %v1825_v24  ;;  %vm1831_vm2 = vweird.f32 %v1825_v24  ;;  %v1835_v11 = vand.u32 2147483647, %v1825_v24 }
0x1e86   :  { %v1838_v63 = vor.u32 1.1754944e-38, %v1837_v0  ;;  %vm1836_vm4 = vcmp.eq.f32.partialorder %v1835_v11, 8.507059e+37 }
0x1e8a   :  { %v2710_v36 = vpop.eup %2709 }
0x1e8b   :  { %v1827_v25 = vmul.f32 %v2710_v36, %v1825_v24  ;;  %vm1832_vm1 = vweird.f32 %v2710_v36 }
0x1e8c   :  { %vm1833_vm3 = vmor %vm1831_vm2, %vm1832_vm1 }
0x1e8d   :  { %v1828_v23 = vsub.f32 1.0, %v1827_v25 }
0x1e8f   :  { %v1829_v19 = vmul.f32 %v2710_v36, %v1828_v23 }
0x1e91   :  { %v1830_v3 = vadd.f32 %v2710_v36, %v1829_v19 }
0x1e93   :  { %v1834_v8 = vsel %vm1833_vm3, %v2710_v36, %v1830_v3 }
0x1e94   :  { %v1839_v21 = vsel %vm1836_vm4, %v1838_v63, %v1834_v8 }
0x1e95   :  { %v1842_v12 = vmul.f32 %v1839_v21, %v1789_v28 }
0x1ef2   :  { %v1845_v1 = vpop.permute.xlu1 %1844 }
0x1ef3   :  { %v1847_v18 = vmul.f32 %v1845_v1, %v1839_v21 }
0x1ef5   :  { %1849 = vrot.lane.b32.xlu2 %v1847_v18, %s2809_s2 }
0x1efd   :  { %1490 = vrot.lane.b32.xlu2 %v3233_v2, %s2808_s21 }
0x1f4f   :  { %v1850_v44 = vpop.permute.xlu2 %1849 }
0x1f50   :  { %v1852_v9 = vadd.f32 %v1850_v44, %v1842_v12 }
0x1f52   :  { %2711 = vtanh.f32 %v1852_v9 }
0x1f57   :  { %v1491_v32 = vpop.permute.xlu2 %1490 }
0x1f58   :  { %v2712_v46 = vpop.eup %2711  ;;  %v1493_v17 = vsel %vm214_vm5, %v3279_v6, %v1491_v32 }
0x1f59   :  { %2469 = vmatmul.msk.f32.gmra.mxu0 %vm1534_vm14, %v1493_v17  ;;  %1855 = vrot.lane.b32.xlu0 %v2712_v46, %s2808_s21 }
0x1fcb   :  { %v1856_v27 = vpop.permute.xlu0 %1855 }
0x1fcc   :  { %v1858_v50 = vmul.f32 %v1856_v27, %v1839_v21 }
0x1fce   :  { %1860 = vrot.lane.b32.xlu1 %v1858_v50, %s2809_s2 }
0x1fd6   :  { %v1594_v2 = vpop.f32.mrf.mxu0 }
0x1fd7   :  { %v1595_v54 = vadd.f32 %v3467_v58, %v1594_v2 }
0x2040   :  { %v3549_v39 = vpop.permute.xlu1 %1860 }
0x2041   :  { %2482 = vmatmul.msk.f32.vlgmr.msrb.gmra.mxu2 %vm214_vm5, %v3549_v39 }
0x20c4   :  { %v1881_v52 = vpop.f32.mrf.mxu2 }
0x20c5   :  { %v1884_v14 = vadd.f32 %v1881_v52, %v1595_v54 }
0x20c7   :  { %2713 = vtanh.f32 %v1884_v14  ;;  %v2483_v15 = vmul.f32 -1.442695, %v1884_v14 }
0x20c9   :  { %2715 = vpow2.f32 %v2483_v15 }
0x20cd   :  { %v2714_v6 = vpop.eup %2713 }
0x20ce   :  { %1907 = vrot.lane.b32.xlu0 %v2714_v6, %s2808_s21 }
0x20cf   :  { %v2716_v56 = vpop.eup %2715 }
0x20d0   :  { %v1888_v43 = vadd.f32 1.0, %v2716_v56 }
0x20d2   :  { %2717 = vrcp.f32 %v1888_v43  ;;  %v1900_v62 = vand.u32 2147483648, %v1888_v43  ;;  %vm1894_vm7 = vweird.f32 %v1888_v43  ;;  %v1898_v28 = vand.u32 2147483647, %v1888_v43 }
0x20d4   :  { %v1901_v16 = vor.u32 1.1754944e-38, %v1900_v62  ;;  %vm1899_vm9 = vcmp.eq.f32.partialorder %v1898_v28, 8.507059e+37 }
0x20d8   :  { %v2718_v45 = vpop.eup %2717 }
0x20d9   :  { %v1890_v41 = vmul.f32 %v2718_v45, %v1888_v43  ;;  %vm1895_vm6 = vweird.f32 %v2718_v45 }
0x20da   :  { %vm1896_vm8 = vmor %vm1894_vm7, %vm1895_vm6 }
0x20db   :  { %v1891_v7 = vsub.f32 1.0, %v1890_v41 }
0x20dd   :  { %v1892_v48 = vmul.f32 %v2718_v45, %v1891_v7 }
0x20df   :  { %v1893_v10 = vadd.f32 %v2718_v45, %v1892_v48 }
0x20e1   :  { %v1897_v51 = vsel %vm1896_vm8, %v2718_v45, %v1893_v10 }
0x20e2   :  { %v1902_v33 = vsel %vm1899_vm9, %v1901_v16, %v1897_v51 }
0x20e3   :  { %v1905_v34 = vmul.f32 %v1902_v33, %v1852_v9 }
0x2140   :  { %v1908_v22 = vpop.permute.xlu0 %1907 }
0x2141   :  { %v1910_v30 = vmul.f32 %v1908_v22, %v1902_v33 }
0x2143   :  { %1912 = vrot.lane.b32.xlu1 %v1910_v30, %s2809_s2 }
0x214b   :  { %1495 = vrot.lane.b32.xlu1 %v3198_v29, %s2808_s21 }
0x21b5   :  { %v1913_v31 = vpop.permute.xlu1 %1912 }
0x21b6   :  { %v1915_v37 = vadd.f32 %v1913_v31, %v1905_v34 }
0x21b8   :  { %2719 = vtanh.f32 %v1915_v37 }
0x21bd   :  { %v1496_v40 = vpop.permute.xlu1 %1495 }
0x21be   :  { %v2720_v61 = vpop.eup %2719  ;;  %v1498_v24 = vsel %vm214_vm5, %v3314_v49, %v1496_v40 }
0x21bf   :  { %2470 = vmatmul.msk.f32.gmra.mxu0 %vm1534_vm14, %v1498_v24  ;;  %1918 = vrot.lane.b32.xlu2 %v2720_v61, %s2808_s21 }
0x2219   :  { %v1919_v36 = vpop.permute.xlu2 %1918 }
0x221a   :  { %v1921_v25 = vmul.f32 %v1919_v36, %v1902_v33 }
0x221c   :  { %1923 = vrot.lane.b32.xlu0 %v1921_v25, %s2809_s2 }
0x223c   :  { %v1597_v29 = vpop.f32.mrf.mxu0 }
0x223d   :  { %v1598_v19 = vadd.f32 %v3467_v58, %v1597_v29 }
0x228e   :  { %v3563_v23 = vpop.permute.xlu0 %1923 }
0x228f   :  { %2484 = vmatmul.msk.f32.vlgmr.msrb.gmra.mxu3 %vm214_vm5, %v3563_v23 }
0x2312   :  { %v1944_v3 = vpop.f32.mrf.mxu3 }
0x2313   :  { %v1947_v0 = vadd.f32 %v1944_v3, %v1598_v19 }
0x2315   :  { %2721 = vtanh.f32 %v1947_v0  ;;  %v2485_v11 = vmul.f32 -1.442695, %v1947_v0 }
0x2317   :  { %2723 = vpow2.f32 %v2485_v11 }
0x231b   :  { %v2722_v49 = vpop.eup %2721 }
0x231c   :  { %1970 = vrot.lane.b32.xlu2 %v2722_v49, %s2808_s21 }
0x231d   :  { %v2724_v8 = vpop.eup %2723 }
0x231e   :  { %v1951_v63 = vadd.f32 1.0, %v2724_v8 }
0x2320   :  { %2725 = vrcp.f32 %v1951_v63  ;;  %v1963_v9 = vand.u32 2147483648, %v1951_v63  ;;  %vm1957_vm11 = vweird.f32 %v1951_v63  ;;  %v1961_v32 = vand.u32 2147483647, %v1951_v63 }
0x2322   :  { %v1964_v17 = vor.u32 1.1754944e-38, %v1963_v9  ;;  %vm1962_vm13 = vcmp.eq.f32.partialorder %v1961_v32, 8.507059e+37 }
0x2324   :  { %1500 = vrot.lane.b32.xlu2 %v3163_v55, %s2808_s21 }
0x2326   :  { %v2726_v1 = vpop.eup %2725 }
0x2327   :  { %v1953_v21 = vmul.f32 %v2726_v1, %v1951_v63  ;;  %vm1958_vm10 = vweird.f32 %v2726_v1 }
0x2328   :  { %vm1959_vm12 = vmor %vm1957_vm11, %vm1958_vm10 }
0x2329   :  { %v1954_v18 = vsub.f32 1.0, %v1953_v21  ;;  %v2237_v21 = vld [vmem:[%s3764_s8] sm:$0xff] }
0x232b   :  { %v1955_v12 = vmul.f32 %v2726_v1, %v1954_v18 }
0x232d   :  { %v1956_v44 = vadd.f32 %v2726_v1, %v1955_v12 }
0x232f   :  { %v1960_v46 = vsel %vm1959_vm12, %v2726_v1, %v1956_v44  ;;  %v2239_v1 = vld [vmem:[%s3764_s8 + $0x10] sm:$0xff]  ;;  %vm2313_vm12 = vcmask 130048  }
0x2330   :  { %v1965_v55 = vsel %vm1962_vm13, %v1964_v17, %v1960_v46  ;;  %vm2391_vm13 = vcmask 7168  }
0x2331   :  { %v1968_v52 = vmul.f32 %v1965_v55, %v1915_v37 }
0x2376   :  { %v1971_v27 = vpop.permute.xlu2 %1970 }
0x2377   :  { %v1973_v50 = vmul.f32 %v1971_v27, %v1965_v55 }
0x2379   :  { %1975 = vrot.lane.b32.xlu0 %v1973_v50, %s2809_s2 }
0x237e   :  { %v1501_v2 = vpop.permute.xlu2 %1500 }
0x237f   :  { %v1503_v54 = vsel %vm214_vm5, %v3365_v59, %v1501_v2 }
0x2380   :  { %2471 = vmatmul.msk.f32.gmra.mxu0 %vm1534_vm14, %v1503_v54 }
0x23eb   :  { %v1976_v14 = vpop.permute.xlu0 %1975 }
0x23ec   :  { %v1978_v6 = vadd.f32 %v1976_v14, %v1968_v52 }
0x23ee   :  { %2727 = vtanh.f32 %v1978_v6 }
0x23f4   :  { %v2728_v15 = vpop.eup %2727 }
0x23f5   :  { %1981 = vrot.lane.b32.xlu1 %v2728_v15, %s2808_s21 }
0x23fd   :  { %v1600_v41 = vpop.f32.mrf.mxu0 }
0x23fe   :  { %v1601_v7 = vadd.f32 %v3467_v58, %v1600_v41 }
0x2467   :  { %v1982_v56 = vpop.permute.xlu1 %1981 }
0x2468   :  { %v1984_v43 = vmul.f32 %v1982_v56, %v1965_v55 }
0x246a   :  { %1986 = vrot.lane.b32.xlu0 %v1984_v43, %s2809_s2 }
0x24dc   :  { %v1987_v45 = vpop.permute.xlu0 %1986 }
0x24dd   :  { %2486 = vmatmul.msk.f32.vlgmr.msrb.gmra.mxu1 %vm214_vm5, %v1987_v45 }
0x255a   :  { %v2007_v59 = vpop.f32.mrf.mxu1 }
0x255b   :  { %v2010_v48 = vadd.f32 %v2007_v59, %v1601_v7 }
0x255d   :  { %2729 = vtanh.f32 %v2010_v48  ;;  %v2487_v62 = vmul.f32 -1.442695, %v2010_v48  ;;  %v165_v48 = vadd.f32 %v3462_v57, %v3092_v4 }
0x255f   :  { %2731 = vpow2.f32 %v2487_v62 }
0x2563   :  { %v2730_v10 = vpop.eup %2729 }
0x2564   :  { %2033 = vrot.lane.b32.xlu1 %v2730_v10, %s2808_s21  ;;  %v1367_v10 = vadd.f32 %v3501_v60, %v165_v48 }
0x2565   :  { %v2732_v28 = vpop.eup %2731 }
0x2566   :  { %v2014_v51 = vadd.f32 1.0, %v2732_v28 }
0x2568   :  { %2733 = vrcp.f32 %v2014_v51  ;;  %v2026_v31 = vand.u32 2147483648, %v2014_v51  ;;  %vm2020_vm0 = vweird.f32 %v2014_v51  ;;  %v2024_v37 = vand.u32 2147483647, %v2014_v51 }
0x256a   :  { %v2027_v61 = vor.u32 1.1754944e-38, %v2026_v31  ;;  %vm2025_vm2 = vcmp.eq.f32.partialorder %v2024_v37, 8.507059e+37 }
0x256e   :  { %v2734_v16 = vpop.eup %2733 }
0x256f   :  { %v2016_v22 = vmul.f32 %v2734_v16, %v2014_v51  ;;  %vm2021_vm15 = vweird.f32 %v2734_v16 }
0x2570   :  { %vm2022_vm1 = vmor %vm2020_vm0, %vm2021_vm15 }
0x2571   :  { %v2017_v33 = vsub.f32 1.0, %v2016_v22 }
0x2573   :  { %v2018_v30 = vmul.f32 %v2734_v16, %v2017_v33 }
0x2575   :  { %v2019_v34 = vadd.f32 %v2734_v16, %v2018_v30 }
0x2577   :  { %v2023_v40 = vsel %vm2022_vm1, %v2734_v16, %v2019_v34  ;;  %v2462_v16 = vmul.f32 -1.442695, %v1367_v10 }
0x2578   :  { %v2028_v36 = vsel %vm2025_vm2, %v2027_v61, %v2023_v40 }
0x2579   :  { %v2031_v29 = vmul.f32 %v2028_v36, %v1978_v6 }
0x25d6   :  { %v2034_v24 = vpop.permute.xlu1 %2033 }
0x25d7   :  { %v2036_v25 = vmul.f32 %v2034_v24, %v2028_v36 }
0x25d9   :  { %2038 = vrot.lane.b32.xlu2 %v2036_v25, %s2809_s2 }
0x25e1   :  { %1505 = vrot.lane.b32.xlu2 %v3128_v26, %s2808_s21  ;;  %v2240_v26 = vld [vmem:[%s3764_s8 + $0x18] sm:$0xff] }
0x25e2   :  { %2514 = vmatpush.msrb.mxu2 %v2240_v26  ;;  %2262 = vmatpush.msrb.mxu1 %v2240_v26 }
0x25e4   :  { %2515 = vmatpush.msrb.mxu2 %v2239_v1  ;;  %2263 = vmatpush.msrb.mxu1 %v2239_v1 }
0x2633   :  { %v2039_v19 = vpop.permute.xlu2 %2038 }
0x2634   :  { %v2041_v3 = vadd.f32 %v2039_v19, %v2031_v29  ;;  %v3631_v19 = vld [vmem:[%s3766_s10 + $0x8] sm:$0xff] }
0x2635   :  { %2518 = vmatpush.msrb.mxu3 %v3631_v19 }
0x2636   :  { %2735 = vtanh.f32 %v2041_v3 }
0x263b   :  { %v1506_v0 = vpop.permute.xlu2 %1505 }
0x263c   :  { %v2736_v49 = vpop.eup %2735  ;;  %v1508_v11 = vsel %vm214_vm5, %v3393_v20, %v1506_v0  ;;  %v2238_v20 = vld [vmem:[%s3764_s8 + $0x8] sm:$0xff] }
0x263d   :  { %2472 = vmatmul.msk.f32.gmra.mxu0 %vm1534_vm14, %v1508_v11  ;;  %2044 = vrot.lane.b32.xlu0 %v2736_v49, %s2808_s21  ;;  %v3643_v49 = vld [vmem:[%s3765_s9] ss:$0 sm:$0xff] }
0x263e   :  { %2516 = vmatpush.msrb.mxu2 %v2238_v20  ;;  %2264 = vmatpush.msrb.mxu1 %v2238_v20 }
0x2640   :  { %2517 = vmatpush.msrb.mxu2 %v2237_v21  ;;  %2265 = vmatpush.msrb.mxu1 %v2237_v21 }
0x26af   :  { %v2045_v8 = vpop.permute.xlu0 %2044 }
0x26b0   :  { %v2047_v63 = vmul.f32 %v2045_v8, %v2028_v36 }
0x26b2   :  { %2049 = vrot.lane.b32.xlu1 %v2047_v63, %s2809_s2 }
0x26ba   :  { %v1603_v12 = vpop.f32.mrf.mxu0 }
0x26bb   :  { %v1604_v44 = vadd.f32 %v3467_v58, %v1603_v12 }
0x2724   :  { %v2050_v18 = vpop.permute.xlu1 %2049 }
0x2725   :  { %2488 = vmatmul.msk.f32.vlgmr.msra.gmra.mxu2 %vm214_vm5, %v2050_v18 }
0x272d   :  { %2497 = vmatmul.msk.f32.vlgmr.msrb.gmra.mxu2 %vm214_vm5, %v3549_v39 }
0x2735   :  { %2498 = vmatmul.msk.f32.gmra.mxu2 %vm214_vm5, %v3563_v23 }
0x273d   :  { %2499 = vmatmul.msk.f32.gmra.mxu2 %vm214_vm5, %v1987_v45 }
0x2745   :  { %2500 = vmatmul.msk.f32.gmra.mxu2 %vm214_vm5, %v2050_v18 }
0x27a8   :  { %v2070_v9 = vpop.f32.mrf.mxu2 }
0x27a9   :  { %v2073_v32 = vadd.f32 %v2070_v9, %v1604_v44 }
0x27ab   :  { %2737 = vtanh.f32 %v2073_v32  ;;  %v2489_v17 = vmul.f32 -1.442695, %v2073_v32 }
0x27ad   :  { %2739 = vpow2.f32 %v2489_v17 }
0x27b0   :  { %v2276_v0 = vpop.f32.mrf.mxu2 }
0x27b1   :  { %v2738_v46 = vpop.eup %2737  ;;  %v2277_v8 = vadd.f32 %v3643_v49, %v2276_v0 }
0x27b2   :  { %2096 = vrot.lane.b32.xlu0 %v2738_v46, %s2808_s21 }
0x27b3   :  { %v2740_v27 = vpop.eup %2739  ;;  %v2300_v26 = vmax.f32 %v2277_v8, 0.0 }
0x27b4   :  { %v2077_v39 = vadd.f32 1.0, %v2740_v27 }
0x27b6   :  { %2741 = vrcp.f32 %v2077_v39  ;;  %v2089_v52 = vand.u32 2147483648, %v2077_v39  ;;  %vm2083_vm4 = vweird.f32 %v2077_v39  ;;  %v2087_v14 = vand.u32 2147483647, %v2077_v39 }
0x27b8   :  { %v2090_v15 = vor.u32 1.1754944e-38, %v2089_v52  ;;  %vm2088_vm7 = vcmp.eq.f32.partialorder %v2087_v14, 8.507059e+37  ;;  %v2279_v63 = vpop.f32.mrf.mxu2  ;;  %v3660_v52 = vld [vmem:[#allocation2] ss:$0 sm:$0xff] }
0x27b9   :  { %v2280_v1 = vadd.f32 %v3643_v49, %v2279_v63 }
0x27bb   :  { %v2301_v21 = vmax.f32 %v2280_v1, 0.0 }
0x27bc   :  { %v2742_v55 = vpop.eup %2741 }
0x27bd   :  { %v2079_v23 = vmul.f32 %v2742_v55, %v2077_v39  ;;  %vm2084_vm3 = vweird.f32 %v2742_v55 }
0x27be   :  { %vm2085_vm6 = vmor %vm2083_vm4, %vm2084_vm3 }
0x27bf   :  { %v2080_v50 = vsub.f32 1.0, %v2079_v23 }
0x27c0   :  { %v2282_v20 = vpop.f32.mrf.mxu2 }
0x27c1   :  { %v2081_v2 = vmul.f32 %v2742_v55, %v2080_v50  ;;  %v2283_v18 = vadd.f32 %v3643_v49, %v2282_v20  ;;  %v2777_v20 = vld [vmem:[%s3763_s7] ss:$0 sm:$0xff] }
0x27c3   :  { %v2082_v54 = vadd.f32 %v2742_v55, %v2081_v2  ;;  %v2302_v12 = vmax.f32 %v2283_v18, 0.0 }
0x27c5   :  { %v2086_v6 = vsel %vm2085_vm6, %v2742_v55, %v2082_v54 }
0x27c6   :  { %v2091_v43 = vsel %vm2088_vm7, %v2090_v15, %v2086_v6 }
0x27c7   :  { %v2094_v41 = vmul.f32 %v2091_v43, %v2041_v3  ;;  %v3636_v3 = vld [vmem:[%s3766_s10] sm:$0xff] }
0x27c8   :  { %2519 = vmatpush.msrb.mxu3 %v3636_v3  ;;  %v2285_v44 = vpop.f32.mrf.mxu2 }
0x27c9   :  { %v2286_v9 = vadd.f32 %v3643_v49, %v2285_v44 }
0x27cb   :  { %v2303_v32 = vmax.f32 %v2286_v9, 0.0 }
0x2824   :  { %v2097_v56 = vpop.permute.xlu0 %2096 }
0x2825   :  { %v2099_v45 = vmul.f32 %v2097_v56, %v2091_v43 }
0x2827   :  { %2101 = vrot.lane.b32.xlu1 %v2099_v45, %s2809_s2 }
0x282f   :  { %1510 = vrot.lane.b32.xlu1 %v3095_v13, %s2808_s21 }
0x2899   :  { %v2102_v7 = vpop.permute.xlu1 %2101 }
0x289a   :  { %v3612_v59 = vadd.f32 %v2102_v7, %v2094_v41 }
0x289c   :  { %2743 = vtanh.f32 %v3612_v59 }
0x289d   :  { %2745 = vtanh.f32 %v1367_v10 }
0x289e   :  { %2747 = vpow2.f32 %v2462_v16 }
0x28a1   :  { %v1511_v62 = vpop.permute.xlu1 %1510 }
0x28a2   :  { %v2744_v28 = vpop.eup %2743  ;;  %v1513_v51 = vsel %vm214_vm5, %v3479_v47, %v1511_v62 }
0x28a3   :  { %2473 = vmatmul.msk.f32.gmra.mxu0 %vm1534_vm14, %v1513_v51  ;;  %2107 = vrot.lane.b32.xlu2 %v2744_v28, %s2808_s21  ;;  %v2746_v13 = vpop.eup %2745 }
0x28a4   :  { %v2748_v22 = vpop.eup %2747 }
0x28a5   :  { %v1371_v33 = vadd.f32 1.0, %v2748_v22 }
0x28a7   :  { %2749 = vrcp.f32 %v1371_v33  ;;  %v1383_v37 = vand.u32 2147483648, %v1371_v33  ;;  %vm1377_vm9 = vweird.f32 %v1371_v33  ;;  %v1381_v40 = vand.u32 2147483647, %v1371_v33 }
0x28a9   :  { %v1384_v24 = vor.u32 1.1754944e-38, %v1383_v37  ;;  %vm1382_vm11 = vcmp.eq.f32.partialorder %v1381_v40, 8.507059e+37 }
0x28ab   :  { %1390 = vrot.lane.b32.xlu2 %v2746_v13, %s2808_s21 }
0x28ad   :  { %v2750_v4 = vpop.eup %2749 }
0x28ae   :  { %v1373_v57 = vmul.f32 %v2750_v4, %v1371_v33  ;;  %vm1378_vm8 = vweird.f32 %v2750_v4 }
0x28af   :  { %vm1379_vm10 = vmor %vm1377_vm9, %vm1378_vm8 }
0x28b0   :  { %v1374_v60 = vsub.f32 1.0, %v1373_v57 }
0x28b2   :  { %v1375_v30 = vmul.f32 %v2750_v4, %v1374_v60 }
0x28b4   :  { %v1376_v47 = vadd.f32 %v2750_v4, %v1375_v30 }
0x28b6   :  { %v1380_v61 = vsel %vm1379_vm10, %v2750_v4, %v1376_v47 }
0x28b7   :  { %v3624_v25 = vsel %vm1382_vm11, %v1384_v24, %v1380_v61 }
0x28b8   :  { %v1388_v54 = vmul.f32 %v3624_v25, %v3472_v35 }
0x28fd   :  { %v2108_v34 = vpop.permute.xlu2 %2107 }
0x28fe   :  { %v2110_v31 = vmul.f32 %v2108_v34, %v2091_v43 }
0x2900   :  { %2112 = vrot.lane.b32.xlu0 %v2110_v31, %s2809_s2 }
0x2905   :  { %v1391_v36 = vpop.permute.xlu2 %1390 }
0x2906   :  { %v1393_v29 = vmul.f32 %v1391_v36, %v3624_v25 }
0x2908   :  { %1395 = vrot.lane.b32.xlu1 %v1393_v29, %s2809_s2 }
0x2920   :  { %v1606_v46 = vpop.f32.mrf.mxu0 }
0x2921   :  { %v1607_v17 = vadd.f32 %v3467_v58, %v1606_v46 }
0x2972   :  { %v2113_v11 = vpop.permute.xlu0 %2112 }
0x2973   :  { %2490 = vmatmul.msk.f32.vlgmr.msra.gmra.mxu3 %vm214_vm5, %v2113_v11  ;;  %2501 = vmatmul.msk.f32.gmra.mxu2 %vm214_vm5, %v2113_v11 }
0x297a   :  { %v1396_v2 = vpop.permute.xlu1 %1395 }
0x297b   :  { %2507 = vmatmul.msk.f32.vlgmr.msrb.gmra.mxu3 %vm2313_vm12, %v2300_v26  ;;  %v1398_v14 = vadd.f32 %v1396_v2, %v1388_v54 }
0x2983   :  { %2508 = vmatmul.msk.f32.gmra.mxu3 %vm2313_vm12, %v2301_v21 }
0x298b   :  { %2509 = vmatmul.msk.f32.gmra.mxu3 %vm2313_vm12, %v2302_v12 }
0x2993   :  { %2510 = vmatmul.msk.f32.gmra.mxu3 %vm2313_vm12, %v2303_v32 }
0x29f6   :  { %v2133_v27 = vpop.f32.mrf.mxu3  ;;  %v2288_v39 = vpop.f32.mrf.mxu2 }
0x29f7   :  { %v2136_v55 = vadd.f32 %v2133_v27, %v1607_v17  ;;  %v2289_v23 = vadd.f32 %v3643_v49, %v2288_v39 }
0x29f9   :  { %2751 = vtanh.f32 %v2136_v55  ;;  %v2304_v50 = vmax.f32 %v2289_v23, 0.0  ;;  %v2491_v10 = vmul.f32 -1.442695, %v2136_v55 }
0x29fa   :  { %2753 = vtanh.f32 %v1398_v14 }
0x29fb   :  { %2511 = vmatmul.msk.f32.gmra.mxu3 %vm2313_vm12, %v2304_v50  ;;  %2755 = vpow2.f32 %v2491_v10 }
0x29fe   :  { %v2370_v6 = vpop.f32.mrf.mxu3 }
0x29ff   :  { %v2752_v15 = vpop.eup %2751  ;;  %v2371_v58 = vadd.f32 %v3660_v52, %v2370_v6 }
0x2a00   :  { %2159 = vrot.lane.b32.xlu0 %v2752_v15, %s2808_s21  ;;  %v2754_v35 = vpop.eup %2753 }
0x2a01   :  { %2395 = vst.msk [vmem:[%s3768_s12 + $0x18] sm:$0xff] %vm2391_vm13, %v2371_v58  ;;  %v2756_v62 = vpop.eup %2755 }
0x2a02   :  { %v2140_v28 = vadd.f32 1.0, %v2756_v62 }
0x2a04   :  { %2757 = vrcp.f32 %v2140_v28  ;;  %v2152_v33 = vand.u32 2147483648, %v2140_v28  ;;  %vm2146_vm0 = vweird.f32 %v2140_v28  ;;  %v2150_v4 = vand.u32 2147483647, %v2140_v28 }
0x2a06   :  { %v2373_v56 = vpop.f32.mrf.mxu3  ;;  %v2153_v60 = vor.u32 1.1754944e-38, %v2152_v33  ;;  %vm2151_vm2 = vcmp.eq.f32.partialorder %v2150_v4, 8.507059e+37 }
0x2a07   :  { %v2374_v43 = vadd.f32 %v3660_v52, %v2373_v56 }
0x2a08   :  { %1401 = vrot.lane.b32.xlu0 %v2754_v35, %s2808_s21 }
0x2a09   :  { %2396 = vst.msk [vmem:[%s3768_s12 + $0x20] sm:$0xff] %vm2391_vm13, %v2374_v43 }
0x2a0a   :  { %v2758_v51 = vpop.eup %2757 }
0x2a0b   :  { %vm2147_vm15 = vweird.f32 %v2758_v51 }
0x2a0c   :  { %vm2148_vm1 = vmor %vm2146_vm0, %vm2147_vm15 }
0x2a0e   :  { %v2376_v45 = vpop.f32.mrf.mxu3 }
0x2a0f   :  { %v2377_v41 = vadd.f32 %v3660_v52, %v2376_v45 }
0x2a10   :  { %1518 = vrot.lane.b32.xlu0 %v3018_v53, %s2808_s21  ;;  %v2142_v53 = vmul.f32 %v2758_v51, %v2140_v28 }
0x2a11   :  { %2397 = vst.msk [vmem:[%s3768_s12 + $0x28] sm:$0xff] %vm2391_vm13, %v2377_v41 }
0x2a12   :  { %v2143_v13 = vsub.f32 1.0, %v2142_v53 }
0x2a14   :  { %v2144_v16 = vmul.f32 %v2758_v51, %v2143_v13 }
0x2a16   :  { %v2379_v7 = vpop.f32.mrf.mxu3  ;;  %v2145_v22 = vadd.f32 %v2758_v51, %v2144_v16 }
0x2a17   :  { %v2380_v48 = vadd.f32 %v3660_v52, %v2379_v7 }
0x2a18   :  { %v2149_v57 = vsel %vm2148_vm1, %v2758_v51, %v2145_v22 }
0x2a19   :  { %2398 = vst.msk [vmem:[%s3768_s12 + $0x30] sm:$0xff] %vm2391_vm13, %v2380_v48  ;;  %v2154_v34 = vsel %vm2151_vm2, %v2153_v60, %v2149_v57 }
0x2a1a   :  { %v2157_v24 = vmul.f32 %v2154_v34, %v3612_v59 }
0x2a72   :  { %v2160_v30 = vpop.permute.xlu0 %2159 }
0x2a73   :  { %v2162_v31 = vmul.f32 %v2160_v30, %v2154_v34 }
0x2a75   :  { %2164 = vrot.lane.b32.xlu2 %v2162_v31, %s2809_s2 }
0x2a7a   :  { %v1402_v47 = vpop.permute.xlu0 %1401 }
0x2a7b   :  { %v1404_v37 = vmul.f32 %v1402_v47, %v3624_v25 }
0x2a7d   :  { %1515 = vrot.lane.b32.xlu2 %v1404_v37, %s2809_s2 }
0x2a7e   :  { %v2382_v40 = vpop.f32.mrf.mxu3 }
0x2a7f   :  { %v2383_v61 = vadd.f32 %v3660_v52, %v2382_v40 }
0x2a81   :  { %2399 = vst.msk [vmem:[%s3768_s12 + $0x38] sm:$0xff] %vm2391_vm13, %v2383_v61 }
0x2a82   :  { %v1519_v0 = vpop.permute.xlu0 %1518 }
0x2acf   :  { %v2165_v36 = vpop.permute.xlu2 %2164 }
0x2ad0   :  { %v3695_v29 = vadd.f32 %v2165_v36, %v2157_v24 }
0x2ad2   :  { %2759 = vtanh.f32 %v3695_v29 }
0x2ad7   :  { %v1516_v11 = vpop.permute.xlu2 %1515 }
0x2ad8   :  { %v2760_v25 = vpop.eup %2759  ;;  %v1521_v8 = vsel %vm214_vm5, %v1516_v11, %v1519_v0 }
0x2ad9   :  { %2170 = vrot.lane.b32.xlu1 %v2760_v25, %s2808_s21  ;;  %2474 = vmatmul.msk.f32.gmra.mxu0 %vm1534_vm14, %v1521_v8 }
0x2b4b   :  { %v2171_v63 = vpop.permute.xlu1 %2170 }
0x2b4c   :  { %v2173_v26 = vmul.f32 %v2171_v63, %v2154_v34 }
0x2b4e   :  { %2175 = vrot.lane.b32.xlu1 %v2173_v26, %s2809_s2 }
0x2b56   :  { %v1609_v59 = vpop.f32.mrf.mxu0 }
0x2b57   :  { %v1610_v21 = vadd.f32 %v2777_v20, %v1609_v59 }
0x2bc0   :  { %v2176_v1 = vpop.permute.xlu1 %2175 }
0x2bc1   :  { %2492 = vmatmul.msk.f32.vlgmr.msra.gmra.mxu1 %vm214_vm5, %v2176_v1  ;;  %2502 = vmatmul.msk.f32.gmra.mxu2 %vm214_vm5, %v2176_v1 }
0x2bc2   :  { %2358 = vmatpush.msra.mxu1 %v3631_v19 }
0x2bc4   :  { %2359 = vmatpush.msra.mxu1 %v3636_v3 }
0x2bc9   :  { %2494 = vmatmul.msk.f32.vlgmr.msrb.gmra.mxu1 %vm214_vm5, %v3493_v5 }
0x2bd1   :  { %2495 = vmatmul.msk.f32.gmra.mxu1 %vm214_vm5, %v3513_v42 }
0x2bd9   :  { %2496 = vmatmul.msk.f32.gmra.mxu1 %vm214_vm5, %v3531_v38 }
0x2c3e   :  { %v2196_v18 = vpop.f32.mrf.mxu1 }
0x2c3f   :  { %v2199_v12 = vadd.f32 %v2196_v18, %v1610_v21 }
0x2c41   :  { %2761 = vtanh.f32 %v2199_v12  ;;  %v2493_v23 = vmul.f32 -1.442695, %v2199_v12 }
0x2c43   :  { %2763 = vpow2.f32 %v2493_v23 }
0x2c44   :  { %v2291_v19 = vpop.f32.mrf.mxu2 }
0x2c45   :  { %v2292_v3 = vadd.f32 %v3643_v49, %v2291_v19 }
0x2c46   :  { %v2267_v44 = vpop.f32.mrf.mxu1 }
0x2c47   :  { %v2762_v5 = vpop.eup %2761  ;;  %v2305_v9 = vmax.f32 %v2292_v3, 0.0  ;;  %v2268_v42 = vadd.f32 %v3643_v49, %v2267_v44 }
0x2c48   :  { %2222 = vrot.lane.b32.xlu2 %v2762_v5, %s2808_s21 }
0x2c49   :  { %v2297_v38 = vmax.f32 %v2268_v42, 0.0  ;;  %2512 = vmatmul.msk.f32.gmra.mxu3 %vm2313_vm12, %v2305_v9  ;;  %v2764_v50 = vpop.eup %2763 }
0x2c4a   :  { %v2203_v2 = vadd.f32 1.0, %v2764_v50 }
0x2c4b   :  { %2504 = vmatmul.msk.f32.vlgmr.msra.gmra.mxu1 %vm2313_vm12, %v2297_v38 }
0x2c4c   :  { %2765 = vrcp.f32 %v2203_v2  ;;  %v2215_v56 = vand.u32 2147483648, %v2203_v2  ;;  %vm2209_vm3 = vweird.f32 %v2203_v2  ;;  %v2213_v35 = vand.u32 2147483647, %v2203_v2 }
0x2c4e   :  { %v2270_v32 = vpop.f32.mrf.mxu1  ;;  %v2216_v45 = vor.u32 1.1754944e-38, %v2215_v56  ;;  %vm2214_vm6 = vcmp.eq.f32.partialorder %v2213_v35, 8.507059e+37 }
0x2c4f   :  { %v2271_v46 = vadd.f32 %v3643_v49, %v2270_v32 }
0x2c51   :  { %v2298_v17 = vmax.f32 %v2271_v46, 0.0 }
0x2c52   :  { %v2766_v54 = vpop.eup %2765 }
0x2c53   :  { %2505 = vmatmul.msk.f32.gmra.mxu1 %vm2313_vm12, %v2298_v17  ;;  %v2205_v14 = vmul.f32 %v2766_v54, %v2203_v2  ;;  %vm2210_vm14 = vweird.f32 %v2766_v54 }
0x2c54   :  { %vm2211_vm4 = vmor %vm2209_vm3, %vm2210_vm14 }
0x2c55   :  { %v2206_v6 = vsub.f32 1.0, %v2205_v14 }
0x2c56   :  { %v2273_v27 = vpop.f32.mrf.mxu1 }
0x2c57   :  { %v2274_v39 = vadd.f32 %v3643_v49, %v2273_v27  ;;  %v2207_v15 = vmul.f32 %v2766_v54, %v2206_v6 }
0x2c59   :  { %v2299_v55 = vmax.f32 %v2274_v39, 0.0  ;;  %v2208_v58 = vadd.f32 %v2766_v54, %v2207_v15 }
0x2c5b   :  { %2506 = vmatmul.msk.f32.gmra.mxu1 %vm2313_vm12, %v2299_v55  ;;  %v2212_v43 = vsel %vm2211_vm4, %v2766_v54, %v2208_v58 }
0x2c5c   :  { %v2217_v7 = vsel %vm2214_vm6, %v2216_v45, %v2212_v43 }
0x2c5d   :  { %v2220_v33 = vmul.f32 %v2217_v7, %v3695_v29 }
0x2ca2   :  { %v2223_v41 = vpop.permute.xlu2 %2222 }
0x2ca3   :  { %v2225_v48 = vmul.f32 %v2223_v41, %v2217_v7 }
0x2ca5   :  { %2227 = vrot.lane.b32.xlu0 %v2225_v48, %s2809_s2 }
0x2cc8   :  { %v2361_v10 = vpop.f32.mrf.mxu1 }
0x2cc9   :  { %v2362_v62 = vadd.f32 %v3660_v52, %v2361_v10 }
0x2ccb   :  { %2392 = vst.msk [vmem:[%s3768_s12] sm:$0xff] %vm2391_vm13, %v2362_v62 }
0x2ccc   :  { %v2385_v28 = vpop.f32.mrf.mxu3 }
0x2ccd   :  { %v2386_v51 = vadd.f32 %v3660_v52, %v2385_v28 }
0x2ccf   :  { %2400 = vst.msk [vmem:[%s3768_s12 + $0x40] sm:$0xff] %vm2391_vm13, %v2386_v51 }
0x2cd0   :  { %v2364_v53 = vpop.f32.mrf.mxu1 }
0x2cd1   :  { %v2365_v13 = vadd.f32 %v3660_v52, %v2364_v53 }
0x2cd3   :  { %2393 = vst.msk [vmem:[%s3768_s12 + $0x8] sm:$0xff] %vm2391_vm13, %v2365_v13 }
0x2cd8   :  { %v2367_v16 = vpop.f32.mrf.mxu1 }
0x2cd9   :  { %v2368_v22 = vadd.f32 %v3660_v52, %v2367_v16 }
0x2cdb   :  { %2394 = vst.msk [vmem:[%s3768_s12 + $0x10] sm:$0xff] %vm2391_vm13, %v2368_v22 }
0x2d17   :  { %v2228_v4 = vpop.permute.xlu0 %2227 }
0x2d18   :  { %v2230_v57 = vadd.f32 %v2228_v4, %v2220_v33 }
0x2d1a   :  { %2767 = vtanh.f32 %v2230_v57 }
0x2d20   :  { %v2768_v60 = vpop.eup %2767 }
0x2d21   :  { %2233 = vrot.lane.b32.xlu1 %v2768_v60, %s2808_s21 }
0x2d93   :  { %v2234_v30 = vpop.permute.xlu1 %2233 }
0x2d94   :  { %v2236_v34 = vmul.f32 %v2234_v30, %v2217_v7 }
0x2d96   :  { %2246 = vrot.lane.b32.xlu2 %v2236_v34, %s2809_s2 }
0x2df0   :  { %v2247_v31 = vpop.permute.xlu2 %2246 }
0x2df1   :  { %2503 = vmatmul.msk.f32.gmra.mxu2 %vm214_vm5, %v2247_v31 }
0x2e74   :  { %v2294_v47 = vpop.f32.mrf.mxu2 }
0x2e75   :  { %v2295_v37 = vadd.f32 %v3643_v49, %v2294_v47 }
0x2e77   :  { %v2306_v40 = vmax.f32 %v2295_v37, 0.0 }
0x2e79   :  { %2513 = vmatmul.msk.f32.gmra.mxu3 %vm2313_vm12, %v2306_v40 }
0x2efc   :  { %v2388_v61 = vpop.f32.mrf.mxu3 }
0x2efd   :  { %v2389_v24 = vadd.f32 %v3660_v52, %v2388_v61 }
0x2eff   :  { %2401 = vst.msk [vmem:[%s3768_s12 + $0x48] sm:$0xff] %vm2391_vm13, %v2389_v24 }
0x2f00   :  { %2406 = vsyncpa [#allocation4], 1 }

</bundles_post_ra>
